<compile_context>
chip_gen: v7x
topology: tpu7x:2x2x1
jax: 0.10.0
libtpu: 0.0.40
codegen_flags: <defaults>
</compile_context>

<pallas_src>
import jax
import jax.numpy as jnp
from jax.experimental import pallas as pl
from jax.experimental.pallas import tpu as pltpu


# ---------------------------------------------------------------------------
# Kernel
# ---------------------------------------------------------------------------
def _transpose2d_kernel(x_ref, o_ref):
    # x tile: (tm, tn)  ->  o tile: (tn, tm); lowers to XLU vxpose.
    o_ref[...] = x_ref[...].T


# ---------------------------------------------------------------------------
# Tile selection
# ---------------------------------------------------------------------------
_FULL_EXTENT_CAP = 2048                     # dims up to this may be taken whole
_TILE_CANDS = (2048, 1024, 512, 256, 128)   # multiples of 128: lane- and
                                            # sublane-safe for f32/bf16/int8
_MAX_TILE_BYTES = 4 << 20                   # per-block; x4 (double-buffered
                                            # in + out) stays inside VMEM on
                                            # v5e/v6e/v7x with the limit bump
_PALLAS_MIN_BYTES = 1 << 18                 # below this, launch overhead wins


def _dim_options(dim):
    opts = [dim] if dim <= _FULL_EXTENT_CAP else []
    opts += [t for t in _TILE_CANDS if t < dim]
    return opts or [dim]


def _select_tiles(M, N, itemsize):
    """Pick (tm, tn) for input blocks (tm, tn) / output blocks (tn, tm)."""
    best_score, best = None, (min(M, 128), min(N, 128))
    for tm in _dim_options(M):
        for tn in _dim_options(N):
            if tm * tn * itemsize > _MAX_TILE_BYTES:
                continue
            # Priority: contiguous output writes (tm == M), then contiguous
            # input reads (tn == N), then the biggest tile (fewest grid steps,
            # lower per-step pipeline overhead).
            score = (tm == M, tn == N, tm * tn)
            if best_score is None or score > best_score:
                best_score, best = score, (tm, tn)
    tm, tn = best

    # Keep >= 2 grid blocks on big single-block cases so v7x megacore sharding
    # and double-buffered pipelining still have work to split.
    if pl.cdiv(M, tm) == 1 and pl.cdiv(N, tn) == 1 and M * N * itemsize > (4 << 20):
        m_half = [t for t in _TILE_CANDS if t <= M // 2]
        n_half = [t for t in _TILE_CANDS if t <= N // 2]
        if m_half:
            tm = m_half[0]
        elif n_half:
            tn = n_half[0]
    return tm, tn


# ---------------------------------------------------------------------------
# Pallas 2-D transpose
# ---------------------------------------------------------------------------
def _transpose2d(x2d):
    """(M, N) -> (N, M) via a tiled, auto-pipelined Pallas kernel."""
    M, N = x2d.shape
    itemsize = jnp.dtype(x2d.dtype).itemsize
    tm, tn = _select_tiles(M, N, itemsize)
    grid = (pl.cdiv(M, tm), pl.cdiv(N, tn))

    # Pallas double-buffers both the input and the output block; add slack for
    # Mosaic internals.  Never below the smallest default (v5e: 16 MiB) and
    # comfortably under v7x's 64 MiB physical VMEM.
    tile_bytes = tm * tn * itemsize
    vmem_limit = int(min(max(4 * tile_bytes + (2 << 20), 16 << 20), 48 << 20))

    return pl.pallas_call(
        _transpose2d_kernel,
        out_shape=jax.ShapeDtypeStruct((N, M), x2d.dtype),
        grid=grid,
        in_specs=[pl.BlockSpec((tm, tn), lambda i, j: (i, j))],
        out_specs=pl.BlockSpec((tn, tm), lambda i, j: (j, i)),
        compiler_params=pltpu.CompilerParams(
            dimension_semantics=("parallel", "parallel"),
            vmem_limit_bytes=vmem_limit,
        ),
        cost_estimate=pl.CostEstimate(
            flops=0, transcendentals=0,
            bytes_accessed=2 * M * N * itemsize),
    )(x2d)


# ---------------------------------------------------------------------------
# Forward pass: x.permute(2, 0, 1)
# ---------------------------------------------------------------------------
def permute_201(x):
    """out[c, a, b] = x[a, b, c]  (torch `x.permute(2, 0, 1)`)."""
    A, B, C = x.shape
    M, N = A * B, C
    # Lane-sparse output blocks (M < 128 -> masked partial stores) or tiny
    # tensors (launch overhead dominates): plain XLA transpose is faster.
    if M < 128 or N < 8 or x.size * jnp.dtype(x.dtype).itemsize < _PALLAS_MIN_BYTES:
        return jnp.transpose(x, (2, 0, 1))
    x2d = x.reshape(M, N)              # metadata-only for contiguous arrays
    out2d = _transpose2d(x2d)          # (C, A*B)
    return out2d.reshape(C, A, B)      # metadata-only


if __name__ == "__main__":
    key = jax.random.PRNGKey(0)

    # Small shape consistent with the module: rank-3 input (A=2, B=4, C=16).
    # (Takes the lane-sparse fallback path by design.)
    x_small = jax.random.normal(key, (2, 4, 16), dtype=jnp.float32)
    out_small = jax.block_until_ready(permute_201(x_small))
    ref_small = jnp.transpose(x_small, (2, 0, 1))
    assert out_small.shape == (16, 2, 4), out_small.shape
    assert jnp.array_equal(out_small, ref_small), "mismatch vs reference (small)"

    # Large enough for the Pallas path: M = A*B = 512, full-extent tiles
    # (tm = 512, tn = 1024) -> one fully contiguous block.
    x_med = jax.random.normal(jax.random.PRNGKey(1), (16, 32, 1024),
                              dtype=jnp.float32)
    out_med = jax.block_until_ready(permute_201(x_med))
    ref_med = jnp.transpose(x_med, (2, 0, 1))
    assert out_med.shape == (1024, 16, 32), out_med.shape
    assert jnp.array_equal(out_med, ref_med), "mismatch vs reference (pallas)"

    # Exercises the multi-block, pipelined path: tm = 512 (full extent, so
    # every output block write is one contiguous slab), tn = 2048 -> grid (1, 2).
    x_big = jax.random.normal(jax.random.PRNGKey(2), (16, 32, 4096),
                              dtype=jnp.float32)
    out_big = jax.block_until_ready(permute_201(x_big))
    ref_big = jnp.transpose(x_big, (2, 0, 1))
    assert out_big.shape == (4096, 16, 32), out_big.shape
    assert jnp.array_equal(out_big, ref_big), "mismatch vs reference (tiled)"

    print("KERNEL_OK")
</pallas_src>

<mosaic_0001>
module attributes {stable_mosaic.version = 11 : i64} {
  func.func @_transpose2d_kernel(%arg0: i32, %arg1: i32, %arg2: memref<512x1024xf32, #tpu.memory_space<vmem>>, %arg3: memref<1024x512xf32, #tpu.memory_space<vmem>>) attributes {dimension_semantics = [#tpu.dimension_semantics<parallel>, #tpu.dimension_semantics<parallel>], iteration_bounds = array<i64: 1, 1>, scalar_prefetch = 0 : i64, scratch_operands = 0 : i64, tpu.core_type = #tpu.core_type<tc>, window_params = [{transform_indices = @transform_0, window_bounds = array<i64: 512, 1024>}, {transform_indices = @transform_1, window_bounds = array<i64: 1024, 512>}]} {
    %c0 = arith.constant 0 : index
    %c0_0 = arith.constant 0 : index
    %0 = vector.load %arg2[%c0, %c0_0] : memref<512x1024xf32, #tpu.memory_space<vmem>>, vector<512x1024xf32>
    %1 = tpu.transpose %0, [1, 0] : vector<512x1024xf32> -> vector<1024x512xf32>
    %c0_1 = arith.constant 0 : index
    %c0_2 = arith.constant 0 : index
    %2 = vector.load %arg3[%c0_1, %c0_2] : memref<1024x512xf32, #tpu.memory_space<vmem>>, vector<1024x512xf32>
    tpu.vector_store %arg3[%c0_1, %c0_2], %1 {strides = array<i32>} : memref<1024x512xf32, #tpu.memory_space<vmem>>, vector<1024x512xf32>,
    return
  }
  func.func @transform_0(%arg0: i32, %arg1: i32) -> (i32, i32) {
    %c0_i32 = arith.constant 0 : i32
    return %arg0, %arg1 : i32, i32
  }
  func.func @transform_1(%arg0: i32, %arg1: i32) -> (i32, i32) {
    %c0_i32 = arith.constant 0 : i32
    return %arg1, %arg0 : i32, i32
  }
}

</mosaic_0001>

<bundles_post_ra>
// kernel: tpu_custom_call.1
= control target key start
LH: loop header
LB: loop body
LE: loop exit
PB: predicated region body
PF: predicated region fallthrough
CT: control target
= control target key end

     0   :  { %6 = vsyncpa [#allocation3], 0  ;;  %s2182_s0 = inlined_call_operand.hbm [shape: f32[512,1024], index: 0, kind: input, shape index: {}]   ;;  %s2183_s1 = inlined_call_operand.hbm [shape: f32[1024,512], index: 1, kind: output, shape index: {}]  }
   0x1   :  { %7 = vsyncpa [#allocation4], 0  ;;  %s2142_s6 = smov [#allocation2]   ;;  %s2094_s10 = scalar_lea.hbm %s2182_s0, 65536 }
   0x2   :  { %s13_s7 = sshll.u32 %s2142_s6, 4  ;;  %p2095_p0 = scmp.ne.s32.totalorder %s2182_s0, %s2094_s10  ;;  %s14_s7 = int_to_ptr.vmem [resolvable:$true] %s13_s7 }
   0x3   :  { %p2098_p1 = scmp.lt.u32.totalorder %s2094_s10, %s2182_s0 }
   0x5   :  { %p2100_p2 = pnand %p2098_p1, %p2095_p0 }
   0x7   :  { %2103 = shalt.err (!%p2100_p2)
}
   0x8   :  { %s2104_s15 = scalar_lea.vmem %s14_s7, 65536  ;;  %p2109_p4 = scmp.lt.s32.totalorder %s14_s7, %s14_s7 }
   0x9   :  { %p2105_p3 = scmp.ne.s32.totalorder %s14_s7, %s2104_s15  ;;  %p2110_p5 = scmp.lt.s32.totalorder %s2104_s15, %s2104_s15 }
   0xb   :  { %p2111_p6 = por %p2110_p5, %p2109_p4 }
   0xd   :  { %p2112_p7 = pnand %p2111_p6, %p2105_p3 }
   0xf   :  { %2115 = shalt.err (!%p2112_p7)
}
  0x10   :  { %s2143_s16 = smov 1024   ;;  %s2144_s17 = smov 64  }
  0x11   :  { %19 = dma.hbm_to_vmem [thread:$0]  %s2182_s0, 65536, %s14_s7, [#allocation3], %s2143_s16, %s2143_s16, %s2144_s17  }
  0x12   :  { %2138 = dma.done.wait [#allocation3], 65536  }
  0x13   :  { %2139 = vsyncadd [#allocation3], 4294901760  ;;  %v24_v0 = vld [vmem:[#allocation2 + $0x8] sm:$0xff]  ;;  %v23_v1 = vld [vmem:[#allocation2] sm:$0xff]  ;;  %s2145_s0 = smov [#allocation5]  }
  0x14   :  { %567 = vxpose.xlu1.b32.start [1/16] %v24_v0, 128  ;;  %535 = vxpose.xlu0.b32.start [1/16] %v23_v1, 128  ;;  %v32_v2 = vld [vmem:[#allocation2 + $0x48] sm:$0xff]  ;;  %v31_v3 = vld [vmem:[#allocation2 + $0x40] sm:$0xff]  ;;  %v26_v32 = vld [vmem:[#allocation2 + $0x18] sm:$0xff]  ;;  %s2076_s20 = sshll.u32 %s2145_s0, 4  ;;  %s2077_s20 = int_to_ptr.vmem [resolvable:$true] %s2076_s20 }
  0x15   :  { %v40_v4 = vld [vmem:[#allocation2 + $0x88] sm:$0xff]  ;;  %v39_v5 = vld [vmem:[#allocation2 + $0x80] sm:$0xff]  ;;  %v25_v33 = vld [vmem:[#allocation2 + $0x10] sm:$0xff]  ;;  %s2116_s21 = scalar_lea.vmem %s2077_s20, 65536  ;;  %p2121_p9 = scmp.lt.s32.totalorder %s2077_s20, %s2077_s20 }
  0x16   :  { %v48_v6 = vld [vmem:[#allocation2 + $0xc8] sm:$0xff]  ;;  %v47_v7 = vld [vmem:[#allocation2 + $0xc0] sm:$0xff]  ;;  %v34_v34 = vld [vmem:[#allocation2 + $0x58] sm:$0xff]  ;;  %p2117_p8 = scmp.ne.s32.totalorder %s2077_s20, %s2116_s21  ;;  %p2122_p10 = scmp.lt.s32.totalorder %s2116_s21, %s2116_s21 }
  0x17   :  { %v56_v8 = vld [vmem:[#allocation2 + $0x108] sm:$0xff]  ;;  %v55_v9 = vld [vmem:[#allocation2 + $0x100] sm:$0xff]  ;;  %v33_v35 = vld [vmem:[#allocation2 + $0x50] sm:$0xff] }
  0x18   :  { %568 = vxpose.xlu1.b32.cont [2/16] %v32_v2, 128  ;;  %536 = vxpose.xlu0.b32.cont [2/16] %v31_v3, 128  ;;  %v64_v10 = vld [vmem:[#allocation2 + $0x148] sm:$0xff]  ;;  %v63_v11 = vld [vmem:[#allocation2 + $0x140] sm:$0xff]  ;;  %v42_v36 = vld [vmem:[#allocation2 + $0x98] sm:$0xff]  ;;  %p2123_p11 = por %p2122_p10, %p2121_p9 }
  0x19   :  { %v72_v12 = vld [vmem:[#allocation2 + $0x188] sm:$0xff]  ;;  %v71_v13 = vld [vmem:[#allocation2 + $0x180] sm:$0xff]  ;;  %v41_v37 = vld [vmem:[#allocation2 + $0x90] sm:$0xff] }
  0x1a   :  { %v80_v14 = vld [vmem:[#allocation2 + $0x1c8] sm:$0xff]  ;;  %v79_v15 = vld [vmem:[#allocation2 + $0x1c0] sm:$0xff]  ;;  %v50_v38 = vld [vmem:[#allocation2 + $0xd8] sm:$0xff]  ;;  %p2124_p12 = pnand %p2123_p11, %p2117_p8 }
  0x1b   :  { %v88_v16 = vld [vmem:[#allocation2 + $0x208] sm:$0xff]  ;;  %v87_v17 = vld [vmem:[#allocation2 + $0x200] sm:$0xff]  ;;  %v49_v39 = vld [vmem:[#allocation2 + $0xd0] sm:$0xff] }
  0x1c   :  { %569 = vxpose.xlu1.b32.cont [3/16] %v40_v4, 128  ;;  %537 = vxpose.xlu0.b32.cont [3/16] %v39_v5, 128  ;;  %v96_v18 = vld [vmem:[#allocation2 + $0x248] sm:$0xff]  ;;  %v95_v19 = vld [vmem:[#allocation2 + $0x240] sm:$0xff]  ;;  %v58_v40 = vld [vmem:[#allocation2 + $0x118] sm:$0xff] }
  0x1d   :  { %v104_v20 = vld [vmem:[#allocation2 + $0x288] sm:$0xff]  ;;  %v103_v21 = vld [vmem:[#allocation2 + $0x280] sm:$0xff]  ;;  %v57_v41 = vld [vmem:[#allocation2 + $0x110] sm:$0xff] }
  0x1e   :  { %v112_v22 = vld [vmem:[#allocation2 + $0x2c8] sm:$0xff]  ;;  %v111_v23 = vld [vmem:[#allocation2 + $0x2c0] sm:$0xff]  ;;  %v66_v42 = vld [vmem:[#allocation2 + $0x158] sm:$0xff] }
  0x1f   :  { %v120_v24 = vld [vmem:[#allocation2 + $0x308] sm:$0xff]  ;;  %v119_v25 = vld [vmem:[#allocation2 + $0x300] sm:$0xff]  ;;  %v65_v43 = vld [vmem:[#allocation2 + $0x150] sm:$0xff] }
  0x20   :  { %570 = vxpose.xlu1.b32.cont [4/16] %v48_v6, 128  ;;  %538 = vxpose.xlu0.b32.cont [4/16] %v47_v7, 128  ;;  %v128_v26 = vld [vmem:[#allocation2 + $0x348] sm:$0xff]  ;;  %v127_v27 = vld [vmem:[#allocation2 + $0x340] sm:$0xff]  ;;  %v74_v44 = vld [vmem:[#allocation2 + $0x198] sm:$0xff] }
  0x21   :  { %v136_v28 = vld [vmem:[#allocation2 + $0x388] sm:$0xff]  ;;  %v135_v29 = vld [vmem:[#allocation2 + $0x380] sm:$0xff]  ;;  %v73_v45 = vld [vmem:[#allocation2 + $0x190] sm:$0xff] }
  0x22   :  { %v144_v30 = vld [vmem:[#allocation2 + $0x3c8] sm:$0xff]  ;;  %v143_v31 = vld [vmem:[#allocation2 + $0x3c0] sm:$0xff]  ;;  %v82_v46 = vld [vmem:[#allocation2 + $0x1d8] sm:$0xff] }
  0x23   :  { %v81_v47 = vld [vmem:[#allocation2 + $0x1d0] sm:$0xff]  ;;  %v90_v48 = vld [vmem:[#allocation2 + $0x218] sm:$0xff]  ;;  %v28_v0 = vld [vmem:[#allocation2 + $0x28] sm:$0xff] }
  0x24   :  { %571 = vxpose.xlu1.b32.cont [5/16] %v56_v8, 128  ;;  %539 = vxpose.xlu0.b32.cont [5/16] %v55_v9, 128  ;;  %v89_v49 = vld [vmem:[#allocation2 + $0x210] sm:$0xff]  ;;  %v98_v50 = vld [vmem:[#allocation2 + $0x258] sm:$0xff]  ;;  %v27_v1 = vld [vmem:[#allocation2 + $0x20] sm:$0xff] }
  0x25   :  { %v97_v51 = vld [vmem:[#allocation2 + $0x250] sm:$0xff]  ;;  %v106_v52 = vld [vmem:[#allocation2 + $0x298] sm:$0xff]  ;;  %v36_v4 = vld [vmem:[#allocation2 + $0x68] sm:$0xff] }
  0x26   :  { %v105_v53 = vld [vmem:[#allocation2 + $0x290] sm:$0xff]  ;;  %v114_v54 = vld [vmem:[#allocation2 + $0x2d8] sm:$0xff]  ;;  %v35_v5 = vld [vmem:[#allocation2 + $0x60] sm:$0xff] }
  0x27   :  { %v113_v55 = vld [vmem:[#allocation2 + $0x2d0] sm:$0xff]  ;;  %v122_v56 = vld [vmem:[#allocation2 + $0x318] sm:$0xff]  ;;  %v44_v8 = vld [vmem:[#allocation2 + $0xa8] sm:$0xff] }
  0x28   :  { %572 = vxpose.xlu1.b32.cont [6/16] %v64_v10, 128  ;;  %540 = vxpose.xlu0.b32.cont [6/16] %v63_v11, 128  ;;  %v121_v57 = vld [vmem:[#allocation2 + $0x310] sm:$0xff]  ;;  %v130_v58 = vld [vmem:[#allocation2 + $0x358] sm:$0xff]  ;;  %v43_v9 = vld [vmem:[#allocation2 + $0xa0] sm:$0xff] }
  0x29   :  { %v129_v59 = vld [vmem:[#allocation2 + $0x350] sm:$0xff]  ;;  %v138_v60 = vld [vmem:[#allocation2 + $0x398] sm:$0xff] }
  0x2a   :  { %v137_v61 = vld [vmem:[#allocation2 + $0x390] sm:$0xff]  ;;  %v146_v62 = vld [vmem:[#allocation2 + $0x3d8] sm:$0xff] }
  0x2b   :  { %v145_v63 = vld [vmem:[#allocation2 + $0x3d0] sm:$0xff] }
  0x2c   :  { %573 = vxpose.xlu1.b32.cont [7/16] %v72_v12, 128  ;;  %541 = vxpose.xlu0.b32.cont [7/16] %v71_v13, 128  ;;  %v52_v12 = vld [vmem:[#allocation2 + $0xe8] sm:$0xff]  ;;  %v51_v13 = vld [vmem:[#allocation2 + $0xe0] sm:$0xff] }
  0x30   :  { %574 = vxpose.xlu1.b32.cont [8/16] %v80_v14, 128  ;;  %542 = vxpose.xlu0.b32.cont [8/16] %v79_v15, 128 }
  0x34   :  { %575 = vxpose.xlu1.b32.cont [9/16] %v88_v16, 128  ;;  %543 = vxpose.xlu0.b32.cont [9/16] %v87_v17, 128  ;;  %v60_v16 = vld [vmem:[#allocation2 + $0x128] sm:$0xff]  ;;  %v59_v17 = vld [vmem:[#allocation2 + $0x120] sm:$0xff] }
  0x38   :  { %576 = vxpose.xlu1.b32.cont [10/16] %v96_v18, 128  ;;  %544 = vxpose.xlu0.b32.cont [10/16] %v95_v19, 128 }
  0x3c   :  { %577 = vxpose.xlu1.b32.cont [11/16] %v104_v20, 128  ;;  %545 = vxpose.xlu0.b32.cont [11/16] %v103_v21, 128  ;;  %v68_v20 = vld [vmem:[#allocation2 + $0x168] sm:$0xff]  ;;  %v67_v21 = vld [vmem:[#allocation2 + $0x160] sm:$0xff] }
  0x40   :  { %578 = vxpose.xlu1.b32.cont [12/16] %v112_v22, 128  ;;  %546 = vxpose.xlu0.b32.cont [12/16] %v111_v23, 128 }
  0x44   :  { %579 = vxpose.xlu1.b32.cont [13/16] %v120_v24, 128  ;;  %547 = vxpose.xlu0.b32.cont [13/16] %v119_v25, 128  ;;  %v76_v24 = vld [vmem:[#allocation2 + $0x1a8] sm:$0xff]  ;;  %v75_v25 = vld [vmem:[#allocation2 + $0x1a0] sm:$0xff] }
  0x48   :  { %580 = vxpose.xlu1.b32.cont [14/16] %v128_v26, 128  ;;  %548 = vxpose.xlu0.b32.cont [14/16] %v127_v27, 128 }
  0x4c   :  { %581 = vxpose.xlu1.b32.cont [15/16] %v136_v28, 128  ;;  %549 = vxpose.xlu0.b32.cont [15/16] %v135_v29, 128  ;;  %v84_v28 = vld [vmem:[#allocation2 + $0x1e8] sm:$0xff]  ;;  %v83_v29 = vld [vmem:[#allocation2 + $0x1e0] sm:$0xff] }
  0x50   :  { %582 = vxpose.xlu1.b32.end [16/16] %v144_v30, 128  ;;  %550 = vxpose.xlu0.b32.end [16/16] %v143_v31, 128 }
  0x54   :  { %631 = vxpose.xlu1.b32.start [1/16] %v26_v32, 128  ;;  %599 = vxpose.xlu0.b32.start [1/16] %v25_v33, 128  ;;  %v92_v32 = vld [vmem:[#allocation2 + $0x228] sm:$0xff]  ;;  %v91_v33 = vld [vmem:[#allocation2 + $0x220] sm:$0xff] }
  0x58   :  { %632 = vxpose.xlu1.b32.cont [2/16] %v34_v34, 128  ;;  %600 = vxpose.xlu0.b32.cont [2/16] %v33_v35, 128 }
  0x5c   :  { %633 = vxpose.xlu1.b32.cont [3/16] %v42_v36, 128  ;;  %601 = vxpose.xlu0.b32.cont [3/16] %v41_v37, 128  ;;  %v100_v36 = vld [vmem:[#allocation2 + $0x268] sm:$0xff]  ;;  %v99_v37 = vld [vmem:[#allocation2 + $0x260] sm:$0xff] }
  0x60   :  { %634 = vxpose.xlu1.b32.cont [4/16] %v50_v38, 128  ;;  %602 = vxpose.xlu0.b32.cont [4/16] %v49_v39, 128 }
  0x64   :  { %635 = vxpose.xlu1.b32.cont [5/16] %v58_v40, 128  ;;  %603 = vxpose.xlu0.b32.cont [5/16] %v57_v41, 128  ;;  %v108_v40 = vld [vmem:[#allocation2 + $0x2a8] sm:$0xff]  ;;  %v107_v41 = vld [vmem:[#allocation2 + $0x2a0] sm:$0xff] }
  0x68   :  { %636 = vxpose.xlu1.b32.cont [6/16] %v66_v42, 128  ;;  %604 = vxpose.xlu0.b32.cont [6/16] %v65_v43, 128 }
  0x6c   :  { %637 = vxpose.xlu1.b32.cont [7/16] %v74_v44, 128  ;;  %605 = vxpose.xlu0.b32.cont [7/16] %v73_v45, 128  ;;  %v116_v44 = vld [vmem:[#allocation2 + $0x2e8] sm:$0xff]  ;;  %v115_v45 = vld [vmem:[#allocation2 + $0x2e0] sm:$0xff] }
  0x70   :  { %638 = vxpose.xlu1.b32.cont [8/16] %v82_v46, 128  ;;  %606 = vxpose.xlu0.b32.cont [8/16] %v81_v47, 128 }
  0x74   :  { %639 = vxpose.xlu1.b32.cont [9/16] %v90_v48, 128  ;;  %607 = vxpose.xlu0.b32.cont [9/16] %v89_v49, 128  ;;  %v124_v48 = vld [vmem:[#allocation2 + $0x328] sm:$0xff]  ;;  %v123_v49 = vld [vmem:[#allocation2 + $0x320] sm:$0xff] }
  0x78   :  { %640 = vxpose.xlu1.b32.cont [10/16] %v98_v50, 128  ;;  %608 = vxpose.xlu0.b32.cont [10/16] %v97_v51, 128 }
  0x7c   :  { %641 = vxpose.xlu1.b32.cont [11/16] %v106_v52, 128  ;;  %609 = vxpose.xlu0.b32.cont [11/16] %v105_v53, 128  ;;  %v132_v52 = vld [vmem:[#allocation2 + $0x368] sm:$0xff]  ;;  %v131_v53 = vld [vmem:[#allocation2 + $0x360] sm:$0xff] }
  0x80   :  { %642 = vxpose.xlu1.b32.cont [12/16] %v114_v54, 128  ;;  %610 = vxpose.xlu0.b32.cont [12/16] %v113_v55, 128 }
  0x84   :  { %643 = vxpose.xlu1.b32.cont [13/16] %v122_v56, 128  ;;  %611 = vxpose.xlu0.b32.cont [13/16] %v121_v57, 128  ;;  %v140_v56 = vld [vmem:[#allocation2 + $0x3a8] sm:$0xff]  ;;  %v139_v57 = vld [vmem:[#allocation2 + $0x3a0] sm:$0xff] }
  0x88   :  { %644 = vxpose.xlu1.b32.cont [14/16] %v130_v58, 128  ;;  %612 = vxpose.xlu0.b32.cont [14/16] %v129_v59, 128 }
  0x8c   :  { %645 = vxpose.xlu1.b32.cont [15/16] %v138_v60, 128  ;;  %613 = vxpose.xlu0.b32.cont [15/16] %v137_v61, 128  ;;  %v148_v60 = vld [vmem:[#allocation2 + $0x3e8] sm:$0xff]  ;;  %v147_v61 = vld [vmem:[#allocation2 + $0x3e0] sm:$0xff] }
  0x90   :  { %646 = vxpose.xlu1.b32.end [16/16] %v146_v62, 128  ;;  %614 = vxpose.xlu0.b32.end [16/16] %v145_v63, 128 }
  0x94   :  { %695 = vxpose.xlu1.b32.start [1/16] %v28_v0, 128  ;;  %v583_v2 = vpop.trf.xlu1  ;;  %663 = vxpose.xlu0.b32.start [1/16] %v27_v1, 128  ;;  %v551_v3 = vpop.trf.xlu0  ;;  %v30_v0 = vld [vmem:[#allocation2 + $0x38] sm:$0xff]  ;;  %v29_v1 = vld [vmem:[#allocation2 + $0x30] sm:$0xff] }
  0x95   :  { %1623 = vst [vmem:[#allocation5 + $0x200] sm:$0xff] %v583_v2  ;;  %1559 = vst [vmem:[#allocation5] sm:$0xff] %v551_v3 }
  0x98   :  { %696 = vxpose.xlu1.b32.cont [2/16] %v36_v4, 128  ;;  %v584_v6 = vpop.trf.xlu1  ;;  %664 = vxpose.xlu0.b32.cont [2/16] %v35_v5, 128  ;;  %v552_v7 = vpop.trf.xlu0  ;;  %v38_v4 = vld [vmem:[#allocation2 + $0x78] sm:$0xff]  ;;  %v37_v5 = vld [vmem:[#allocation2 + $0x70] sm:$0xff] }
  0x99   :  { %1627 = vst [vmem:[#allocation5 + $0x220] sm:$0xff] %v584_v6  ;;  %1563 = vst [vmem:[#allocation5 + $0x20] sm:$0xff] %v552_v7 }
  0x9c   :  { %697 = vxpose.xlu1.b32.cont [3/16] %v44_v8, 128  ;;  %v585_v10 = vpop.trf.xlu1  ;;  %665 = vxpose.xlu0.b32.cont [3/16] %v43_v9, 128  ;;  %v553_v11 = vpop.trf.xlu0  ;;  %v46_v8 = vld [vmem:[#allocation2 + $0xb8] sm:$0xff]  ;;  %v45_v9 = vld [vmem:[#allocation2 + $0xb0] sm:$0xff] }
  0x9d   :  { %1631 = vst [vmem:[#allocation5 + $0x240] sm:$0xff] %v585_v10  ;;  %1567 = vst [vmem:[#allocation5 + $0x40] sm:$0xff] %v553_v11 }
  0xa0   :  { %698 = vxpose.xlu1.b32.cont [4/16] %v52_v12, 128  ;;  %v586_v14 = vpop.trf.xlu1  ;;  %666 = vxpose.xlu0.b32.cont [4/16] %v51_v13, 128  ;;  %v554_v15 = vpop.trf.xlu0  ;;  %v54_v12 = vld [vmem:[#allocation2 + $0xf8] sm:$0xff]  ;;  %v53_v13 = vld [vmem:[#allocation2 + $0xf0] sm:$0xff] }
  0xa1   :  { %1635 = vst [vmem:[#allocation5 + $0x260] sm:$0xff] %v586_v14  ;;  %1571 = vst [vmem:[#allocation5 + $0x60] sm:$0xff] %v554_v15 }
  0xa4   :  { %699 = vxpose.xlu1.b32.cont [5/16] %v60_v16, 128  ;;  %v587_v18 = vpop.trf.xlu1  ;;  %667 = vxpose.xlu0.b32.cont [5/16] %v59_v17, 128  ;;  %v555_v19 = vpop.trf.xlu0  ;;  %v62_v16 = vld [vmem:[#allocation2 + $0x138] sm:$0xff]  ;;  %v61_v17 = vld [vmem:[#allocation2 + $0x130] sm:$0xff] }
  0xa5   :  { %1639 = vst [vmem:[#allocation5 + $0x280] sm:$0xff] %v587_v18  ;;  %1575 = vst [vmem:[#allocation5 + $0x80] sm:$0xff] %v555_v19 }
  0xa8   :  { %700 = vxpose.xlu1.b32.cont [6/16] %v68_v20, 128  ;;  %v588_v22 = vpop.trf.xlu1  ;;  %668 = vxpose.xlu0.b32.cont [6/16] %v67_v21, 128  ;;  %v556_v23 = vpop.trf.xlu0  ;;  %v70_v20 = vld [vmem:[#allocation2 + $0x178] sm:$0xff]  ;;  %v69_v21 = vld [vmem:[#allocation2 + $0x170] sm:$0xff] }
  0xa9   :  { %1643 = vst [vmem:[#allocation5 + $0x2a0] sm:$0xff] %v588_v22  ;;  %1579 = vst [vmem:[#allocation5 + $0xa0] sm:$0xff] %v556_v23 }
  0xac   :  { %701 = vxpose.xlu1.b32.cont [7/16] %v76_v24, 128  ;;  %v589_v26 = vpop.trf.xlu1  ;;  %669 = vxpose.xlu0.b32.cont [7/16] %v75_v25, 128  ;;  %v557_v27 = vpop.trf.xlu0  ;;  %v78_v24 = vld [vmem:[#allocation2 + $0x1b8] sm:$0xff]  ;;  %v77_v25 = vld [vmem:[#allocation2 + $0x1b0] sm:$0xff] }
  0xad   :  { %1647 = vst [vmem:[#allocation5 + $0x2c0] sm:$0xff] %v589_v26  ;;  %1583 = vst [vmem:[#allocation5 + $0xc0] sm:$0xff] %v557_v27 }
  0xb0   :  { %702 = vxpose.xlu1.b32.cont [8/16] %v84_v28, 128  ;;  %v590_v30 = vpop.trf.xlu1  ;;  %670 = vxpose.xlu0.b32.cont [8/16] %v83_v29, 128  ;;  %v558_v31 = vpop.trf.xlu0  ;;  %v86_v28 = vld [vmem:[#allocation2 + $0x1f8] sm:$0xff]  ;;  %v85_v29 = vld [vmem:[#allocation2 + $0x1f0] sm:$0xff] }
  0xb1   :  { %1651 = vst [vmem:[#allocation5 + $0x2e0] sm:$0xff] %v590_v30  ;;  %1587 = vst [vmem:[#allocation5 + $0xe0] sm:$0xff] %v558_v31 }
  0xb4   :  { %703 = vxpose.xlu1.b32.cont [9/16] %v92_v32, 128  ;;  %v591_v34 = vpop.trf.xlu1  ;;  %671 = vxpose.xlu0.b32.cont [9/16] %v91_v33, 128  ;;  %v559_v35 = vpop.trf.xlu0  ;;  %v94_v32 = vld [vmem:[#allocation2 + $0x238] sm:$0xff]  ;;  %v93_v33 = vld [vmem:[#allocation2 + $0x230] sm:$0xff] }
  0xb5   :  { %1655 = vst [vmem:[#allocation5 + $0x300] sm:$0xff] %v591_v34  ;;  %1591 = vst [vmem:[#allocation5 + $0x100] sm:$0xff] %v559_v35 }
  0xb8   :  { %704 = vxpose.xlu1.b32.cont [10/16] %v100_v36, 128  ;;  %v592_v38 = vpop.trf.xlu1  ;;  %672 = vxpose.xlu0.b32.cont [10/16] %v99_v37, 128  ;;  %v560_v39 = vpop.trf.xlu0  ;;  %v102_v36 = vld [vmem:[#allocation2 + $0x278] sm:$0xff]  ;;  %v101_v37 = vld [vmem:[#allocation2 + $0x270] sm:$0xff] }
  0xb9   :  { %1659 = vst [vmem:[#allocation5 + $0x320] sm:$0xff] %v592_v38  ;;  %1595 = vst [vmem:[#allocation5 + $0x120] sm:$0xff] %v560_v39 }
  0xbc   :  { %705 = vxpose.xlu1.b32.cont [11/16] %v108_v40, 128  ;;  %v593_v42 = vpop.trf.xlu1  ;;  %673 = vxpose.xlu0.b32.cont [11/16] %v107_v41, 128  ;;  %v561_v43 = vpop.trf.xlu0  ;;  %v110_v40 = vld [vmem:[#allocation2 + $0x2b8] sm:$0xff]  ;;  %v109_v41 = vld [vmem:[#allocation2 + $0x2b0] sm:$0xff] }
  0xbd   :  { %1663 = vst [vmem:[#allocation5 + $0x340] sm:$0xff] %v593_v42  ;;  %1599 = vst [vmem:[#allocation5 + $0x140] sm:$0xff] %v561_v43 }
  0xc0   :  { %706 = vxpose.xlu1.b32.cont [12/16] %v116_v44, 128  ;;  %v594_v46 = vpop.trf.xlu1  ;;  %674 = vxpose.xlu0.b32.cont [12/16] %v115_v45, 128  ;;  %v562_v47 = vpop.trf.xlu0  ;;  %v118_v44 = vld [vmem:[#allocation2 + $0x2f8] sm:$0xff]  ;;  %v117_v45 = vld [vmem:[#allocation2 + $0x2f0] sm:$0xff] }
  0xc1   :  { %1667 = vst [vmem:[#allocation5 + $0x360] sm:$0xff] %v594_v46  ;;  %1603 = vst [vmem:[#allocation5 + $0x160] sm:$0xff] %v562_v47 }
  0xc4   :  { %707 = vxpose.xlu1.b32.cont [13/16] %v124_v48, 128  ;;  %v595_v50 = vpop.trf.xlu1  ;;  %675 = vxpose.xlu0.b32.cont [13/16] %v123_v49, 128  ;;  %v563_v51 = vpop.trf.xlu0  ;;  %v126_v48 = vld [vmem:[#allocation2 + $0x338] sm:$0xff]  ;;  %v125_v49 = vld [vmem:[#allocation2 + $0x330] sm:$0xff] }
  0xc5   :  { %1671 = vst [vmem:[#allocation5 + $0x380] sm:$0xff] %v595_v50  ;;  %1607 = vst [vmem:[#allocation5 + $0x180] sm:$0xff] %v563_v51 }
  0xc8   :  { %708 = vxpose.xlu1.b32.cont [14/16] %v132_v52, 128  ;;  %v596_v54 = vpop.trf.xlu1  ;;  %676 = vxpose.xlu0.b32.cont [14/16] %v131_v53, 128  ;;  %v564_v55 = vpop.trf.xlu0  ;;  %v134_v52 = vld [vmem:[#allocation2 + $0x378] sm:$0xff]  ;;  %v133_v53 = vld [vmem:[#allocation2 + $0x370] sm:$0xff] }
  0xc9   :  { %1675 = vst [vmem:[#allocation5 + $0x3a0] sm:$0xff] %v596_v54  ;;  %1611 = vst [vmem:[#allocation5 + $0x1a0] sm:$0xff] %v564_v55 }
  0xcc   :  { %709 = vxpose.xlu1.b32.cont [15/16] %v140_v56, 128  ;;  %v597_v58 = vpop.trf.xlu1  ;;  %677 = vxpose.xlu0.b32.cont [15/16] %v139_v57, 128  ;;  %v565_v59 = vpop.trf.xlu0  ;;  %v142_v56 = vld [vmem:[#allocation2 + $0x3b8] sm:$0xff]  ;;  %v141_v57 = vld [vmem:[#allocation2 + $0x3b0] sm:$0xff] }
  0xcd   :  { %1679 = vst [vmem:[#allocation5 + $0x3c0] sm:$0xff] %v597_v58  ;;  %1615 = vst [vmem:[#allocation5 + $0x1c0] sm:$0xff] %v565_v59 }
  0xd0   :  { %710 = vxpose.xlu1.b32.end [16/16] %v148_v60, 128  ;;  %v598_v62 = vpop.trf.xlu1  ;;  %678 = vxpose.xlu0.b32.end [16/16] %v147_v61, 128  ;;  %v566_v63 = vpop.trf.xlu0  ;;  %v150_v60 = vld [vmem:[#allocation2 + $0x3f8] sm:$0xff]  ;;  %v149_v61 = vld [vmem:[#allocation2 + $0x3f0] sm:$0xff] }
  0xd1   :  { %1683 = vst [vmem:[#allocation5 + $0x3e0] sm:$0xff] %v598_v62  ;;  %1619 = vst [vmem:[#allocation5 + $0x1e0] sm:$0xff] %v566_v63 }
  0xd4   :  { %759 = vxpose.xlu1.b32.start [1/16] %v30_v0, 128  ;;  %v647_v2 = vpop.trf.xlu1  ;;  %727 = vxpose.xlu0.b32.start [1/16] %v29_v1, 128  ;;  %v615_v3 = vpop.trf.xlu0  ;;  %v152_v0 = vld [vmem:[#allocation2 + $0x408] sm:$0xff]  ;;  %v151_v1 = vld [vmem:[#allocation2 + $0x400] sm:$0xff] }
  0xd5   :  { %1751 = vst [vmem:[#allocation5 + $0x600] sm:$0xff] %v647_v2  ;;  %1687 = vst [vmem:[#allocation5 + $0x400] sm:$0xff] %v615_v3 }
  0xd8   :  { %760 = vxpose.xlu1.b32.cont [2/16] %v38_v4, 128  ;;  %v648_v6 = vpop.trf.xlu1  ;;  %728 = vxpose.xlu0.b32.cont [2/16] %v37_v5, 128  ;;  %v616_v7 = vpop.trf.xlu0  ;;  %v160_v4 = vld [vmem:[#allocation2 + $0x448] sm:$0xff]  ;;  %v159_v5 = vld [vmem:[#allocation2 + $0x440] sm:$0xff] }
  0xd9   :  { %1755 = vst [vmem:[#allocation5 + $0x620] sm:$0xff] %v648_v6  ;;  %1691 = vst [vmem:[#allocation5 + $0x420] sm:$0xff] %v616_v7 }
  0xdc   :  { %761 = vxpose.xlu1.b32.cont [3/16] %v46_v8, 128  ;;  %v649_v10 = vpop.trf.xlu1  ;;  %729 = vxpose.xlu0.b32.cont [3/16] %v45_v9, 128  ;;  %v617_v11 = vpop.trf.xlu0  ;;  %v168_v8 = vld [vmem:[#allocation2 + $0x488] sm:$0xff]  ;;  %v167_v9 = vld [vmem:[#allocation2 + $0x480] sm:$0xff] }
  0xdd   :  { %1759 = vst [vmem:[#allocation5 + $0x640] sm:$0xff] %v649_v10  ;;  %1695 = vst [vmem:[#allocation5 + $0x440] sm:$0xff] %v617_v11 }
  0xe0   :  { %762 = vxpose.xlu1.b32.cont [4/16] %v54_v12, 128  ;;  %v650_v14 = vpop.trf.xlu1  ;;  %730 = vxpose.xlu0.b32.cont [4/16] %v53_v13, 128  ;;  %v618_v15 = vpop.trf.xlu0  ;;  %v176_v12 = vld [vmem:[#allocation2 + $0x4c8] sm:$0xff]  ;;  %v175_v13 = vld [vmem:[#allocation2 + $0x4c0] sm:$0xff] }
  0xe1   :  { %1763 = vst [vmem:[#allocation5 + $0x660] sm:$0xff] %v650_v14  ;;  %1699 = vst [vmem:[#allocation5 + $0x460] sm:$0xff] %v618_v15 }
  0xe4   :  { %763 = vxpose.xlu1.b32.cont [5/16] %v62_v16, 128  ;;  %v651_v18 = vpop.trf.xlu1  ;;  %731 = vxpose.xlu0.b32.cont [5/16] %v61_v17, 128  ;;  %v619_v19 = vpop.trf.xlu0  ;;  %v184_v16 = vld [vmem:[#allocation2 + $0x508] sm:$0xff]  ;;  %v183_v17 = vld [vmem:[#allocation2 + $0x500] sm:$0xff] }
  0xe5   :  { %1767 = vst [vmem:[#allocation5 + $0x680] sm:$0xff] %v651_v18  ;;  %1703 = vst [vmem:[#allocation5 + $0x480] sm:$0xff] %v619_v19 }
  0xe8   :  { %764 = vxpose.xlu1.b32.cont [6/16] %v70_v20, 128  ;;  %v652_v22 = vpop.trf.xlu1  ;;  %732 = vxpose.xlu0.b32.cont [6/16] %v69_v21, 128  ;;  %v620_v23 = vpop.trf.xlu0  ;;  %v192_v20 = vld [vmem:[#allocation2 + $0x548] sm:$0xff]  ;;  %v191_v21 = vld [vmem:[#allocation2 + $0x540] sm:$0xff] }
  0xe9   :  { %1771 = vst [vmem:[#allocation5 + $0x6a0] sm:$0xff] %v652_v22  ;;  %1707 = vst [vmem:[#allocation5 + $0x4a0] sm:$0xff] %v620_v23 }
  0xec   :  { %765 = vxpose.xlu1.b32.cont [7/16] %v78_v24, 128  ;;  %v653_v26 = vpop.trf.xlu1  ;;  %733 = vxpose.xlu0.b32.cont [7/16] %v77_v25, 128  ;;  %v621_v27 = vpop.trf.xlu0  ;;  %v200_v24 = vld [vmem:[#allocation2 + $0x588] sm:$0xff]  ;;  %v199_v25 = vld [vmem:[#allocation2 + $0x580] sm:$0xff] }
  0xed   :  { %1775 = vst [vmem:[#allocation5 + $0x6c0] sm:$0xff] %v653_v26  ;;  %1711 = vst [vmem:[#allocation5 + $0x4c0] sm:$0xff] %v621_v27 }
  0xf0   :  { %766 = vxpose.xlu1.b32.cont [8/16] %v86_v28, 128  ;;  %v654_v30 = vpop.trf.xlu1  ;;  %734 = vxpose.xlu0.b32.cont [8/16] %v85_v29, 128  ;;  %v622_v31 = vpop.trf.xlu0  ;;  %v208_v28 = vld [vmem:[#allocation2 + $0x5c8] sm:$0xff]  ;;  %v207_v29 = vld [vmem:[#allocation2 + $0x5c0] sm:$0xff] }
  0xf1   :  { %1779 = vst [vmem:[#allocation5 + $0x6e0] sm:$0xff] %v654_v30  ;;  %1715 = vst [vmem:[#allocation5 + $0x4e0] sm:$0xff] %v622_v31 }
  0xf4   :  { %767 = vxpose.xlu1.b32.cont [9/16] %v94_v32, 128  ;;  %v655_v34 = vpop.trf.xlu1  ;;  %735 = vxpose.xlu0.b32.cont [9/16] %v93_v33, 128  ;;  %v623_v35 = vpop.trf.xlu0  ;;  %v216_v32 = vld [vmem:[#allocation2 + $0x608] sm:$0xff]  ;;  %v215_v33 = vld [vmem:[#allocation2 + $0x600] sm:$0xff] }
  0xf5   :  { %1783 = vst [vmem:[#allocation5 + $0x700] sm:$0xff] %v655_v34  ;;  %1719 = vst [vmem:[#allocation5 + $0x500] sm:$0xff] %v623_v35 }
  0xf8   :  { %768 = vxpose.xlu1.b32.cont [10/16] %v102_v36, 128  ;;  %v656_v38 = vpop.trf.xlu1  ;;  %736 = vxpose.xlu0.b32.cont [10/16] %v101_v37, 128  ;;  %v624_v39 = vpop.trf.xlu0  ;;  %v224_v36 = vld [vmem:[#allocation2 + $0x648] sm:$0xff]  ;;  %v223_v37 = vld [vmem:[#allocation2 + $0x640] sm:$0xff] }
  0xf9   :  { %1787 = vst [vmem:[#allocation5 + $0x720] sm:$0xff] %v656_v38  ;;  %1723 = vst [vmem:[#allocation5 + $0x520] sm:$0xff] %v624_v39 }
  0xfc   :  { %769 = vxpose.xlu1.b32.cont [11/16] %v110_v40, 128  ;;  %v657_v42 = vpop.trf.xlu1  ;;  %737 = vxpose.xlu0.b32.cont [11/16] %v109_v41, 128  ;;  %v625_v43 = vpop.trf.xlu0  ;;  %v232_v40 = vld [vmem:[#allocation2 + $0x688] sm:$0xff]  ;;  %v231_v41 = vld [vmem:[#allocation2 + $0x680] sm:$0xff] }
  0xfd   :  { %1791 = vst [vmem:[#allocation5 + $0x740] sm:$0xff] %v657_v42  ;;  %1727 = vst [vmem:[#allocation5 + $0x540] sm:$0xff] %v625_v43 }
 0x100   :  { %770 = vxpose.xlu1.b32.cont [12/16] %v118_v44, 128  ;;  %v658_v46 = vpop.trf.xlu1  ;;  %738 = vxpose.xlu0.b32.cont [12/16] %v117_v45, 128  ;;  %v626_v47 = vpop.trf.xlu0  ;;  %v240_v44 = vld [vmem:[#allocation2 + $0x6c8] sm:$0xff]  ;;  %v239_v45 = vld [vmem:[#allocation2 + $0x6c0] sm:$0xff] }
 0x101   :  { %1795 = vst [vmem:[#allocation5 + $0x760] sm:$0xff] %v658_v46  ;;  %1731 = vst [vmem:[#allocation5 + $0x560] sm:$0xff] %v626_v47 }
 0x104   :  { %771 = vxpose.xlu1.b32.cont [13/16] %v126_v48, 128  ;;  %v659_v50 = vpop.trf.xlu1  ;;  %739 = vxpose.xlu0.b32.cont [13/16] %v125_v49, 128  ;;  %v627_v51 = vpop.trf.xlu0  ;;  %v248_v48 = vld [vmem:[#allocation2 + $0x708] sm:$0xff]  ;;  %v247_v49 = vld [vmem:[#allocation2 + $0x700] sm:$0xff] }
 0x105   :  { %1799 = vst [vmem:[#allocation5 + $0x780] sm:$0xff] %v659_v50  ;;  %1735 = vst [vmem:[#allocation5 + $0x580] sm:$0xff] %v627_v51 }
 0x108   :  { %772 = vxpose.xlu1.b32.cont [14/16] %v134_v52, 128  ;;  %v660_v54 = vpop.trf.xlu1  ;;  %740 = vxpose.xlu0.b32.cont [14/16] %v133_v53, 128  ;;  %v628_v55 = vpop.trf.xlu0  ;;  %v256_v52 = vld [vmem:[#allocation2 + $0x748] sm:$0xff]  ;;  %v255_v53 = vld [vmem:[#allocation2 + $0x740] sm:$0xff] }
 0x109   :  { %1803 = vst [vmem:[#allocation5 + $0x7a0] sm:$0xff] %v660_v54  ;;  %1739 = vst [vmem:[#allocation5 + $0x5a0] sm:$0xff] %v628_v55 }
 0x10c   :  { %773 = vxpose.xlu1.b32.cont [15/16] %v142_v56, 128  ;;  %v661_v58 = vpop.trf.xlu1  ;;  %741 = vxpose.xlu0.b32.cont [15/16] %v141_v57, 128  ;;  %v629_v59 = vpop.trf.xlu0  ;;  %v264_v56 = vld [vmem:[#allocation2 + $0x788] sm:$0xff]  ;;  %v263_v57 = vld [vmem:[#allocation2 + $0x780] sm:$0xff] }
 0x10d   :  { %1807 = vst [vmem:[#allocation5 + $0x7c0] sm:$0xff] %v661_v58  ;;  %1743 = vst [vmem:[#allocation5 + $0x5c0] sm:$0xff] %v629_v59 }
 0x110   :  { %774 = vxpose.xlu1.b32.end [16/16] %v150_v60, 128  ;;  %v662_v62 = vpop.trf.xlu1  ;;  %742 = vxpose.xlu0.b32.end [16/16] %v149_v61, 128  ;;  %v630_v63 = vpop.trf.xlu0  ;;  %v272_v60 = vld [vmem:[#allocation2 + $0x7c8] sm:$0xff]  ;;  %v271_v61 = vld [vmem:[#allocation2 + $0x7c0] sm:$0xff] }
 0x111   :  { %1811 = vst [vmem:[#allocation5 + $0x7e0] sm:$0xff] %v662_v62  ;;  %1747 = vst [vmem:[#allocation5 + $0x5e0] sm:$0xff] %v630_v63 }
 0x114   :  { %823 = vxpose.xlu1.b32.start [1/16] %v152_v0, 128  ;;  %v711_v2 = vpop.trf.xlu1  ;;  %791 = vxpose.xlu0.b32.start [1/16] %v151_v1, 128  ;;  %v679_v3 = vpop.trf.xlu0  ;;  %v154_v0 = vld [vmem:[#allocation2 + $0x418] sm:$0xff]  ;;  %v153_v1 = vld [vmem:[#allocation2 + $0x410] sm:$0xff] }
 0x115   :  { %1879 = vst [vmem:[#allocation5 + $0xa00] sm:$0xff] %v711_v2  ;;  %1815 = vst [vmem:[#allocation5 + $0x800] sm:$0xff] %v679_v3 }
 0x118   :  { %824 = vxpose.xlu1.b32.cont [2/16] %v160_v4, 128  ;;  %v712_v6 = vpop.trf.xlu1  ;;  %792 = vxpose.xlu0.b32.cont [2/16] %v159_v5, 128  ;;  %v680_v7 = vpop.trf.xlu0  ;;  %v162_v4 = vld [vmem:[#allocation2 + $0x458] sm:$0xff]  ;;  %v161_v5 = vld [vmem:[#allocation2 + $0x450] sm:$0xff] }
 0x119   :  { %1883 = vst [vmem:[#allocation5 + $0xa20] sm:$0xff] %v712_v6  ;;  %1819 = vst [vmem:[#allocation5 + $0x820] sm:$0xff] %v680_v7 }
 0x11c   :  { %825 = vxpose.xlu1.b32.cont [3/16] %v168_v8, 128  ;;  %v713_v10 = vpop.trf.xlu1  ;;  %793 = vxpose.xlu0.b32.cont [3/16] %v167_v9, 128  ;;  %v681_v11 = vpop.trf.xlu0  ;;  %v170_v8 = vld [vmem:[#allocation2 + $0x498] sm:$0xff]  ;;  %v169_v9 = vld [vmem:[#allocation2 + $0x490] sm:$0xff] }
 0x11d   :  { %1887 = vst [vmem:[#allocation5 + $0xa40] sm:$0xff] %v713_v10  ;;  %1823 = vst [vmem:[#allocation5 + $0x840] sm:$0xff] %v681_v11 }
 0x120   :  { %826 = vxpose.xlu1.b32.cont [4/16] %v176_v12, 128  ;;  %v714_v14 = vpop.trf.xlu1  ;;  %794 = vxpose.xlu0.b32.cont [4/16] %v175_v13, 128  ;;  %v682_v15 = vpop.trf.xlu0  ;;  %v178_v12 = vld [vmem:[#allocation2 + $0x4d8] sm:$0xff]  ;;  %v177_v13 = vld [vmem:[#allocation2 + $0x4d0] sm:$0xff] }
 0x121   :  { %1891 = vst [vmem:[#allocation5 + $0xa60] sm:$0xff] %v714_v14  ;;  %1827 = vst [vmem:[#allocation5 + $0x860] sm:$0xff] %v682_v15 }
 0x124   :  { %827 = vxpose.xlu1.b32.cont [5/16] %v184_v16, 128  ;;  %v715_v18 = vpop.trf.xlu1  ;;  %795 = vxpose.xlu0.b32.cont [5/16] %v183_v17, 128  ;;  %v683_v19 = vpop.trf.xlu0  ;;  %v186_v16 = vld [vmem:[#allocation2 + $0x518] sm:$0xff]  ;;  %v185_v17 = vld [vmem:[#allocation2 + $0x510] sm:$0xff] }
 0x125   :  { %1895 = vst [vmem:[#allocation5 + $0xa80] sm:$0xff] %v715_v18  ;;  %1831 = vst [vmem:[#allocation5 + $0x880] sm:$0xff] %v683_v19 }
 0x128   :  { %828 = vxpose.xlu1.b32.cont [6/16] %v192_v20, 128  ;;  %v716_v22 = vpop.trf.xlu1  ;;  %796 = vxpose.xlu0.b32.cont [6/16] %v191_v21, 128  ;;  %v684_v23 = vpop.trf.xlu0  ;;  %v194_v20 = vld [vmem:[#allocation2 + $0x558] sm:$0xff]  ;;  %v193_v21 = vld [vmem:[#allocation2 + $0x550] sm:$0xff] }
 0x129   :  { %1899 = vst [vmem:[#allocation5 + $0xaa0] sm:$0xff] %v716_v22  ;;  %1835 = vst [vmem:[#allocation5 + $0x8a0] sm:$0xff] %v684_v23 }
 0x12c   :  { %829 = vxpose.xlu1.b32.cont [7/16] %v200_v24, 128  ;;  %v717_v26 = vpop.trf.xlu1  ;;  %797 = vxpose.xlu0.b32.cont [7/16] %v199_v25, 128  ;;  %v685_v27 = vpop.trf.xlu0  ;;  %v202_v24 = vld [vmem:[#allocation2 + $0x598] sm:$0xff]  ;;  %v201_v25 = vld [vmem:[#allocation2 + $0x590] sm:$0xff] }
 0x12d   :  { %1903 = vst [vmem:[#allocation5 + $0xac0] sm:$0xff] %v717_v26  ;;  %1839 = vst [vmem:[#allocation5 + $0x8c0] sm:$0xff] %v685_v27 }
 0x130   :  { %830 = vxpose.xlu1.b32.cont [8/16] %v208_v28, 128  ;;  %v718_v30 = vpop.trf.xlu1  ;;  %798 = vxpose.xlu0.b32.cont [8/16] %v207_v29, 128  ;;  %v686_v31 = vpop.trf.xlu0  ;;  %v210_v28 = vld [vmem:[#allocation2 + $0x5d8] sm:$0xff]  ;;  %v209_v29 = vld [vmem:[#allocation2 + $0x5d0] sm:$0xff] }
 0x131   :  { %1907 = vst [vmem:[#allocation5 + $0xae0] sm:$0xff] %v718_v30  ;;  %1843 = vst [vmem:[#allocation5 + $0x8e0] sm:$0xff] %v686_v31 }
 0x134   :  { %831 = vxpose.xlu1.b32.cont [9/16] %v216_v32, 128  ;;  %v719_v34 = vpop.trf.xlu1  ;;  %799 = vxpose.xlu0.b32.cont [9/16] %v215_v33, 128  ;;  %v687_v35 = vpop.trf.xlu0  ;;  %v218_v32 = vld [vmem:[#allocation2 + $0x618] sm:$0xff]  ;;  %v217_v33 = vld [vmem:[#allocation2 + $0x610] sm:$0xff] }
 0x135   :  { %1911 = vst [vmem:[#allocation5 + $0xb00] sm:$0xff] %v719_v34  ;;  %1847 = vst [vmem:[#allocation5 + $0x900] sm:$0xff] %v687_v35 }
 0x138   :  { %832 = vxpose.xlu1.b32.cont [10/16] %v224_v36, 128  ;;  %v720_v38 = vpop.trf.xlu1  ;;  %800 = vxpose.xlu0.b32.cont [10/16] %v223_v37, 128  ;;  %v688_v39 = vpop.trf.xlu0  ;;  %v226_v36 = vld [vmem:[#allocation2 + $0x658] sm:$0xff]  ;;  %v225_v37 = vld [vmem:[#allocation2 + $0x650] sm:$0xff] }
 0x139   :  { %1915 = vst [vmem:[#allocation5 + $0xb20] sm:$0xff] %v720_v38  ;;  %1851 = vst [vmem:[#allocation5 + $0x920] sm:$0xff] %v688_v39 }
 0x13c   :  { %833 = vxpose.xlu1.b32.cont [11/16] %v232_v40, 128  ;;  %v721_v42 = vpop.trf.xlu1  ;;  %801 = vxpose.xlu0.b32.cont [11/16] %v231_v41, 128  ;;  %v689_v43 = vpop.trf.xlu0  ;;  %v234_v40 = vld [vmem:[#allocation2 + $0x698] sm:$0xff]  ;;  %v233_v41 = vld [vmem:[#allocation2 + $0x690] sm:$0xff] }
 0x13d   :  { %1919 = vst [vmem:[#allocation5 + $0xb40] sm:$0xff] %v721_v42  ;;  %1855 = vst [vmem:[#allocation5 + $0x940] sm:$0xff] %v689_v43 }
 0x140   :  { %834 = vxpose.xlu1.b32.cont [12/16] %v240_v44, 128  ;;  %v722_v46 = vpop.trf.xlu1  ;;  %802 = vxpose.xlu0.b32.cont [12/16] %v239_v45, 128  ;;  %v690_v47 = vpop.trf.xlu0  ;;  %v242_v44 = vld [vmem:[#allocation2 + $0x6d8] sm:$0xff]  ;;  %v241_v45 = vld [vmem:[#allocation2 + $0x6d0] sm:$0xff] }
 0x141   :  { %1923 = vst [vmem:[#allocation5 + $0xb60] sm:$0xff] %v722_v46  ;;  %1859 = vst [vmem:[#allocation5 + $0x960] sm:$0xff] %v690_v47 }
 0x144   :  { %835 = vxpose.xlu1.b32.cont [13/16] %v248_v48, 128  ;;  %v723_v50 = vpop.trf.xlu1  ;;  %803 = vxpose.xlu0.b32.cont [13/16] %v247_v49, 128  ;;  %v691_v51 = vpop.trf.xlu0  ;;  %v250_v48 = vld [vmem:[#allocation2 + $0x718] sm:$0xff]  ;;  %v249_v49 = vld [vmem:[#allocation2 + $0x710] sm:$0xff] }
 0x145   :  { %1927 = vst [vmem:[#allocation5 + $0xb80] sm:$0xff] %v723_v50  ;;  %1863 = vst [vmem:[#allocation5 + $0x980] sm:$0xff] %v691_v51 }
 0x148   :  { %836 = vxpose.xlu1.b32.cont [14/16] %v256_v52, 128  ;;  %v724_v54 = vpop.trf.xlu1  ;;  %804 = vxpose.xlu0.b32.cont [14/16] %v255_v53, 128  ;;  %v692_v55 = vpop.trf.xlu0  ;;  %v258_v52 = vld [vmem:[#allocation2 + $0x758] sm:$0xff]  ;;  %v257_v53 = vld [vmem:[#allocation2 + $0x750] sm:$0xff] }
 0x149   :  { %1931 = vst [vmem:[#allocation5 + $0xba0] sm:$0xff] %v724_v54  ;;  %1867 = vst [vmem:[#allocation5 + $0x9a0] sm:$0xff] %v692_v55 }
 0x14c   :  { %837 = vxpose.xlu1.b32.cont [15/16] %v264_v56, 128  ;;  %v725_v58 = vpop.trf.xlu1  ;;  %805 = vxpose.xlu0.b32.cont [15/16] %v263_v57, 128  ;;  %v693_v59 = vpop.trf.xlu0  ;;  %v266_v56 = vld [vmem:[#allocation2 + $0x798] sm:$0xff]  ;;  %v265_v57 = vld [vmem:[#allocation2 + $0x790] sm:$0xff] }
 0x14d   :  { %1935 = vst [vmem:[#allocation5 + $0xbc0] sm:$0xff] %v725_v58  ;;  %1871 = vst [vmem:[#allocation5 + $0x9c0] sm:$0xff] %v693_v59 }
 0x150   :  { %838 = vxpose.xlu1.b32.end [16/16] %v272_v60, 128  ;;  %v726_v62 = vpop.trf.xlu1  ;;  %806 = vxpose.xlu0.b32.end [16/16] %v271_v61, 128  ;;  %v694_v63 = vpop.trf.xlu0  ;;  %v274_v60 = vld [vmem:[#allocation2 + $0x7d8] sm:$0xff]  ;;  %v273_v61 = vld [vmem:[#allocation2 + $0x7d0] sm:$0xff] }
 0x151   :  { %1939 = vst [vmem:[#allocation5 + $0xbe0] sm:$0xff] %v726_v62  ;;  %1875 = vst [vmem:[#allocation5 + $0x9e0] sm:$0xff] %v694_v63 }
 0x154   :  { %887 = vxpose.xlu1.b32.start [1/16] %v154_v0, 128  ;;  %v775_v2 = vpop.trf.xlu1  ;;  %855 = vxpose.xlu0.b32.start [1/16] %v153_v1, 128  ;;  %v743_v3 = vpop.trf.xlu0  ;;  %v156_v0 = vld [vmem:[#allocation2 + $0x428] sm:$0xff]  ;;  %v155_v1 = vld [vmem:[#allocation2 + $0x420] sm:$0xff] }
 0x155   :  { %2007 = vst [vmem:[#allocation5 + $0xe00] sm:$0xff] %v775_v2  ;;  %1943 = vst [vmem:[#allocation5 + $0xc00] sm:$0xff] %v743_v3 }
 0x158   :  { %888 = vxpose.xlu1.b32.cont [2/16] %v162_v4, 128  ;;  %v776_v6 = vpop.trf.xlu1  ;;  %856 = vxpose.xlu0.b32.cont [2/16] %v161_v5, 128  ;;  %v744_v7 = vpop.trf.xlu0  ;;  %v164_v4 = vld [vmem:[#allocation2 + $0x468] sm:$0xff]  ;;  %v163_v5 = vld [vmem:[#allocation2 + $0x460] sm:$0xff] }
 0x159   :  { %2011 = vst [vmem:[#allocation5 + $0xe20] sm:$0xff] %v776_v6  ;;  %1947 = vst [vmem:[#allocation5 + $0xc20] sm:$0xff] %v744_v7 }
 0x15c   :  { %889 = vxpose.xlu1.b32.cont [3/16] %v170_v8, 128  ;;  %v777_v10 = vpop.trf.xlu1  ;;  %857 = vxpose.xlu0.b32.cont [3/16] %v169_v9, 128  ;;  %v745_v11 = vpop.trf.xlu0  ;;  %v172_v8 = vld [vmem:[#allocation2 + $0x4a8] sm:$0xff]  ;;  %v171_v9 = vld [vmem:[#allocation2 + $0x4a0] sm:$0xff] }
 0x15d   :  { %2015 = vst [vmem:[#allocation5 + $0xe40] sm:$0xff] %v777_v10  ;;  %1951 = vst [vmem:[#allocation5 + $0xc40] sm:$0xff] %v745_v11 }
 0x160   :  { %890 = vxpose.xlu1.b32.cont [4/16] %v178_v12, 128  ;;  %v778_v14 = vpop.trf.xlu1  ;;  %858 = vxpose.xlu0.b32.cont [4/16] %v177_v13, 128  ;;  %v746_v15 = vpop.trf.xlu0  ;;  %v180_v12 = vld [vmem:[#allocation2 + $0x4e8] sm:$0xff]  ;;  %v179_v13 = vld [vmem:[#allocation2 + $0x4e0] sm:$0xff] }
 0x161   :  { %2019 = vst [vmem:[#allocation5 + $0xe60] sm:$0xff] %v778_v14  ;;  %1955 = vst [vmem:[#allocation5 + $0xc60] sm:$0xff] %v746_v15 }
 0x164   :  { %891 = vxpose.xlu1.b32.cont [5/16] %v186_v16, 128  ;;  %v779_v18 = vpop.trf.xlu1  ;;  %859 = vxpose.xlu0.b32.cont [5/16] %v185_v17, 128  ;;  %v747_v19 = vpop.trf.xlu0  ;;  %v188_v16 = vld [vmem:[#allocation2 + $0x528] sm:$0xff]  ;;  %v187_v17 = vld [vmem:[#allocation2 + $0x520] sm:$0xff] }
 0x165   :  { %2023 = vst [vmem:[#allocation5 + $0xe80] sm:$0xff] %v779_v18  ;;  %1959 = vst [vmem:[#allocation5 + $0xc80] sm:$0xff] %v747_v19 }
 0x168   :  { %892 = vxpose.xlu1.b32.cont [6/16] %v194_v20, 128  ;;  %v780_v22 = vpop.trf.xlu1  ;;  %860 = vxpose.xlu0.b32.cont [6/16] %v193_v21, 128  ;;  %v748_v23 = vpop.trf.xlu0  ;;  %v196_v20 = vld [vmem:[#allocation2 + $0x568] sm:$0xff]  ;;  %v195_v21 = vld [vmem:[#allocation2 + $0x560] sm:$0xff] }
 0x169   :  { %2027 = vst [vmem:[#allocation5 + $0xea0] sm:$0xff] %v780_v22  ;;  %1963 = vst [vmem:[#allocation5 + $0xca0] sm:$0xff] %v748_v23 }
 0x16c   :  { %893 = vxpose.xlu1.b32.cont [7/16] %v202_v24, 128  ;;  %v781_v26 = vpop.trf.xlu1  ;;  %861 = vxpose.xlu0.b32.cont [7/16] %v201_v25, 128  ;;  %v749_v27 = vpop.trf.xlu0  ;;  %v204_v24 = vld [vmem:[#allocation2 + $0x5a8] sm:$0xff]  ;;  %v203_v25 = vld [vmem:[#allocation2 + $0x5a0] sm:$0xff] }
 0x16d   :  { %2031 = vst [vmem:[#allocation5 + $0xec0] sm:$0xff] %v781_v26  ;;  %1967 = vst [vmem:[#allocation5 + $0xcc0] sm:$0xff] %v749_v27 }
 0x170   :  { %894 = vxpose.xlu1.b32.cont [8/16] %v210_v28, 128  ;;  %v782_v30 = vpop.trf.xlu1  ;;  %862 = vxpose.xlu0.b32.cont [8/16] %v209_v29, 128  ;;  %v750_v31 = vpop.trf.xlu0  ;;  %v212_v28 = vld [vmem:[#allocation2 + $0x5e8] sm:$0xff]  ;;  %v211_v29 = vld [vmem:[#allocation2 + $0x5e0] sm:$0xff] }
 0x171   :  { %2035 = vst [vmem:[#allocation5 + $0xee0] sm:$0xff] %v782_v30  ;;  %1971 = vst [vmem:[#allocation5 + $0xce0] sm:$0xff] %v750_v31 }
 0x174   :  { %895 = vxpose.xlu1.b32.cont [9/16] %v218_v32, 128  ;;  %v783_v34 = vpop.trf.xlu1  ;;  %863 = vxpose.xlu0.b32.cont [9/16] %v217_v33, 128  ;;  %v751_v35 = vpop.trf.xlu0  ;;  %v220_v32 = vld [vmem:[#allocation2 + $0x628] sm:$0xff]  ;;  %v219_v33 = vld [vmem:[#allocation2 + $0x620] sm:$0xff] }
 0x175   :  { %2039 = vst [vmem:[#allocation5 + $0xf00] sm:$0xff] %v783_v34  ;;  %1975 = vst [vmem:[#allocation5 + $0xd00] sm:$0xff] %v751_v35 }
 0x178   :  { %896 = vxpose.xlu1.b32.cont [10/16] %v226_v36, 128  ;;  %v784_v38 = vpop.trf.xlu1  ;;  %864 = vxpose.xlu0.b32.cont [10/16] %v225_v37, 128  ;;  %v752_v39 = vpop.trf.xlu0  ;;  %v228_v36 = vld [vmem:[#allocation2 + $0x668] sm:$0xff]  ;;  %v227_v37 = vld [vmem:[#allocation2 + $0x660] sm:$0xff] }
 0x179   :  { %2043 = vst [vmem:[#allocation5 + $0xf20] sm:$0xff] %v784_v38  ;;  %1979 = vst [vmem:[#allocation5 + $0xd20] sm:$0xff] %v752_v39 }
 0x17c   :  { %897 = vxpose.xlu1.b32.cont [11/16] %v234_v40, 128  ;;  %v785_v42 = vpop.trf.xlu1  ;;  %865 = vxpose.xlu0.b32.cont [11/16] %v233_v41, 128  ;;  %v753_v43 = vpop.trf.xlu0  ;;  %v236_v40 = vld [vmem:[#allocation2 + $0x6a8] sm:$0xff]  ;;  %v235_v41 = vld [vmem:[#allocation2 + $0x6a0] sm:$0xff] }
 0x17d   :  { %2047 = vst [vmem:[#allocation5 + $0xf40] sm:$0xff] %v785_v42  ;;  %1983 = vst [vmem:[#allocation5 + $0xd40] sm:$0xff] %v753_v43 }
 0x180   :  { %898 = vxpose.xlu1.b32.cont [12/16] %v242_v44, 128  ;;  %v786_v46 = vpop.trf.xlu1  ;;  %866 = vxpose.xlu0.b32.cont [12/16] %v241_v45, 128  ;;  %v754_v47 = vpop.trf.xlu0  ;;  %v244_v44 = vld [vmem:[#allocation2 + $0x6e8] sm:$0xff]  ;;  %v243_v45 = vld [vmem:[#allocation2 + $0x6e0] sm:$0xff] }
 0x181   :  { %2051 = vst [vmem:[#allocation5 + $0xf60] sm:$0xff] %v786_v46  ;;  %1987 = vst [vmem:[#allocation5 + $0xd60] sm:$0xff] %v754_v47 }
 0x184   :  { %899 = vxpose.xlu1.b32.cont [13/16] %v250_v48, 128  ;;  %v787_v50 = vpop.trf.xlu1  ;;  %867 = vxpose.xlu0.b32.cont [13/16] %v249_v49, 128  ;;  %v755_v51 = vpop.trf.xlu0  ;;  %v252_v48 = vld [vmem:[#allocation2 + $0x728] sm:$0xff]  ;;  %v251_v49 = vld [vmem:[#allocation2 + $0x720] sm:$0xff] }
 0x185   :  { %2055 = vst [vmem:[#allocation5 + $0xf80] sm:$0xff] %v787_v50  ;;  %1991 = vst [vmem:[#allocation5 + $0xd80] sm:$0xff] %v755_v51 }
 0x188   :  { %900 = vxpose.xlu1.b32.cont [14/16] %v258_v52, 128  ;;  %v788_v54 = vpop.trf.xlu1  ;;  %868 = vxpose.xlu0.b32.cont [14/16] %v257_v53, 128  ;;  %v756_v55 = vpop.trf.xlu0  ;;  %v260_v52 = vld [vmem:[#allocation2 + $0x768] sm:$0xff]  ;;  %v259_v53 = vld [vmem:[#allocation2 + $0x760] sm:$0xff] }
 0x189   :  { %2059 = vst [vmem:[#allocation5 + $0xfa0] sm:$0xff] %v788_v54  ;;  %1995 = vst [vmem:[#allocation5 + $0xda0] sm:$0xff] %v756_v55 }
 0x18c   :  { %901 = vxpose.xlu1.b32.cont [15/16] %v266_v56, 128  ;;  %v789_v58 = vpop.trf.xlu1  ;;  %869 = vxpose.xlu0.b32.cont [15/16] %v265_v57, 128  ;;  %v757_v59 = vpop.trf.xlu0  ;;  %v268_v56 = vld [vmem:[#allocation2 + $0x7a8] sm:$0xff]  ;;  %v267_v57 = vld [vmem:[#allocation2 + $0x7a0] sm:$0xff] }
 0x18d   :  { %2063 = vst [vmem:[#allocation5 + $0xfc0] sm:$0xff] %v789_v58  ;;  %1999 = vst [vmem:[#allocation5 + $0xdc0] sm:$0xff] %v757_v59 }
 0x190   :  { %902 = vxpose.xlu1.b32.end [16/16] %v274_v60, 128  ;;  %v790_v62 = vpop.trf.xlu1  ;;  %870 = vxpose.xlu0.b32.end [16/16] %v273_v61, 128  ;;  %v758_v63 = vpop.trf.xlu0  ;;  %v276_v60 = vld [vmem:[#allocation2 + $0x7e8] sm:$0xff]  ;;  %v275_v61 = vld [vmem:[#allocation2 + $0x7e0] sm:$0xff] }
 0x191   :  { %2067 = vst [vmem:[#allocation5 + $0xfe0] sm:$0xff] %v790_v62  ;;  %2003 = vst [vmem:[#allocation5 + $0xde0] sm:$0xff] %v758_v63 }
 0x194   :  { %951 = vxpose.xlu1.b32.start [1/16] %v156_v0, 128  ;;  %v839_v2 = vpop.trf.xlu1  ;;  %919 = vxpose.xlu0.b32.start [1/16] %v155_v1, 128  ;;  %v807_v3 = vpop.trf.xlu0  ;;  %v158_v0 = vld [vmem:[#allocation2 + $0x438] sm:$0xff]  ;;  %v157_v1 = vld [vmem:[#allocation2 + $0x430] sm:$0xff] }
 0x195   :  { %1624 = vst [vmem:[#allocation5 + $0x208] sm:$0xff] %v839_v2  ;;  %1560 = vst [vmem:[#allocation5 + $0x8] sm:$0xff] %v807_v3 }
 0x198   :  { %952 = vxpose.xlu1.b32.cont [2/16] %v164_v4, 128  ;;  %v840_v6 = vpop.trf.xlu1  ;;  %920 = vxpose.xlu0.b32.cont [2/16] %v163_v5, 128  ;;  %v808_v7 = vpop.trf.xlu0  ;;  %v166_v4 = vld [vmem:[#allocation2 + $0x478] sm:$0xff]  ;;  %v165_v5 = vld [vmem:[#allocation2 + $0x470] sm:$0xff] }
 0x199   :  { %1628 = vst [vmem:[#allocation5 + $0x228] sm:$0xff] %v840_v6  ;;  %1564 = vst [vmem:[#allocation5 + $0x28] sm:$0xff] %v808_v7 }
 0x19c   :  { %953 = vxpose.xlu1.b32.cont [3/16] %v172_v8, 128  ;;  %v841_v10 = vpop.trf.xlu1  ;;  %921 = vxpose.xlu0.b32.cont [3/16] %v171_v9, 128  ;;  %v809_v11 = vpop.trf.xlu0  ;;  %v174_v8 = vld [vmem:[#allocation2 + $0x4b8] sm:$0xff]  ;;  %v173_v9 = vld [vmem:[#allocation2 + $0x4b0] sm:$0xff] }
 0x19d   :  { %1632 = vst [vmem:[#allocation5 + $0x248] sm:$0xff] %v841_v10  ;;  %1568 = vst [vmem:[#allocation5 + $0x48] sm:$0xff] %v809_v11 }
 0x1a0   :  { %954 = vxpose.xlu1.b32.cont [4/16] %v180_v12, 128  ;;  %v842_v14 = vpop.trf.xlu1  ;;  %922 = vxpose.xlu0.b32.cont [4/16] %v179_v13, 128  ;;  %v810_v15 = vpop.trf.xlu0  ;;  %v182_v12 = vld [vmem:[#allocation2 + $0x4f8] sm:$0xff]  ;;  %v181_v13 = vld [vmem:[#allocation2 + $0x4f0] sm:$0xff] }
 0x1a1   :  { %1636 = vst [vmem:[#allocation5 + $0x268] sm:$0xff] %v842_v14  ;;  %1572 = vst [vmem:[#allocation5 + $0x68] sm:$0xff] %v810_v15 }
 0x1a4   :  { %955 = vxpose.xlu1.b32.cont [5/16] %v188_v16, 128  ;;  %v843_v18 = vpop.trf.xlu1  ;;  %923 = vxpose.xlu0.b32.cont [5/16] %v187_v17, 128  ;;  %v811_v19 = vpop.trf.xlu0  ;;  %v190_v16 = vld [vmem:[#allocation2 + $0x538] sm:$0xff]  ;;  %v189_v17 = vld [vmem:[#allocation2 + $0x530] sm:$0xff] }
 0x1a5   :  { %1640 = vst [vmem:[#allocation5 + $0x288] sm:$0xff] %v843_v18  ;;  %1576 = vst [vmem:[#allocation5 + $0x88] sm:$0xff] %v811_v19 }
 0x1a8   :  { %956 = vxpose.xlu1.b32.cont [6/16] %v196_v20, 128  ;;  %v844_v22 = vpop.trf.xlu1  ;;  %924 = vxpose.xlu0.b32.cont [6/16] %v195_v21, 128  ;;  %v812_v23 = vpop.trf.xlu0  ;;  %v198_v20 = vld [vmem:[#allocation2 + $0x578] sm:$0xff]  ;;  %v197_v21 = vld [vmem:[#allocation2 + $0x570] sm:$0xff] }
 0x1a9   :  { %1644 = vst [vmem:[#allocation5 + $0x2a8] sm:$0xff] %v844_v22  ;;  %1580 = vst [vmem:[#allocation5 + $0xa8] sm:$0xff] %v812_v23 }
 0x1ac   :  { %957 = vxpose.xlu1.b32.cont [7/16] %v204_v24, 128  ;;  %v845_v26 = vpop.trf.xlu1  ;;  %925 = vxpose.xlu0.b32.cont [7/16] %v203_v25, 128  ;;  %v813_v27 = vpop.trf.xlu0  ;;  %v206_v24 = vld [vmem:[#allocation2 + $0x5b8] sm:$0xff]  ;;  %v205_v25 = vld [vmem:[#allocation2 + $0x5b0] sm:$0xff] }
 0x1ad   :  { %1648 = vst [vmem:[#allocation5 + $0x2c8] sm:$0xff] %v845_v26  ;;  %1584 = vst [vmem:[#allocation5 + $0xc8] sm:$0xff] %v813_v27 }
 0x1b0   :  { %958 = vxpose.xlu1.b32.cont [8/16] %v212_v28, 128  ;;  %v846_v30 = vpop.trf.xlu1  ;;  %926 = vxpose.xlu0.b32.cont [8/16] %v211_v29, 128  ;;  %v814_v31 = vpop.trf.xlu0  ;;  %v214_v28 = vld [vmem:[#allocation2 + $0x5f8] sm:$0xff]  ;;  %v213_v29 = vld [vmem:[#allocation2 + $0x5f0] sm:$0xff] }
 0x1b1   :  { %1652 = vst [vmem:[#allocation5 + $0x2e8] sm:$0xff] %v846_v30  ;;  %1588 = vst [vmem:[#allocation5 + $0xe8] sm:$0xff] %v814_v31 }
 0x1b4   :  { %959 = vxpose.xlu1.b32.cont [9/16] %v220_v32, 128  ;;  %v847_v34 = vpop.trf.xlu1  ;;  %927 = vxpose.xlu0.b32.cont [9/16] %v219_v33, 128  ;;  %v815_v35 = vpop.trf.xlu0  ;;  %v222_v32 = vld [vmem:[#allocation2 + $0x638] sm:$0xff]  ;;  %v221_v33 = vld [vmem:[#allocation2 + $0x630] sm:$0xff] }
 0x1b5   :  { %1656 = vst [vmem:[#allocation5 + $0x308] sm:$0xff] %v847_v34  ;;  %1592 = vst [vmem:[#allocation5 + $0x108] sm:$0xff] %v815_v35 }
 0x1b8   :  { %960 = vxpose.xlu1.b32.cont [10/16] %v228_v36, 128  ;;  %v848_v38 = vpop.trf.xlu1  ;;  %928 = vxpose.xlu0.b32.cont [10/16] %v227_v37, 128  ;;  %v816_v39 = vpop.trf.xlu0  ;;  %v230_v36 = vld [vmem:[#allocation2 + $0x678] sm:$0xff]  ;;  %v229_v37 = vld [vmem:[#allocation2 + $0x670] sm:$0xff] }
 0x1b9   :  { %1660 = vst [vmem:[#allocation5 + $0x328] sm:$0xff] %v848_v38  ;;  %1596 = vst [vmem:[#allocation5 + $0x128] sm:$0xff] %v816_v39 }
 0x1bc   :  { %961 = vxpose.xlu1.b32.cont [11/16] %v236_v40, 128  ;;  %v849_v42 = vpop.trf.xlu1  ;;  %929 = vxpose.xlu0.b32.cont [11/16] %v235_v41, 128  ;;  %v817_v43 = vpop.trf.xlu0  ;;  %v238_v40 = vld [vmem:[#allocation2 + $0x6b8] sm:$0xff]  ;;  %v237_v41 = vld [vmem:[#allocation2 + $0x6b0] sm:$0xff] }
 0x1bd   :  { %1664 = vst [vmem:[#allocation5 + $0x348] sm:$0xff] %v849_v42  ;;  %1600 = vst [vmem:[#allocation5 + $0x148] sm:$0xff] %v817_v43 }
 0x1c0   :  { %962 = vxpose.xlu1.b32.cont [12/16] %v244_v44, 128  ;;  %v850_v46 = vpop.trf.xlu1  ;;  %930 = vxpose.xlu0.b32.cont [12/16] %v243_v45, 128  ;;  %v818_v47 = vpop.trf.xlu0  ;;  %v246_v44 = vld [vmem:[#allocation2 + $0x6f8] sm:$0xff]  ;;  %v245_v45 = vld [vmem:[#allocation2 + $0x6f0] sm:$0xff] }
 0x1c1   :  { %1668 = vst [vmem:[#allocation5 + $0x368] sm:$0xff] %v850_v46  ;;  %1604 = vst [vmem:[#allocation5 + $0x168] sm:$0xff] %v818_v47 }
 0x1c4   :  { %963 = vxpose.xlu1.b32.cont [13/16] %v252_v48, 128  ;;  %v851_v50 = vpop.trf.xlu1  ;;  %931 = vxpose.xlu0.b32.cont [13/16] %v251_v49, 128  ;;  %v819_v51 = vpop.trf.xlu0  ;;  %v254_v48 = vld [vmem:[#allocation2 + $0x738] sm:$0xff]  ;;  %v253_v49 = vld [vmem:[#allocation2 + $0x730] sm:$0xff] }
 0x1c5   :  { %1672 = vst [vmem:[#allocation5 + $0x388] sm:$0xff] %v851_v50  ;;  %1608 = vst [vmem:[#allocation5 + $0x188] sm:$0xff] %v819_v51 }
 0x1c8   :  { %964 = vxpose.xlu1.b32.cont [14/16] %v260_v52, 128  ;;  %v852_v54 = vpop.trf.xlu1  ;;  %932 = vxpose.xlu0.b32.cont [14/16] %v259_v53, 128  ;;  %v820_v55 = vpop.trf.xlu0  ;;  %v262_v52 = vld [vmem:[#allocation2 + $0x778] sm:$0xff]  ;;  %v261_v53 = vld [vmem:[#allocation2 + $0x770] sm:$0xff] }
 0x1c9   :  { %1676 = vst [vmem:[#allocation5 + $0x3a8] sm:$0xff] %v852_v54  ;;  %1612 = vst [vmem:[#allocation5 + $0x1a8] sm:$0xff] %v820_v55 }
 0x1cc   :  { %965 = vxpose.xlu1.b32.cont [15/16] %v268_v56, 128  ;;  %v853_v58 = vpop.trf.xlu1  ;;  %933 = vxpose.xlu0.b32.cont [15/16] %v267_v57, 128  ;;  %v821_v59 = vpop.trf.xlu0  ;;  %v270_v56 = vld [vmem:[#allocation2 + $0x7b8] sm:$0xff]  ;;  %v269_v57 = vld [vmem:[#allocation2 + $0x7b0] sm:$0xff] }
 0x1cd   :  { %1680 = vst [vmem:[#allocation5 + $0x3c8] sm:$0xff] %v853_v58  ;;  %1616 = vst [vmem:[#allocation5 + $0x1c8] sm:$0xff] %v821_v59 }
 0x1d0   :  { %966 = vxpose.xlu1.b32.end [16/16] %v276_v60, 128  ;;  %v854_v62 = vpop.trf.xlu1  ;;  %934 = vxpose.xlu0.b32.end [16/16] %v275_v61, 128  ;;  %v822_v63 = vpop.trf.xlu0  ;;  %v278_v60 = vld [vmem:[#allocation2 + $0x7f8] sm:$0xff]  ;;  %v277_v61 = vld [vmem:[#allocation2 + $0x7f0] sm:$0xff] }
 0x1d1   :  { %1684 = vst [vmem:[#allocation5 + $0x3e8] sm:$0xff] %v854_v62  ;;  %1620 = vst [vmem:[#allocation5 + $0x1e8] sm:$0xff] %v822_v63 }
 0x1d4   :  { %1015 = vxpose.xlu1.b32.start [1/16] %v158_v0, 128  ;;  %v903_v2 = vpop.trf.xlu1  ;;  %983 = vxpose.xlu0.b32.start [1/16] %v157_v1, 128  ;;  %v871_v3 = vpop.trf.xlu0  ;;  %v280_v0 = vld [vmem:[#allocation2 + $0x808] sm:$0xff]  ;;  %v279_v1 = vld [vmem:[#allocation2 + $0x800] sm:$0xff] }
 0x1d5   :  { %1752 = vst [vmem:[#allocation5 + $0x608] sm:$0xff] %v903_v2  ;;  %1688 = vst [vmem:[#allocation5 + $0x408] sm:$0xff] %v871_v3 }
 0x1d8   :  { %1016 = vxpose.xlu1.b32.cont [2/16] %v166_v4, 128  ;;  %v904_v6 = vpop.trf.xlu1  ;;  %984 = vxpose.xlu0.b32.cont [2/16] %v165_v5, 128  ;;  %v872_v7 = vpop.trf.xlu0  ;;  %v288_v4 = vld [vmem:[#allocation2 + $0x848] sm:$0xff]  ;;  %v287_v5 = vld [vmem:[#allocation2 + $0x840] sm:$0xff] }
 0x1d9   :  { %1756 = vst [vmem:[#allocation5 + $0x628] sm:$0xff] %v904_v6  ;;  %1692 = vst [vmem:[#allocation5 + $0x428] sm:$0xff] %v872_v7 }
 0x1dc   :  { %1017 = vxpose.xlu1.b32.cont [3/16] %v174_v8, 128  ;;  %v905_v10 = vpop.trf.xlu1  ;;  %985 = vxpose.xlu0.b32.cont [3/16] %v173_v9, 128  ;;  %v873_v11 = vpop.trf.xlu0  ;;  %v296_v8 = vld [vmem:[#allocation2 + $0x888] sm:$0xff]  ;;  %v295_v9 = vld [vmem:[#allocation2 + $0x880] sm:$0xff] }
 0x1dd   :  { %1760 = vst [vmem:[#allocation5 + $0x648] sm:$0xff] %v905_v10  ;;  %1696 = vst [vmem:[#allocation5 + $0x448] sm:$0xff] %v873_v11 }
 0x1e0   :  { %1018 = vxpose.xlu1.b32.cont [4/16] %v182_v12, 128  ;;  %v906_v14 = vpop.trf.xlu1  ;;  %986 = vxpose.xlu0.b32.cont [4/16] %v181_v13, 128  ;;  %v874_v15 = vpop.trf.xlu0  ;;  %v304_v12 = vld [vmem:[#allocation2 + $0x8c8] sm:$0xff]  ;;  %v303_v13 = vld [vmem:[#allocation2 + $0x8c0] sm:$0xff] }
 0x1e1   :  { %1764 = vst [vmem:[#allocation5 + $0x668] sm:$0xff] %v906_v14  ;;  %1700 = vst [vmem:[#allocation5 + $0x468] sm:$0xff] %v874_v15 }
 0x1e4   :  { %1019 = vxpose.xlu1.b32.cont [5/16] %v190_v16, 128  ;;  %v907_v18 = vpop.trf.xlu1  ;;  %987 = vxpose.xlu0.b32.cont [5/16] %v189_v17, 128  ;;  %v875_v19 = vpop.trf.xlu0  ;;  %v312_v16 = vld [vmem:[#allocation2 + $0x908] sm:$0xff]  ;;  %v311_v17 = vld [vmem:[#allocation2 + $0x900] sm:$0xff] }
 0x1e5   :  { %1768 = vst [vmem:[#allocation5 + $0x688] sm:$0xff] %v907_v18  ;;  %1704 = vst [vmem:[#allocation5 + $0x488] sm:$0xff] %v875_v19 }
 0x1e8   :  { %1020 = vxpose.xlu1.b32.cont [6/16] %v198_v20, 128  ;;  %v908_v22 = vpop.trf.xlu1  ;;  %988 = vxpose.xlu0.b32.cont [6/16] %v197_v21, 128  ;;  %v876_v23 = vpop.trf.xlu0  ;;  %v320_v20 = vld [vmem:[#allocation2 + $0x948] sm:$0xff]  ;;  %v319_v21 = vld [vmem:[#allocation2 + $0x940] sm:$0xff] }
 0x1e9   :  { %1772 = vst [vmem:[#allocation5 + $0x6a8] sm:$0xff] %v908_v22  ;;  %1708 = vst [vmem:[#allocation5 + $0x4a8] sm:$0xff] %v876_v23 }
 0x1ec   :  { %1021 = vxpose.xlu1.b32.cont [7/16] %v206_v24, 128  ;;  %v909_v26 = vpop.trf.xlu1  ;;  %989 = vxpose.xlu0.b32.cont [7/16] %v205_v25, 128  ;;  %v877_v27 = vpop.trf.xlu0  ;;  %v328_v24 = vld [vmem:[#allocation2 + $0x988] sm:$0xff]  ;;  %v327_v25 = vld [vmem:[#allocation2 + $0x980] sm:$0xff] }
 0x1ed   :  { %1776 = vst [vmem:[#allocation5 + $0x6c8] sm:$0xff] %v909_v26  ;;  %1712 = vst [vmem:[#allocation5 + $0x4c8] sm:$0xff] %v877_v27 }
 0x1f0   :  { %1022 = vxpose.xlu1.b32.cont [8/16] %v214_v28, 128  ;;  %v910_v30 = vpop.trf.xlu1  ;;  %990 = vxpose.xlu0.b32.cont [8/16] %v213_v29, 128  ;;  %v878_v31 = vpop.trf.xlu0  ;;  %v336_v28 = vld [vmem:[#allocation2 + $0x9c8] sm:$0xff]  ;;  %v335_v29 = vld [vmem:[#allocation2 + $0x9c0] sm:$0xff] }
 0x1f1   :  { %1780 = vst [vmem:[#allocation5 + $0x6e8] sm:$0xff] %v910_v30  ;;  %1716 = vst [vmem:[#allocation5 + $0x4e8] sm:$0xff] %v878_v31 }
 0x1f4   :  { %1023 = vxpose.xlu1.b32.cont [9/16] %v222_v32, 128  ;;  %v911_v34 = vpop.trf.xlu1  ;;  %991 = vxpose.xlu0.b32.cont [9/16] %v221_v33, 128  ;;  %v879_v35 = vpop.trf.xlu0  ;;  %v344_v32 = vld [vmem:[#allocation2 + $0xa08] sm:$0xff]  ;;  %v343_v33 = vld [vmem:[#allocation2 + $0xa00] sm:$0xff] }
 0x1f5   :  { %1784 = vst [vmem:[#allocation5 + $0x708] sm:$0xff] %v911_v34  ;;  %1720 = vst [vmem:[#allocation5 + $0x508] sm:$0xff] %v879_v35 }
 0x1f8   :  { %1024 = vxpose.xlu1.b32.cont [10/16] %v230_v36, 128  ;;  %v912_v38 = vpop.trf.xlu1  ;;  %992 = vxpose.xlu0.b32.cont [10/16] %v229_v37, 128  ;;  %v880_v39 = vpop.trf.xlu0  ;;  %v352_v36 = vld [vmem:[#allocation2 + $0xa48] sm:$0xff]  ;;  %v351_v37 = vld [vmem:[#allocation2 + $0xa40] sm:$0xff] }
 0x1f9   :  { %1788 = vst [vmem:[#allocation5 + $0x728] sm:$0xff] %v912_v38  ;;  %1724 = vst [vmem:[#allocation5 + $0x528] sm:$0xff] %v880_v39 }
 0x1fc   :  { %1025 = vxpose.xlu1.b32.cont [11/16] %v238_v40, 128  ;;  %v913_v42 = vpop.trf.xlu1  ;;  %993 = vxpose.xlu0.b32.cont [11/16] %v237_v41, 128  ;;  %v881_v43 = vpop.trf.xlu0  ;;  %v360_v40 = vld [vmem:[#allocation2 + $0xa88] sm:$0xff]  ;;  %v359_v41 = vld [vmem:[#allocation2 + $0xa80] sm:$0xff] }
 0x1fd   :  { %1792 = vst [vmem:[#allocation5 + $0x748] sm:$0xff] %v913_v42  ;;  %1728 = vst [vmem:[#allocation5 + $0x548] sm:$0xff] %v881_v43 }
 0x200   :  { %1026 = vxpose.xlu1.b32.cont [12/16] %v246_v44, 128  ;;  %v914_v46 = vpop.trf.xlu1  ;;  %994 = vxpose.xlu0.b32.cont [12/16] %v245_v45, 128  ;;  %v882_v47 = vpop.trf.xlu0  ;;  %v368_v44 = vld [vmem:[#allocation2 + $0xac8] sm:$0xff]  ;;  %v367_v45 = vld [vmem:[#allocation2 + $0xac0] sm:$0xff] }
 0x201   :  { %1796 = vst [vmem:[#allocation5 + $0x768] sm:$0xff] %v914_v46  ;;  %1732 = vst [vmem:[#allocation5 + $0x568] sm:$0xff] %v882_v47 }
 0x204   :  { %1027 = vxpose.xlu1.b32.cont [13/16] %v254_v48, 128  ;;  %v915_v50 = vpop.trf.xlu1  ;;  %995 = vxpose.xlu0.b32.cont [13/16] %v253_v49, 128  ;;  %v883_v51 = vpop.trf.xlu0  ;;  %v376_v48 = vld [vmem:[#allocation2 + $0xb08] sm:$0xff]  ;;  %v375_v49 = vld [vmem:[#allocation2 + $0xb00] sm:$0xff] }
 0x205   :  { %1800 = vst [vmem:[#allocation5 + $0x788] sm:$0xff] %v915_v50  ;;  %1736 = vst [vmem:[#allocation5 + $0x588] sm:$0xff] %v883_v51 }
 0x208   :  { %1028 = vxpose.xlu1.b32.cont [14/16] %v262_v52, 128  ;;  %v916_v54 = vpop.trf.xlu1  ;;  %996 = vxpose.xlu0.b32.cont [14/16] %v261_v53, 128  ;;  %v884_v55 = vpop.trf.xlu0  ;;  %v384_v52 = vld [vmem:[#allocation2 + $0xb48] sm:$0xff]  ;;  %v383_v53 = vld [vmem:[#allocation2 + $0xb40] sm:$0xff] }
 0x209   :  { %1804 = vst [vmem:[#allocation5 + $0x7a8] sm:$0xff] %v916_v54  ;;  %1740 = vst [vmem:[#allocation5 + $0x5a8] sm:$0xff] %v884_v55 }
 0x20c   :  { %1029 = vxpose.xlu1.b32.cont [15/16] %v270_v56, 128  ;;  %v917_v58 = vpop.trf.xlu1  ;;  %997 = vxpose.xlu0.b32.cont [15/16] %v269_v57, 128  ;;  %v885_v59 = vpop.trf.xlu0  ;;  %v392_v56 = vld [vmem:[#allocation2 + $0xb88] sm:$0xff]  ;;  %v391_v57 = vld [vmem:[#allocation2 + $0xb80] sm:$0xff] }
 0x20d   :  { %1808 = vst [vmem:[#allocation5 + $0x7c8] sm:$0xff] %v917_v58  ;;  %1744 = vst [vmem:[#allocation5 + $0x5c8] sm:$0xff] %v885_v59 }
 0x210   :  { %1030 = vxpose.xlu1.b32.end [16/16] %v278_v60, 128  ;;  %v918_v62 = vpop.trf.xlu1  ;;  %998 = vxpose.xlu0.b32.end [16/16] %v277_v61, 128  ;;  %v886_v63 = vpop.trf.xlu0  ;;  %v400_v60 = vld [vmem:[#allocation2 + $0xbc8] sm:$0xff]  ;;  %v399_v61 = vld [vmem:[#allocation2 + $0xbc0] sm:$0xff] }
 0x211   :  { %1812 = vst [vmem:[#allocation5 + $0x7e8] sm:$0xff] %v918_v62  ;;  %1748 = vst [vmem:[#allocation5 + $0x5e8] sm:$0xff] %v886_v63 }
 0x214   :  { %1079 = vxpose.xlu1.b32.start [1/16] %v280_v0, 128  ;;  %v967_v2 = vpop.trf.xlu1  ;;  %1047 = vxpose.xlu0.b32.start [1/16] %v279_v1, 128  ;;  %v935_v3 = vpop.trf.xlu0  ;;  %v282_v0 = vld [vmem:[#allocation2 + $0x818] sm:$0xff]  ;;  %v281_v1 = vld [vmem:[#allocation2 + $0x810] sm:$0xff] }
 0x215   :  { %1880 = vst [vmem:[#allocation5 + $0xa08] sm:$0xff] %v967_v2  ;;  %1816 = vst [vmem:[#allocation5 + $0x808] sm:$0xff] %v935_v3 }
 0x218   :  { %1080 = vxpose.xlu1.b32.cont [2/16] %v288_v4, 128  ;;  %v968_v6 = vpop.trf.xlu1  ;;  %1048 = vxpose.xlu0.b32.cont [2/16] %v287_v5, 128  ;;  %v936_v7 = vpop.trf.xlu0  ;;  %v290_v4 = vld [vmem:[#allocation2 + $0x858] sm:$0xff]  ;;  %v289_v5 = vld [vmem:[#allocation2 + $0x850] sm:$0xff] }
 0x219   :  { %1884 = vst [vmem:[#allocation5 + $0xa28] sm:$0xff] %v968_v6  ;;  %1820 = vst [vmem:[#allocation5 + $0x828] sm:$0xff] %v936_v7 }
 0x21c   :  { %1081 = vxpose.xlu1.b32.cont [3/16] %v296_v8, 128  ;;  %v969_v10 = vpop.trf.xlu1  ;;  %1049 = vxpose.xlu0.b32.cont [3/16] %v295_v9, 128  ;;  %v937_v11 = vpop.trf.xlu0  ;;  %v298_v8 = vld [vmem:[#allocation2 + $0x898] sm:$0xff]  ;;  %v297_v9 = vld [vmem:[#allocation2 + $0x890] sm:$0xff] }
 0x21d   :  { %1888 = vst [vmem:[#allocation5 + $0xa48] sm:$0xff] %v969_v10  ;;  %1824 = vst [vmem:[#allocation5 + $0x848] sm:$0xff] %v937_v11 }
 0x220   :  { %1082 = vxpose.xlu1.b32.cont [4/16] %v304_v12, 128  ;;  %v970_v14 = vpop.trf.xlu1  ;;  %1050 = vxpose.xlu0.b32.cont [4/16] %v303_v13, 128  ;;  %v938_v15 = vpop.trf.xlu0  ;;  %v306_v12 = vld [vmem:[#allocation2 + $0x8d8] sm:$0xff]  ;;  %v305_v13 = vld [vmem:[#allocation2 + $0x8d0] sm:$0xff] }
 0x221   :  { %1892 = vst [vmem:[#allocation5 + $0xa68] sm:$0xff] %v970_v14  ;;  %1828 = vst [vmem:[#allocation5 + $0x868] sm:$0xff] %v938_v15 }
 0x224   :  { %1083 = vxpose.xlu1.b32.cont [5/16] %v312_v16, 128  ;;  %v971_v18 = vpop.trf.xlu1  ;;  %1051 = vxpose.xlu0.b32.cont [5/16] %v311_v17, 128  ;;  %v939_v19 = vpop.trf.xlu0  ;;  %v314_v16 = vld [vmem:[#allocation2 + $0x918] sm:$0xff]  ;;  %v313_v17 = vld [vmem:[#allocation2 + $0x910] sm:$0xff] }
 0x225   :  { %1896 = vst [vmem:[#allocation5 + $0xa88] sm:$0xff] %v971_v18  ;;  %1832 = vst [vmem:[#allocation5 + $0x888] sm:$0xff] %v939_v19 }
 0x228   :  { %1084 = vxpose.xlu1.b32.cont [6/16] %v320_v20, 128  ;;  %v972_v22 = vpop.trf.xlu1  ;;  %1052 = vxpose.xlu0.b32.cont [6/16] %v319_v21, 128  ;;  %v940_v23 = vpop.trf.xlu0  ;;  %v322_v20 = vld [vmem:[#allocation2 + $0x958] sm:$0xff]  ;;  %v321_v21 = vld [vmem:[#allocation2 + $0x950] sm:$0xff] }
 0x229   :  { %1900 = vst [vmem:[#allocation5 + $0xaa8] sm:$0xff] %v972_v22  ;;  %1836 = vst [vmem:[#allocation5 + $0x8a8] sm:$0xff] %v940_v23 }
 0x22c   :  { %1085 = vxpose.xlu1.b32.cont [7/16] %v328_v24, 128  ;;  %v973_v26 = vpop.trf.xlu1  ;;  %1053 = vxpose.xlu0.b32.cont [7/16] %v327_v25, 128  ;;  %v941_v27 = vpop.trf.xlu0  ;;  %v330_v24 = vld [vmem:[#allocation2 + $0x998] sm:$0xff]  ;;  %v329_v25 = vld [vmem:[#allocation2 + $0x990] sm:$0xff] }
 0x22d   :  { %1904 = vst [vmem:[#allocation5 + $0xac8] sm:$0xff] %v973_v26  ;;  %1840 = vst [vmem:[#allocation5 + $0x8c8] sm:$0xff] %v941_v27 }
 0x230   :  { %1086 = vxpose.xlu1.b32.cont [8/16] %v336_v28, 128  ;;  %v974_v30 = vpop.trf.xlu1  ;;  %1054 = vxpose.xlu0.b32.cont [8/16] %v335_v29, 128  ;;  %v942_v31 = vpop.trf.xlu0  ;;  %v338_v28 = vld [vmem:[#allocation2 + $0x9d8] sm:$0xff]  ;;  %v337_v29 = vld [vmem:[#allocation2 + $0x9d0] sm:$0xff] }
 0x231   :  { %1908 = vst [vmem:[#allocation5 + $0xae8] sm:$0xff] %v974_v30  ;;  %1844 = vst [vmem:[#allocation5 + $0x8e8] sm:$0xff] %v942_v31 }
 0x234   :  { %1087 = vxpose.xlu1.b32.cont [9/16] %v344_v32, 128  ;;  %v975_v34 = vpop.trf.xlu1  ;;  %1055 = vxpose.xlu0.b32.cont [9/16] %v343_v33, 128  ;;  %v943_v35 = vpop.trf.xlu0  ;;  %v346_v32 = vld [vmem:[#allocation2 + $0xa18] sm:$0xff]  ;;  %v345_v33 = vld [vmem:[#allocation2 + $0xa10] sm:$0xff] }
 0x235   :  { %1912 = vst [vmem:[#allocation5 + $0xb08] sm:$0xff] %v975_v34  ;;  %1848 = vst [vmem:[#allocation5 + $0x908] sm:$0xff] %v943_v35 }
 0x238   :  { %1088 = vxpose.xlu1.b32.cont [10/16] %v352_v36, 128  ;;  %v976_v38 = vpop.trf.xlu1  ;;  %1056 = vxpose.xlu0.b32.cont [10/16] %v351_v37, 128  ;;  %v944_v39 = vpop.trf.xlu0  ;;  %v354_v36 = vld [vmem:[#allocation2 + $0xa58] sm:$0xff]  ;;  %v353_v37 = vld [vmem:[#allocation2 + $0xa50] sm:$0xff] }
 0x239   :  { %1916 = vst [vmem:[#allocation5 + $0xb28] sm:$0xff] %v976_v38  ;;  %1852 = vst [vmem:[#allocation5 + $0x928] sm:$0xff] %v944_v39 }
 0x23c   :  { %1089 = vxpose.xlu1.b32.cont [11/16] %v360_v40, 128  ;;  %v977_v42 = vpop.trf.xlu1  ;;  %1057 = vxpose.xlu0.b32.cont [11/16] %v359_v41, 128  ;;  %v945_v43 = vpop.trf.xlu0  ;;  %v362_v40 = vld [vmem:[#allocation2 + $0xa98] sm:$0xff]  ;;  %v361_v41 = vld [vmem:[#allocation2 + $0xa90] sm:$0xff] }
 0x23d   :  { %1920 = vst [vmem:[#allocation5 + $0xb48] sm:$0xff] %v977_v42  ;;  %1856 = vst [vmem:[#allocation5 + $0x948] sm:$0xff] %v945_v43 }
 0x240   :  { %1090 = vxpose.xlu1.b32.cont [12/16] %v368_v44, 128  ;;  %v978_v46 = vpop.trf.xlu1  ;;  %1058 = vxpose.xlu0.b32.cont [12/16] %v367_v45, 128  ;;  %v946_v47 = vpop.trf.xlu0  ;;  %v370_v44 = vld [vmem:[#allocation2 + $0xad8] sm:$0xff]  ;;  %v369_v45 = vld [vmem:[#allocation2 + $0xad0] sm:$0xff] }
 0x241   :  { %1924 = vst [vmem:[#allocation5 + $0xb68] sm:$0xff] %v978_v46  ;;  %1860 = vst [vmem:[#allocation5 + $0x968] sm:$0xff] %v946_v47 }
 0x244   :  { %1091 = vxpose.xlu1.b32.cont [13/16] %v376_v48, 128  ;;  %v979_v50 = vpop.trf.xlu1  ;;  %1059 = vxpose.xlu0.b32.cont [13/16] %v375_v49, 128  ;;  %v947_v51 = vpop.trf.xlu0  ;;  %v378_v48 = vld [vmem:[#allocation2 + $0xb18] sm:$0xff]  ;;  %v377_v49 = vld [vmem:[#allocation2 + $0xb10] sm:$0xff] }
 0x245   :  { %1928 = vst [vmem:[#allocation5 + $0xb88] sm:$0xff] %v979_v50  ;;  %1864 = vst [vmem:[#allocation5 + $0x988] sm:$0xff] %v947_v51 }
 0x248   :  { %1092 = vxpose.xlu1.b32.cont [14/16] %v384_v52, 128  ;;  %v980_v54 = vpop.trf.xlu1  ;;  %1060 = vxpose.xlu0.b32.cont [14/16] %v383_v53, 128  ;;  %v948_v55 = vpop.trf.xlu0  ;;  %v386_v52 = vld [vmem:[#allocation2 + $0xb58] sm:$0xff]  ;;  %v385_v53 = vld [vmem:[#allocation2 + $0xb50] sm:$0xff] }
 0x249   :  { %1932 = vst [vmem:[#allocation5 + $0xba8] sm:$0xff] %v980_v54  ;;  %1868 = vst [vmem:[#allocation5 + $0x9a8] sm:$0xff] %v948_v55 }
 0x24c   :  { %1093 = vxpose.xlu1.b32.cont [15/16] %v392_v56, 128  ;;  %v981_v58 = vpop.trf.xlu1  ;;  %1061 = vxpose.xlu0.b32.cont [15/16] %v391_v57, 128  ;;  %v949_v59 = vpop.trf.xlu0  ;;  %v394_v56 = vld [vmem:[#allocation2 + $0xb98] sm:$0xff]  ;;  %v393_v57 = vld [vmem:[#allocation2 + $0xb90] sm:$0xff] }
 0x24d   :  { %1936 = vst [vmem:[#allocation5 + $0xbc8] sm:$0xff] %v981_v58  ;;  %1872 = vst [vmem:[#allocation5 + $0x9c8] sm:$0xff] %v949_v59 }
 0x250   :  { %1094 = vxpose.xlu1.b32.end [16/16] %v400_v60, 128  ;;  %v982_v62 = vpop.trf.xlu1  ;;  %1062 = vxpose.xlu0.b32.end [16/16] %v399_v61, 128  ;;  %v950_v63 = vpop.trf.xlu0  ;;  %v402_v60 = vld [vmem:[#allocation2 + $0xbd8] sm:$0xff]  ;;  %v401_v61 = vld [vmem:[#allocation2 + $0xbd0] sm:$0xff] }
 0x251   :  { %1940 = vst [vmem:[#allocation5 + $0xbe8] sm:$0xff] %v982_v62  ;;  %1876 = vst [vmem:[#allocation5 + $0x9e8] sm:$0xff] %v950_v63 }
 0x254   :  { %1143 = vxpose.xlu1.b32.start [1/16] %v282_v0, 128  ;;  %v1031_v2 = vpop.trf.xlu1  ;;  %1111 = vxpose.xlu0.b32.start [1/16] %v281_v1, 128  ;;  %v999_v3 = vpop.trf.xlu0  ;;  %v284_v0 = vld [vmem:[#allocation2 + $0x828] sm:$0xff]  ;;  %v283_v1 = vld [vmem:[#allocation2 + $0x820] sm:$0xff] }
 0x255   :  { %2008 = vst [vmem:[#allocation5 + $0xe08] sm:$0xff] %v1031_v2  ;;  %1944 = vst [vmem:[#allocation5 + $0xc08] sm:$0xff] %v999_v3 }
 0x258   :  { %1144 = vxpose.xlu1.b32.cont [2/16] %v290_v4, 128  ;;  %v1032_v6 = vpop.trf.xlu1  ;;  %1112 = vxpose.xlu0.b32.cont [2/16] %v289_v5, 128  ;;  %v1000_v7 = vpop.trf.xlu0  ;;  %v292_v4 = vld [vmem:[#allocation2 + $0x868] sm:$0xff]  ;;  %v291_v5 = vld [vmem:[#allocation2 + $0x860] sm:$0xff] }
 0x259   :  { %2012 = vst [vmem:[#allocation5 + $0xe28] sm:$0xff] %v1032_v6  ;;  %1948 = vst [vmem:[#allocation5 + $0xc28] sm:$0xff] %v1000_v7 }
 0x25c   :  { %1145 = vxpose.xlu1.b32.cont [3/16] %v298_v8, 128  ;;  %v1033_v10 = vpop.trf.xlu1  ;;  %1113 = vxpose.xlu0.b32.cont [3/16] %v297_v9, 128  ;;  %v1001_v11 = vpop.trf.xlu0  ;;  %v300_v8 = vld [vmem:[#allocation2 + $0x8a8] sm:$0xff]  ;;  %v299_v9 = vld [vmem:[#allocation2 + $0x8a0] sm:$0xff] }
 0x25d   :  { %2016 = vst [vmem:[#allocation5 + $0xe48] sm:$0xff] %v1033_v10  ;;  %1952 = vst [vmem:[#allocation5 + $0xc48] sm:$0xff] %v1001_v11 }
 0x260   :  { %1146 = vxpose.xlu1.b32.cont [4/16] %v306_v12, 128  ;;  %v1034_v14 = vpop.trf.xlu1  ;;  %1114 = vxpose.xlu0.b32.cont [4/16] %v305_v13, 128  ;;  %v1002_v15 = vpop.trf.xlu0  ;;  %v308_v12 = vld [vmem:[#allocation2 + $0x8e8] sm:$0xff]  ;;  %v307_v13 = vld [vmem:[#allocation2 + $0x8e0] sm:$0xff] }
 0x261   :  { %2020 = vst [vmem:[#allocation5 + $0xe68] sm:$0xff] %v1034_v14  ;;  %1956 = vst [vmem:[#allocation5 + $0xc68] sm:$0xff] %v1002_v15 }
 0x264   :  { %1147 = vxpose.xlu1.b32.cont [5/16] %v314_v16, 128  ;;  %v1035_v18 = vpop.trf.xlu1  ;;  %1115 = vxpose.xlu0.b32.cont [5/16] %v313_v17, 128  ;;  %v1003_v19 = vpop.trf.xlu0  ;;  %v316_v16 = vld [vmem:[#allocation2 + $0x928] sm:$0xff]  ;;  %v315_v17 = vld [vmem:[#allocation2 + $0x920] sm:$0xff] }
 0x265   :  { %2024 = vst [vmem:[#allocation5 + $0xe88] sm:$0xff] %v1035_v18  ;;  %1960 = vst [vmem:[#allocation5 + $0xc88] sm:$0xff] %v1003_v19 }
 0x268   :  { %1148 = vxpose.xlu1.b32.cont [6/16] %v322_v20, 128  ;;  %v1036_v22 = vpop.trf.xlu1  ;;  %1116 = vxpose.xlu0.b32.cont [6/16] %v321_v21, 128  ;;  %v1004_v23 = vpop.trf.xlu0  ;;  %v324_v20 = vld [vmem:[#allocation2 + $0x968] sm:$0xff]  ;;  %v323_v21 = vld [vmem:[#allocation2 + $0x960] sm:$0xff] }
 0x269   :  { %2028 = vst [vmem:[#allocation5 + $0xea8] sm:$0xff] %v1036_v22  ;;  %1964 = vst [vmem:[#allocation5 + $0xca8] sm:$0xff] %v1004_v23 }
 0x26c   :  { %1149 = vxpose.xlu1.b32.cont [7/16] %v330_v24, 128  ;;  %v1037_v26 = vpop.trf.xlu1  ;;  %1117 = vxpose.xlu0.b32.cont [7/16] %v329_v25, 128  ;;  %v1005_v27 = vpop.trf.xlu0  ;;  %v332_v24 = vld [vmem:[#allocation2 + $0x9a8] sm:$0xff]  ;;  %v331_v25 = vld [vmem:[#allocation2 + $0x9a0] sm:$0xff] }
 0x26d   :  { %2032 = vst [vmem:[#allocation5 + $0xec8] sm:$0xff] %v1037_v26  ;;  %1968 = vst [vmem:[#allocation5 + $0xcc8] sm:$0xff] %v1005_v27 }
 0x270   :  { %1150 = vxpose.xlu1.b32.cont [8/16] %v338_v28, 128  ;;  %v1038_v30 = vpop.trf.xlu1  ;;  %1118 = vxpose.xlu0.b32.cont [8/16] %v337_v29, 128  ;;  %v1006_v31 = vpop.trf.xlu0  ;;  %v340_v28 = vld [vmem:[#allocation2 + $0x9e8] sm:$0xff]  ;;  %v339_v29 = vld [vmem:[#allocation2 + $0x9e0] sm:$0xff] }
 0x271   :  { %2036 = vst [vmem:[#allocation5 + $0xee8] sm:$0xff] %v1038_v30  ;;  %1972 = vst [vmem:[#allocation5 + $0xce8] sm:$0xff] %v1006_v31 }
 0x274   :  { %1151 = vxpose.xlu1.b32.cont [9/16] %v346_v32, 128  ;;  %v1039_v34 = vpop.trf.xlu1  ;;  %1119 = vxpose.xlu0.b32.cont [9/16] %v345_v33, 128  ;;  %v1007_v35 = vpop.trf.xlu0  ;;  %v348_v32 = vld [vmem:[#allocation2 + $0xa28] sm:$0xff]  ;;  %v347_v33 = vld [vmem:[#allocation2 + $0xa20] sm:$0xff] }
 0x275   :  { %2040 = vst [vmem:[#allocation5 + $0xf08] sm:$0xff] %v1039_v34  ;;  %1976 = vst [vmem:[#allocation5 + $0xd08] sm:$0xff] %v1007_v35 }
 0x278   :  { %1152 = vxpose.xlu1.b32.cont [10/16] %v354_v36, 128  ;;  %v1040_v38 = vpop.trf.xlu1  ;;  %1120 = vxpose.xlu0.b32.cont [10/16] %v353_v37, 128  ;;  %v1008_v39 = vpop.trf.xlu0  ;;  %v356_v36 = vld [vmem:[#allocation2 + $0xa68] sm:$0xff]  ;;  %v355_v37 = vld [vmem:[#allocation2 + $0xa60] sm:$0xff] }
 0x279   :  { %2044 = vst [vmem:[#allocation5 + $0xf28] sm:$0xff] %v1040_v38  ;;  %1980 = vst [vmem:[#allocation5 + $0xd28] sm:$0xff] %v1008_v39 }
 0x27c   :  { %1153 = vxpose.xlu1.b32.cont [11/16] %v362_v40, 128  ;;  %v1041_v42 = vpop.trf.xlu1  ;;  %1121 = vxpose.xlu0.b32.cont [11/16] %v361_v41, 128  ;;  %v1009_v43 = vpop.trf.xlu0  ;;  %v364_v40 = vld [vmem:[#allocation2 + $0xaa8] sm:$0xff]  ;;  %v363_v41 = vld [vmem:[#allocation2 + $0xaa0] sm:$0xff] }
 0x27d   :  { %2048 = vst [vmem:[#allocation5 + $0xf48] sm:$0xff] %v1041_v42  ;;  %1984 = vst [vmem:[#allocation5 + $0xd48] sm:$0xff] %v1009_v43 }
 0x280   :  { %1154 = vxpose.xlu1.b32.cont [12/16] %v370_v44, 128  ;;  %v1042_v46 = vpop.trf.xlu1  ;;  %1122 = vxpose.xlu0.b32.cont [12/16] %v369_v45, 128  ;;  %v1010_v47 = vpop.trf.xlu0  ;;  %v372_v44 = vld [vmem:[#allocation2 + $0xae8] sm:$0xff]  ;;  %v371_v45 = vld [vmem:[#allocation2 + $0xae0] sm:$0xff] }
 0x281   :  { %2052 = vst [vmem:[#allocation5 + $0xf68] sm:$0xff] %v1042_v46  ;;  %1988 = vst [vmem:[#allocation5 + $0xd68] sm:$0xff] %v1010_v47 }
 0x284   :  { %1155 = vxpose.xlu1.b32.cont [13/16] %v378_v48, 128  ;;  %v1043_v50 = vpop.trf.xlu1  ;;  %1123 = vxpose.xlu0.b32.cont [13/16] %v377_v49, 128  ;;  %v1011_v51 = vpop.trf.xlu0  ;;  %v380_v48 = vld [vmem:[#allocation2 + $0xb28] sm:$0xff]  ;;  %v379_v49 = vld [vmem:[#allocation2 + $0xb20] sm:$0xff] }
 0x285   :  { %2056 = vst [vmem:[#allocation5 + $0xf88] sm:$0xff] %v1043_v50  ;;  %1992 = vst [vmem:[#allocation5 + $0xd88] sm:$0xff] %v1011_v51 }
 0x288   :  { %1156 = vxpose.xlu1.b32.cont [14/16] %v386_v52, 128  ;;  %v1044_v54 = vpop.trf.xlu1  ;;  %1124 = vxpose.xlu0.b32.cont [14/16] %v385_v53, 128  ;;  %v1012_v55 = vpop.trf.xlu0  ;;  %v388_v52 = vld [vmem:[#allocation2 + $0xb68] sm:$0xff]  ;;  %v387_v53 = vld [vmem:[#allocation2 + $0xb60] sm:$0xff] }
 0x289   :  { %2060 = vst [vmem:[#allocation5 + $0xfa8] sm:$0xff] %v1044_v54  ;;  %1996 = vst [vmem:[#allocation5 + $0xda8] sm:$0xff] %v1012_v55 }
 0x28c   :  { %1157 = vxpose.xlu1.b32.cont [15/16] %v394_v56, 128  ;;  %v1045_v58 = vpop.trf.xlu1  ;;  %1125 = vxpose.xlu0.b32.cont [15/16] %v393_v57, 128  ;;  %v1013_v59 = vpop.trf.xlu0  ;;  %v396_v56 = vld [vmem:[#allocation2 + $0xba8] sm:$0xff]  ;;  %v395_v57 = vld [vmem:[#allocation2 + $0xba0] sm:$0xff] }
 0x28d   :  { %2064 = vst [vmem:[#allocation5 + $0xfc8] sm:$0xff] %v1045_v58  ;;  %2000 = vst [vmem:[#allocation5 + $0xdc8] sm:$0xff] %v1013_v59 }
 0x290   :  { %1158 = vxpose.xlu1.b32.end [16/16] %v402_v60, 128  ;;  %v1046_v62 = vpop.trf.xlu1  ;;  %1126 = vxpose.xlu0.b32.end [16/16] %v401_v61, 128  ;;  %v1014_v63 = vpop.trf.xlu0  ;;  %v404_v60 = vld [vmem:[#allocation2 + $0xbe8] sm:$0xff]  ;;  %v403_v61 = vld [vmem:[#allocation2 + $0xbe0] sm:$0xff] }
 0x291   :  { %2068 = vst [vmem:[#allocation5 + $0xfe8] sm:$0xff] %v1046_v62  ;;  %2004 = vst [vmem:[#allocation5 + $0xde8] sm:$0xff] %v1014_v63 }
 0x294   :  { %1207 = vxpose.xlu1.b32.start [1/16] %v284_v0, 128  ;;  %v1095_v2 = vpop.trf.xlu1  ;;  %1175 = vxpose.xlu0.b32.start [1/16] %v283_v1, 128  ;;  %v1063_v3 = vpop.trf.xlu0  ;;  %v286_v0 = vld [vmem:[#allocation2 + $0x838] sm:$0xff]  ;;  %v285_v1 = vld [vmem:[#allocation2 + $0x830] sm:$0xff] }
 0x295   :  { %1625 = vst [vmem:[#allocation5 + $0x210] sm:$0xff] %v1095_v2  ;;  %1561 = vst [vmem:[#allocation5 + $0x10] sm:$0xff] %v1063_v3 }
 0x298   :  { %1208 = vxpose.xlu1.b32.cont [2/16] %v292_v4, 128  ;;  %v1096_v6 = vpop.trf.xlu1  ;;  %1176 = vxpose.xlu0.b32.cont [2/16] %v291_v5, 128  ;;  %v1064_v7 = vpop.trf.xlu0  ;;  %v294_v4 = vld [vmem:[#allocation2 + $0x878] sm:$0xff]  ;;  %v293_v5 = vld [vmem:[#allocation2 + $0x870] sm:$0xff] }
 0x299   :  { %1629 = vst [vmem:[#allocation5 + $0x230] sm:$0xff] %v1096_v6  ;;  %1565 = vst [vmem:[#allocation5 + $0x30] sm:$0xff] %v1064_v7 }
 0x29c   :  { %1209 = vxpose.xlu1.b32.cont [3/16] %v300_v8, 128  ;;  %v1097_v10 = vpop.trf.xlu1  ;;  %1177 = vxpose.xlu0.b32.cont [3/16] %v299_v9, 128  ;;  %v1065_v11 = vpop.trf.xlu0  ;;  %v302_v8 = vld [vmem:[#allocation2 + $0x8b8] sm:$0xff]  ;;  %v301_v9 = vld [vmem:[#allocation2 + $0x8b0] sm:$0xff] }
 0x29d   :  { %1633 = vst [vmem:[#allocation5 + $0x250] sm:$0xff] %v1097_v10  ;;  %1569 = vst [vmem:[#allocation5 + $0x50] sm:$0xff] %v1065_v11 }
 0x2a0   :  { %1210 = vxpose.xlu1.b32.cont [4/16] %v308_v12, 128  ;;  %v1098_v14 = vpop.trf.xlu1  ;;  %1178 = vxpose.xlu0.b32.cont [4/16] %v307_v13, 128  ;;  %v1066_v15 = vpop.trf.xlu0  ;;  %v310_v12 = vld [vmem:[#allocation2 + $0x8f8] sm:$0xff]  ;;  %v309_v13 = vld [vmem:[#allocation2 + $0x8f0] sm:$0xff] }
 0x2a1   :  { %1637 = vst [vmem:[#allocation5 + $0x270] sm:$0xff] %v1098_v14  ;;  %1573 = vst [vmem:[#allocation5 + $0x70] sm:$0xff] %v1066_v15 }
 0x2a4   :  { %1211 = vxpose.xlu1.b32.cont [5/16] %v316_v16, 128  ;;  %v1099_v18 = vpop.trf.xlu1  ;;  %1179 = vxpose.xlu0.b32.cont [5/16] %v315_v17, 128  ;;  %v1067_v19 = vpop.trf.xlu0  ;;  %v318_v16 = vld [vmem:[#allocation2 + $0x938] sm:$0xff]  ;;  %v317_v17 = vld [vmem:[#allocation2 + $0x930] sm:$0xff] }
 0x2a5   :  { %1641 = vst [vmem:[#allocation5 + $0x290] sm:$0xff] %v1099_v18  ;;  %1577 = vst [vmem:[#allocation5 + $0x90] sm:$0xff] %v1067_v19 }
 0x2a8   :  { %1212 = vxpose.xlu1.b32.cont [6/16] %v324_v20, 128  ;;  %v1100_v22 = vpop.trf.xlu1  ;;  %1180 = vxpose.xlu0.b32.cont [6/16] %v323_v21, 128  ;;  %v1068_v23 = vpop.trf.xlu0  ;;  %v326_v20 = vld [vmem:[#allocation2 + $0x978] sm:$0xff]  ;;  %v325_v21 = vld [vmem:[#allocation2 + $0x970] sm:$0xff] }
 0x2a9   :  { %1645 = vst [vmem:[#allocation5 + $0x2b0] sm:$0xff] %v1100_v22  ;;  %1581 = vst [vmem:[#allocation5 + $0xb0] sm:$0xff] %v1068_v23 }
 0x2ac   :  { %1213 = vxpose.xlu1.b32.cont [7/16] %v332_v24, 128  ;;  %v1101_v26 = vpop.trf.xlu1  ;;  %1181 = vxpose.xlu0.b32.cont [7/16] %v331_v25, 128  ;;  %v1069_v27 = vpop.trf.xlu0  ;;  %v334_v24 = vld [vmem:[#allocation2 + $0x9b8] sm:$0xff]  ;;  %v333_v25 = vld [vmem:[#allocation2 + $0x9b0] sm:$0xff] }
 0x2ad   :  { %1649 = vst [vmem:[#allocation5 + $0x2d0] sm:$0xff] %v1101_v26  ;;  %1585 = vst [vmem:[#allocation5 + $0xd0] sm:$0xff] %v1069_v27 }
 0x2b0   :  { %1214 = vxpose.xlu1.b32.cont [8/16] %v340_v28, 128  ;;  %v1102_v30 = vpop.trf.xlu1  ;;  %1182 = vxpose.xlu0.b32.cont [8/16] %v339_v29, 128  ;;  %v1070_v31 = vpop.trf.xlu0  ;;  %v342_v28 = vld [vmem:[#allocation2 + $0x9f8] sm:$0xff]  ;;  %v341_v29 = vld [vmem:[#allocation2 + $0x9f0] sm:$0xff] }
 0x2b1   :  { %1653 = vst [vmem:[#allocation5 + $0x2f0] sm:$0xff] %v1102_v30  ;;  %1589 = vst [vmem:[#allocation5 + $0xf0] sm:$0xff] %v1070_v31 }
 0x2b4   :  { %1215 = vxpose.xlu1.b32.cont [9/16] %v348_v32, 128  ;;  %v1103_v34 = vpop.trf.xlu1  ;;  %1183 = vxpose.xlu0.b32.cont [9/16] %v347_v33, 128  ;;  %v1071_v35 = vpop.trf.xlu0  ;;  %v350_v32 = vld [vmem:[#allocation2 + $0xa38] sm:$0xff]  ;;  %v349_v33 = vld [vmem:[#allocation2 + $0xa30] sm:$0xff] }
 0x2b5   :  { %1657 = vst [vmem:[#allocation5 + $0x310] sm:$0xff] %v1103_v34  ;;  %1593 = vst [vmem:[#allocation5 + $0x110] sm:$0xff] %v1071_v35 }
 0x2b8   :  { %1216 = vxpose.xlu1.b32.cont [10/16] %v356_v36, 128  ;;  %v1104_v38 = vpop.trf.xlu1  ;;  %1184 = vxpose.xlu0.b32.cont [10/16] %v355_v37, 128  ;;  %v1072_v39 = vpop.trf.xlu0  ;;  %v358_v36 = vld [vmem:[#allocation2 + $0xa78] sm:$0xff]  ;;  %v357_v37 = vld [vmem:[#allocation2 + $0xa70] sm:$0xff] }
 0x2b9   :  { %1661 = vst [vmem:[#allocation5 + $0x330] sm:$0xff] %v1104_v38  ;;  %1597 = vst [vmem:[#allocation5 + $0x130] sm:$0xff] %v1072_v39 }
 0x2bc   :  { %1217 = vxpose.xlu1.b32.cont [11/16] %v364_v40, 128  ;;  %v1105_v42 = vpop.trf.xlu1  ;;  %1185 = vxpose.xlu0.b32.cont [11/16] %v363_v41, 128  ;;  %v1073_v43 = vpop.trf.xlu0  ;;  %v366_v40 = vld [vmem:[#allocation2 + $0xab8] sm:$0xff]  ;;  %v365_v41 = vld [vmem:[#allocation2 + $0xab0] sm:$0xff] }
 0x2bd   :  { %1665 = vst [vmem:[#allocation5 + $0x350] sm:$0xff] %v1105_v42  ;;  %1601 = vst [vmem:[#allocation5 + $0x150] sm:$0xff] %v1073_v43 }
 0x2c0   :  { %1218 = vxpose.xlu1.b32.cont [12/16] %v372_v44, 128  ;;  %v1106_v46 = vpop.trf.xlu1  ;;  %1186 = vxpose.xlu0.b32.cont [12/16] %v371_v45, 128  ;;  %v1074_v47 = vpop.trf.xlu0  ;;  %v374_v44 = vld [vmem:[#allocation2 + $0xaf8] sm:$0xff]  ;;  %v373_v45 = vld [vmem:[#allocation2 + $0xaf0] sm:$0xff] }
 0x2c1   :  { %1669 = vst [vmem:[#allocation5 + $0x370] sm:$0xff] %v1106_v46  ;;  %1605 = vst [vmem:[#allocation5 + $0x170] sm:$0xff] %v1074_v47 }
 0x2c4   :  { %1219 = vxpose.xlu1.b32.cont [13/16] %v380_v48, 128  ;;  %v1107_v50 = vpop.trf.xlu1  ;;  %1187 = vxpose.xlu0.b32.cont [13/16] %v379_v49, 128  ;;  %v1075_v51 = vpop.trf.xlu0  ;;  %v382_v48 = vld [vmem:[#allocation2 + $0xb38] sm:$0xff]  ;;  %v381_v49 = vld [vmem:[#allocation2 + $0xb30] sm:$0xff] }
 0x2c5   :  { %1673 = vst [vmem:[#allocation5 + $0x390] sm:$0xff] %v1107_v50  ;;  %1609 = vst [vmem:[#allocation5 + $0x190] sm:$0xff] %v1075_v51 }
 0x2c8   :  { %1220 = vxpose.xlu1.b32.cont [14/16] %v388_v52, 128  ;;  %v1108_v54 = vpop.trf.xlu1  ;;  %1188 = vxpose.xlu0.b32.cont [14/16] %v387_v53, 128  ;;  %v1076_v55 = vpop.trf.xlu0  ;;  %v390_v52 = vld [vmem:[#allocation2 + $0xb78] sm:$0xff]  ;;  %v389_v53 = vld [vmem:[#allocation2 + $0xb70] sm:$0xff] }
 0x2c9   :  { %1677 = vst [vmem:[#allocation5 + $0x3b0] sm:$0xff] %v1108_v54  ;;  %1613 = vst [vmem:[#allocation5 + $0x1b0] sm:$0xff] %v1076_v55 }
 0x2cc   :  { %1221 = vxpose.xlu1.b32.cont [15/16] %v396_v56, 128  ;;  %v1109_v58 = vpop.trf.xlu1  ;;  %1189 = vxpose.xlu0.b32.cont [15/16] %v395_v57, 128  ;;  %v1077_v59 = vpop.trf.xlu0  ;;  %v398_v56 = vld [vmem:[#allocation2 + $0xbb8] sm:$0xff]  ;;  %v397_v57 = vld [vmem:[#allocation2 + $0xbb0] sm:$0xff] }
 0x2cd   :  { %1681 = vst [vmem:[#allocation5 + $0x3d0] sm:$0xff] %v1109_v58  ;;  %1617 = vst [vmem:[#allocation5 + $0x1d0] sm:$0xff] %v1077_v59 }
 0x2d0   :  { %1222 = vxpose.xlu1.b32.end [16/16] %v404_v60, 128  ;;  %v1110_v62 = vpop.trf.xlu1  ;;  %1190 = vxpose.xlu0.b32.end [16/16] %v403_v61, 128  ;;  %v1078_v63 = vpop.trf.xlu0  ;;  %v406_v60 = vld [vmem:[#allocation2 + $0xbf8] sm:$0xff]  ;;  %v405_v61 = vld [vmem:[#allocation2 + $0xbf0] sm:$0xff] }
 0x2d1   :  { %1685 = vst [vmem:[#allocation5 + $0x3f0] sm:$0xff] %v1110_v62  ;;  %1621 = vst [vmem:[#allocation5 + $0x1f0] sm:$0xff] %v1078_v63 }
 0x2d4   :  { %1271 = vxpose.xlu1.b32.start [1/16] %v286_v0, 128  ;;  %v1159_v2 = vpop.trf.xlu1  ;;  %1239 = vxpose.xlu0.b32.start [1/16] %v285_v1, 128  ;;  %v1127_v3 = vpop.trf.xlu0  ;;  %v408_v0 = vld [vmem:[#allocation2 + $0xc08] sm:$0xff]  ;;  %v407_v1 = vld [vmem:[#allocation2 + $0xc00] sm:$0xff] }
 0x2d5   :  { %1753 = vst [vmem:[#allocation5 + $0x610] sm:$0xff] %v1159_v2  ;;  %1689 = vst [vmem:[#allocation5 + $0x410] sm:$0xff] %v1127_v3 }
 0x2d8   :  { %1272 = vxpose.xlu1.b32.cont [2/16] %v294_v4, 128  ;;  %v1160_v6 = vpop.trf.xlu1  ;;  %1240 = vxpose.xlu0.b32.cont [2/16] %v293_v5, 128  ;;  %v1128_v7 = vpop.trf.xlu0  ;;  %v416_v4 = vld [vmem:[#allocation2 + $0xc48] sm:$0xff]  ;;  %v415_v5 = vld [vmem:[#allocation2 + $0xc40] sm:$0xff] }
 0x2d9   :  { %1757 = vst [vmem:[#allocation5 + $0x630] sm:$0xff] %v1160_v6  ;;  %1693 = vst [vmem:[#allocation5 + $0x430] sm:$0xff] %v1128_v7 }
 0x2dc   :  { %1273 = vxpose.xlu1.b32.cont [3/16] %v302_v8, 128  ;;  %v1161_v10 = vpop.trf.xlu1  ;;  %1241 = vxpose.xlu0.b32.cont [3/16] %v301_v9, 128  ;;  %v1129_v11 = vpop.trf.xlu0  ;;  %v424_v8 = vld [vmem:[#allocation2 + $0xc88] sm:$0xff]  ;;  %v423_v9 = vld [vmem:[#allocation2 + $0xc80] sm:$0xff] }
 0x2dd   :  { %1761 = vst [vmem:[#allocation5 + $0x650] sm:$0xff] %v1161_v10  ;;  %1697 = vst [vmem:[#allocation5 + $0x450] sm:$0xff] %v1129_v11 }
 0x2e0   :  { %1274 = vxpose.xlu1.b32.cont [4/16] %v310_v12, 128  ;;  %v1162_v14 = vpop.trf.xlu1  ;;  %1242 = vxpose.xlu0.b32.cont [4/16] %v309_v13, 128  ;;  %v1130_v15 = vpop.trf.xlu0  ;;  %v432_v12 = vld [vmem:[#allocation2 + $0xcc8] sm:$0xff]  ;;  %v431_v13 = vld [vmem:[#allocation2 + $0xcc0] sm:$0xff] }
 0x2e1   :  { %1765 = vst [vmem:[#allocation5 + $0x670] sm:$0xff] %v1162_v14  ;;  %1701 = vst [vmem:[#allocation5 + $0x470] sm:$0xff] %v1130_v15 }
 0x2e4   :  { %1275 = vxpose.xlu1.b32.cont [5/16] %v318_v16, 128  ;;  %v1163_v18 = vpop.trf.xlu1  ;;  %1243 = vxpose.xlu0.b32.cont [5/16] %v317_v17, 128  ;;  %v1131_v19 = vpop.trf.xlu0  ;;  %v440_v16 = vld [vmem:[#allocation2 + $0xd08] sm:$0xff]  ;;  %v439_v17 = vld [vmem:[#allocation2 + $0xd00] sm:$0xff] }
 0x2e5   :  { %1769 = vst [vmem:[#allocation5 + $0x690] sm:$0xff] %v1163_v18  ;;  %1705 = vst [vmem:[#allocation5 + $0x490] sm:$0xff] %v1131_v19 }
 0x2e8   :  { %1276 = vxpose.xlu1.b32.cont [6/16] %v326_v20, 128  ;;  %v1164_v22 = vpop.trf.xlu1  ;;  %1244 = vxpose.xlu0.b32.cont [6/16] %v325_v21, 128  ;;  %v1132_v23 = vpop.trf.xlu0  ;;  %v448_v20 = vld [vmem:[#allocation2 + $0xd48] sm:$0xff]  ;;  %v447_v21 = vld [vmem:[#allocation2 + $0xd40] sm:$0xff] }
 0x2e9   :  { %1773 = vst [vmem:[#allocation5 + $0x6b0] sm:$0xff] %v1164_v22  ;;  %1709 = vst [vmem:[#allocation5 + $0x4b0] sm:$0xff] %v1132_v23 }
 0x2ec   :  { %1277 = vxpose.xlu1.b32.cont [7/16] %v334_v24, 128  ;;  %v1165_v26 = vpop.trf.xlu1  ;;  %1245 = vxpose.xlu0.b32.cont [7/16] %v333_v25, 128  ;;  %v1133_v27 = vpop.trf.xlu0  ;;  %v456_v24 = vld [vmem:[#allocation2 + $0xd88] sm:$0xff]  ;;  %v455_v25 = vld [vmem:[#allocation2 + $0xd80] sm:$0xff] }
 0x2ed   :  { %1777 = vst [vmem:[#allocation5 + $0x6d0] sm:$0xff] %v1165_v26  ;;  %1713 = vst [vmem:[#allocation5 + $0x4d0] sm:$0xff] %v1133_v27 }
 0x2f0   :  { %1278 = vxpose.xlu1.b32.cont [8/16] %v342_v28, 128  ;;  %v1166_v30 = vpop.trf.xlu1  ;;  %1246 = vxpose.xlu0.b32.cont [8/16] %v341_v29, 128  ;;  %v1134_v31 = vpop.trf.xlu0  ;;  %v464_v28 = vld [vmem:[#allocation2 + $0xdc8] sm:$0xff]  ;;  %v463_v29 = vld [vmem:[#allocation2 + $0xdc0] sm:$0xff] }
 0x2f1   :  { %1781 = vst [vmem:[#allocation5 + $0x6f0] sm:$0xff] %v1166_v30  ;;  %1717 = vst [vmem:[#allocation5 + $0x4f0] sm:$0xff] %v1134_v31 }
 0x2f4   :  { %1279 = vxpose.xlu1.b32.cont [9/16] %v350_v32, 128  ;;  %v1167_v34 = vpop.trf.xlu1  ;;  %1247 = vxpose.xlu0.b32.cont [9/16] %v349_v33, 128  ;;  %v1135_v35 = vpop.trf.xlu0  ;;  %v472_v32 = vld [vmem:[#allocation2 + $0xe08] sm:$0xff]  ;;  %v471_v33 = vld [vmem:[#allocation2 + $0xe00] sm:$0xff] }
 0x2f5   :  { %1785 = vst [vmem:[#allocation5 + $0x710] sm:$0xff] %v1167_v34  ;;  %1721 = vst [vmem:[#allocation5 + $0x510] sm:$0xff] %v1135_v35 }
 0x2f8   :  { %1280 = vxpose.xlu1.b32.cont [10/16] %v358_v36, 128  ;;  %v1168_v38 = vpop.trf.xlu1  ;;  %1248 = vxpose.xlu0.b32.cont [10/16] %v357_v37, 128  ;;  %v1136_v39 = vpop.trf.xlu0  ;;  %v480_v36 = vld [vmem:[#allocation2 + $0xe48] sm:$0xff]  ;;  %v479_v37 = vld [vmem:[#allocation2 + $0xe40] sm:$0xff] }
 0x2f9   :  { %1789 = vst [vmem:[#allocation5 + $0x730] sm:$0xff] %v1168_v38  ;;  %1725 = vst [vmem:[#allocation5 + $0x530] sm:$0xff] %v1136_v39 }
 0x2fc   :  { %1281 = vxpose.xlu1.b32.cont [11/16] %v366_v40, 128  ;;  %v1169_v42 = vpop.trf.xlu1  ;;  %1249 = vxpose.xlu0.b32.cont [11/16] %v365_v41, 128  ;;  %v1137_v43 = vpop.trf.xlu0  ;;  %v488_v40 = vld [vmem:[#allocation2 + $0xe88] sm:$0xff]  ;;  %v487_v41 = vld [vmem:[#allocation2 + $0xe80] sm:$0xff] }
 0x2fd   :  { %1793 = vst [vmem:[#allocation5 + $0x750] sm:$0xff] %v1169_v42  ;;  %1729 = vst [vmem:[#allocation5 + $0x550] sm:$0xff] %v1137_v43 }
 0x300   :  { %1282 = vxpose.xlu1.b32.cont [12/16] %v374_v44, 128  ;;  %v1170_v46 = vpop.trf.xlu1  ;;  %1250 = vxpose.xlu0.b32.cont [12/16] %v373_v45, 128  ;;  %v1138_v47 = vpop.trf.xlu0  ;;  %v496_v44 = vld [vmem:[#allocation2 + $0xec8] sm:$0xff]  ;;  %v495_v45 = vld [vmem:[#allocation2 + $0xec0] sm:$0xff] }
 0x301   :  { %1797 = vst [vmem:[#allocation5 + $0x770] sm:$0xff] %v1170_v46  ;;  %1733 = vst [vmem:[#allocation5 + $0x570] sm:$0xff] %v1138_v47 }
 0x304   :  { %1283 = vxpose.xlu1.b32.cont [13/16] %v382_v48, 128  ;;  %v1171_v50 = vpop.trf.xlu1  ;;  %1251 = vxpose.xlu0.b32.cont [13/16] %v381_v49, 128  ;;  %v1139_v51 = vpop.trf.xlu0  ;;  %v504_v48 = vld [vmem:[#allocation2 + $0xf08] sm:$0xff]  ;;  %v503_v49 = vld [vmem:[#allocation2 + $0xf00] sm:$0xff] }
 0x305   :  { %1801 = vst [vmem:[#allocation5 + $0x790] sm:$0xff] %v1171_v50  ;;  %1737 = vst [vmem:[#allocation5 + $0x590] sm:$0xff] %v1139_v51 }
 0x308   :  { %1284 = vxpose.xlu1.b32.cont [14/16] %v390_v52, 128  ;;  %v1172_v54 = vpop.trf.xlu1  ;;  %1252 = vxpose.xlu0.b32.cont [14/16] %v389_v53, 128  ;;  %v1140_v55 = vpop.trf.xlu0  ;;  %v512_v52 = vld [vmem:[#allocation2 + $0xf48] sm:$0xff]  ;;  %v511_v53 = vld [vmem:[#allocation2 + $0xf40] sm:$0xff] }
 0x309   :  { %1805 = vst [vmem:[#allocation5 + $0x7b0] sm:$0xff] %v1172_v54  ;;  %1741 = vst [vmem:[#allocation5 + $0x5b0] sm:$0xff] %v1140_v55 }
 0x30c   :  { %1285 = vxpose.xlu1.b32.cont [15/16] %v398_v56, 128  ;;  %v1173_v58 = vpop.trf.xlu1  ;;  %1253 = vxpose.xlu0.b32.cont [15/16] %v397_v57, 128  ;;  %v1141_v59 = vpop.trf.xlu0  ;;  %v520_v56 = vld [vmem:[#allocation2 + $0xf88] sm:$0xff]  ;;  %v519_v57 = vld [vmem:[#allocation2 + $0xf80] sm:$0xff] }
 0x30d   :  { %1809 = vst [vmem:[#allocation5 + $0x7d0] sm:$0xff] %v1173_v58  ;;  %1745 = vst [vmem:[#allocation5 + $0x5d0] sm:$0xff] %v1141_v59 }
 0x310   :  { %1286 = vxpose.xlu1.b32.end [16/16] %v406_v60, 128  ;;  %v1174_v62 = vpop.trf.xlu1  ;;  %1254 = vxpose.xlu0.b32.end [16/16] %v405_v61, 128  ;;  %v1142_v63 = vpop.trf.xlu0  ;;  %v528_v60 = vld [vmem:[#allocation2 + $0xfc8] sm:$0xff]  ;;  %v527_v61 = vld [vmem:[#allocation2 + $0xfc0] sm:$0xff] }
 0x311   :  { %1813 = vst [vmem:[#allocation5 + $0x7f0] sm:$0xff] %v1174_v62  ;;  %1749 = vst [vmem:[#allocation5 + $0x5f0] sm:$0xff] %v1142_v63 }
 0x314   :  { %1335 = vxpose.xlu1.b32.start [1/16] %v408_v0, 128  ;;  %v1223_v2 = vpop.trf.xlu1  ;;  %1303 = vxpose.xlu0.b32.start [1/16] %v407_v1, 128  ;;  %v1191_v3 = vpop.trf.xlu0  ;;  %v410_v0 = vld [vmem:[#allocation2 + $0xc18] sm:$0xff]  ;;  %v409_v1 = vld [vmem:[#allocation2 + $0xc10] sm:$0xff] }
 0x315   :  { %1881 = vst [vmem:[#allocation5 + $0xa10] sm:$0xff] %v1223_v2  ;;  %1817 = vst [vmem:[#allocation5 + $0x810] sm:$0xff] %v1191_v3 }
 0x318   :  { %1336 = vxpose.xlu1.b32.cont [2/16] %v416_v4, 128  ;;  %v1224_v6 = vpop.trf.xlu1  ;;  %1304 = vxpose.xlu0.b32.cont [2/16] %v415_v5, 128  ;;  %v1192_v7 = vpop.trf.xlu0  ;;  %v418_v4 = vld [vmem:[#allocation2 + $0xc58] sm:$0xff]  ;;  %v417_v5 = vld [vmem:[#allocation2 + $0xc50] sm:$0xff] }
 0x319   :  { %1885 = vst [vmem:[#allocation5 + $0xa30] sm:$0xff] %v1224_v6  ;;  %1821 = vst [vmem:[#allocation5 + $0x830] sm:$0xff] %v1192_v7 }
 0x31c   :  { %1337 = vxpose.xlu1.b32.cont [3/16] %v424_v8, 128  ;;  %v1225_v10 = vpop.trf.xlu1  ;;  %1305 = vxpose.xlu0.b32.cont [3/16] %v423_v9, 128  ;;  %v1193_v11 = vpop.trf.xlu0  ;;  %v426_v8 = vld [vmem:[#allocation2 + $0xc98] sm:$0xff]  ;;  %v425_v9 = vld [vmem:[#allocation2 + $0xc90] sm:$0xff] }
 0x31d   :  { %1889 = vst [vmem:[#allocation5 + $0xa50] sm:$0xff] %v1225_v10  ;;  %1825 = vst [vmem:[#allocation5 + $0x850] sm:$0xff] %v1193_v11 }
 0x320   :  { %1338 = vxpose.xlu1.b32.cont [4/16] %v432_v12, 128  ;;  %v1226_v14 = vpop.trf.xlu1  ;;  %1306 = vxpose.xlu0.b32.cont [4/16] %v431_v13, 128  ;;  %v1194_v15 = vpop.trf.xlu0  ;;  %v434_v12 = vld [vmem:[#allocation2 + $0xcd8] sm:$0xff]  ;;  %v433_v13 = vld [vmem:[#allocation2 + $0xcd0] sm:$0xff] }
 0x321   :  { %1893 = vst [vmem:[#allocation5 + $0xa70] sm:$0xff] %v1226_v14  ;;  %1829 = vst [vmem:[#allocation5 + $0x870] sm:$0xff] %v1194_v15 }
 0x324   :  { %1339 = vxpose.xlu1.b32.cont [5/16] %v440_v16, 128  ;;  %v1227_v18 = vpop.trf.xlu1  ;;  %1307 = vxpose.xlu0.b32.cont [5/16] %v439_v17, 128  ;;  %v1195_v19 = vpop.trf.xlu0  ;;  %v442_v16 = vld [vmem:[#allocation2 + $0xd18] sm:$0xff]  ;;  %v441_v17 = vld [vmem:[#allocation2 + $0xd10] sm:$0xff] }
 0x325   :  { %1897 = vst [vmem:[#allocation5 + $0xa90] sm:$0xff] %v1227_v18  ;;  %1833 = vst [vmem:[#allocation5 + $0x890] sm:$0xff] %v1195_v19 }
 0x328   :  { %1340 = vxpose.xlu1.b32.cont [6/16] %v448_v20, 128  ;;  %v1228_v22 = vpop.trf.xlu1  ;;  %1308 = vxpose.xlu0.b32.cont [6/16] %v447_v21, 128  ;;  %v1196_v23 = vpop.trf.xlu0  ;;  %v450_v20 = vld [vmem:[#allocation2 + $0xd58] sm:$0xff]  ;;  %v449_v21 = vld [vmem:[#allocation2 + $0xd50] sm:$0xff] }
 0x329   :  { %1901 = vst [vmem:[#allocation5 + $0xab0] sm:$0xff] %v1228_v22  ;;  %1837 = vst [vmem:[#allocation5 + $0x8b0] sm:$0xff] %v1196_v23 }
 0x32c   :  { %1341 = vxpose.xlu1.b32.cont [7/16] %v456_v24, 128  ;;  %v1229_v26 = vpop.trf.xlu1  ;;  %1309 = vxpose.xlu0.b32.cont [7/16] %v455_v25, 128  ;;  %v1197_v27 = vpop.trf.xlu0  ;;  %v458_v24 = vld [vmem:[#allocation2 + $0xd98] sm:$0xff]  ;;  %v457_v25 = vld [vmem:[#allocation2 + $0xd90] sm:$0xff] }
 0x32d   :  { %1905 = vst [vmem:[#allocation5 + $0xad0] sm:$0xff] %v1229_v26  ;;  %1841 = vst [vmem:[#allocation5 + $0x8d0] sm:$0xff] %v1197_v27 }
 0x330   :  { %1342 = vxpose.xlu1.b32.cont [8/16] %v464_v28, 128  ;;  %v1230_v30 = vpop.trf.xlu1  ;;  %1310 = vxpose.xlu0.b32.cont [8/16] %v463_v29, 128  ;;  %v1198_v31 = vpop.trf.xlu0  ;;  %v466_v28 = vld [vmem:[#allocation2 + $0xdd8] sm:$0xff]  ;;  %v465_v29 = vld [vmem:[#allocation2 + $0xdd0] sm:$0xff] }
 0x331   :  { %1909 = vst [vmem:[#allocation5 + $0xaf0] sm:$0xff] %v1230_v30  ;;  %1845 = vst [vmem:[#allocation5 + $0x8f0] sm:$0xff] %v1198_v31 }
 0x334   :  { %1343 = vxpose.xlu1.b32.cont [9/16] %v472_v32, 128  ;;  %v1231_v34 = vpop.trf.xlu1  ;;  %1311 = vxpose.xlu0.b32.cont [9/16] %v471_v33, 128  ;;  %v1199_v35 = vpop.trf.xlu0  ;;  %v474_v32 = vld [vmem:[#allocation2 + $0xe18] sm:$0xff]  ;;  %v473_v33 = vld [vmem:[#allocation2 + $0xe10] sm:$0xff] }
 0x335   :  { %1913 = vst [vmem:[#allocation5 + $0xb10] sm:$0xff] %v1231_v34  ;;  %1849 = vst [vmem:[#allocation5 + $0x910] sm:$0xff] %v1199_v35 }
 0x338   :  { %1344 = vxpose.xlu1.b32.cont [10/16] %v480_v36, 128  ;;  %v1232_v38 = vpop.trf.xlu1  ;;  %1312 = vxpose.xlu0.b32.cont [10/16] %v479_v37, 128  ;;  %v1200_v39 = vpop.trf.xlu0  ;;  %v482_v36 = vld [vmem:[#allocation2 + $0xe58] sm:$0xff]  ;;  %v481_v37 = vld [vmem:[#allocation2 + $0xe50] sm:$0xff] }
 0x339   :  { %1917 = vst [vmem:[#allocation5 + $0xb30] sm:$0xff] %v1232_v38  ;;  %1853 = vst [vmem:[#allocation5 + $0x930] sm:$0xff] %v1200_v39 }
 0x33c   :  { %1345 = vxpose.xlu1.b32.cont [11/16] %v488_v40, 128  ;;  %v1233_v42 = vpop.trf.xlu1  ;;  %1313 = vxpose.xlu0.b32.cont [11/16] %v487_v41, 128  ;;  %v1201_v43 = vpop.trf.xlu0  ;;  %v490_v40 = vld [vmem:[#allocation2 + $0xe98] sm:$0xff]  ;;  %v489_v41 = vld [vmem:[#allocation2 + $0xe90] sm:$0xff] }
 0x33d   :  { %1921 = vst [vmem:[#allocation5 + $0xb50] sm:$0xff] %v1233_v42  ;;  %1857 = vst [vmem:[#allocation5 + $0x950] sm:$0xff] %v1201_v43 }
 0x340   :  { %1346 = vxpose.xlu1.b32.cont [12/16] %v496_v44, 128  ;;  %v1234_v46 = vpop.trf.xlu1  ;;  %1314 = vxpose.xlu0.b32.cont [12/16] %v495_v45, 128  ;;  %v1202_v47 = vpop.trf.xlu0  ;;  %v498_v44 = vld [vmem:[#allocation2 + $0xed8] sm:$0xff]  ;;  %v497_v45 = vld [vmem:[#allocation2 + $0xed0] sm:$0xff] }
 0x341   :  { %1925 = vst [vmem:[#allocation5 + $0xb70] sm:$0xff] %v1234_v46  ;;  %1861 = vst [vmem:[#allocation5 + $0x970] sm:$0xff] %v1202_v47 }
 0x344   :  { %1347 = vxpose.xlu1.b32.cont [13/16] %v504_v48, 128  ;;  %v1235_v50 = vpop.trf.xlu1  ;;  %1315 = vxpose.xlu0.b32.cont [13/16] %v503_v49, 128  ;;  %v1203_v51 = vpop.trf.xlu0  ;;  %v506_v48 = vld [vmem:[#allocation2 + $0xf18] sm:$0xff]  ;;  %v505_v49 = vld [vmem:[#allocation2 + $0xf10] sm:$0xff] }
 0x345   :  { %1929 = vst [vmem:[#allocation5 + $0xb90] sm:$0xff] %v1235_v50  ;;  %1865 = vst [vmem:[#allocation5 + $0x990] sm:$0xff] %v1203_v51 }
 0x348   :  { %1348 = vxpose.xlu1.b32.cont [14/16] %v512_v52, 128  ;;  %v1236_v54 = vpop.trf.xlu1  ;;  %1316 = vxpose.xlu0.b32.cont [14/16] %v511_v53, 128  ;;  %v1204_v55 = vpop.trf.xlu0  ;;  %v514_v52 = vld [vmem:[#allocation2 + $0xf58] sm:$0xff]  ;;  %v513_v53 = vld [vmem:[#allocation2 + $0xf50] sm:$0xff] }
 0x349   :  { %1933 = vst [vmem:[#allocation5 + $0xbb0] sm:$0xff] %v1236_v54  ;;  %1869 = vst [vmem:[#allocation5 + $0x9b0] sm:$0xff] %v1204_v55 }
 0x34c   :  { %1349 = vxpose.xlu1.b32.cont [15/16] %v520_v56, 128  ;;  %v1237_v58 = vpop.trf.xlu1  ;;  %1317 = vxpose.xlu0.b32.cont [15/16] %v519_v57, 128  ;;  %v1205_v59 = vpop.trf.xlu0  ;;  %v522_v56 = vld [vmem:[#allocation2 + $0xf98] sm:$0xff]  ;;  %v521_v57 = vld [vmem:[#allocation2 + $0xf90] sm:$0xff] }
 0x34d   :  { %1937 = vst [vmem:[#allocation5 + $0xbd0] sm:$0xff] %v1237_v58  ;;  %1873 = vst [vmem:[#allocation5 + $0x9d0] sm:$0xff] %v1205_v59 }
 0x350   :  { %1350 = vxpose.xlu1.b32.end [16/16] %v528_v60, 128  ;;  %v1238_v62 = vpop.trf.xlu1  ;;  %1318 = vxpose.xlu0.b32.end [16/16] %v527_v61, 128  ;;  %v1206_v63 = vpop.trf.xlu0  ;;  %v530_v60 = vld [vmem:[#allocation2 + $0xfd8] sm:$0xff]  ;;  %v529_v61 = vld [vmem:[#allocation2 + $0xfd0] sm:$0xff] }
 0x351   :  { %1941 = vst [vmem:[#allocation5 + $0xbf0] sm:$0xff] %v1238_v62  ;;  %1877 = vst [vmem:[#allocation5 + $0x9f0] sm:$0xff] %v1206_v63 }
 0x354   :  { %1399 = vxpose.xlu1.b32.start [1/16] %v410_v0, 128  ;;  %v1287_v2 = vpop.trf.xlu1  ;;  %1367 = vxpose.xlu0.b32.start [1/16] %v409_v1, 128  ;;  %v1255_v3 = vpop.trf.xlu0  ;;  %v412_v0 = vld [vmem:[#allocation2 + $0xc28] sm:$0xff]  ;;  %v411_v1 = vld [vmem:[#allocation2 + $0xc20] sm:$0xff] }
 0x355   :  { %2009 = vst [vmem:[#allocation5 + $0xe10] sm:$0xff] %v1287_v2  ;;  %1945 = vst [vmem:[#allocation5 + $0xc10] sm:$0xff] %v1255_v3 }
 0x358   :  { %1400 = vxpose.xlu1.b32.cont [2/16] %v418_v4, 128  ;;  %v1288_v6 = vpop.trf.xlu1  ;;  %1368 = vxpose.xlu0.b32.cont [2/16] %v417_v5, 128  ;;  %v1256_v7 = vpop.trf.xlu0  ;;  %v420_v4 = vld [vmem:[#allocation2 + $0xc68] sm:$0xff]  ;;  %v419_v5 = vld [vmem:[#allocation2 + $0xc60] sm:$0xff] }
 0x359   :  { %2013 = vst [vmem:[#allocation5 + $0xe30] sm:$0xff] %v1288_v6  ;;  %1949 = vst [vmem:[#allocation5 + $0xc30] sm:$0xff] %v1256_v7 }
 0x35c   :  { %1401 = vxpose.xlu1.b32.cont [3/16] %v426_v8, 128  ;;  %v1289_v10 = vpop.trf.xlu1  ;;  %1369 = vxpose.xlu0.b32.cont [3/16] %v425_v9, 128  ;;  %v1257_v11 = vpop.trf.xlu0  ;;  %v428_v8 = vld [vmem:[#allocation2 + $0xca8] sm:$0xff]  ;;  %v427_v9 = vld [vmem:[#allocation2 + $0xca0] sm:$0xff] }
 0x35d   :  { %2017 = vst [vmem:[#allocation5 + $0xe50] sm:$0xff] %v1289_v10  ;;  %1953 = vst [vmem:[#allocation5 + $0xc50] sm:$0xff] %v1257_v11 }
 0x360   :  { %1402 = vxpose.xlu1.b32.cont [4/16] %v434_v12, 128  ;;  %v1290_v14 = vpop.trf.xlu1  ;;  %1370 = vxpose.xlu0.b32.cont [4/16] %v433_v13, 128  ;;  %v1258_v15 = vpop.trf.xlu0  ;;  %v436_v12 = vld [vmem:[#allocation2 + $0xce8] sm:$0xff]  ;;  %v435_v13 = vld [vmem:[#allocation2 + $0xce0] sm:$0xff] }
 0x361   :  { %2021 = vst [vmem:[#allocation5 + $0xe70] sm:$0xff] %v1290_v14  ;;  %1957 = vst [vmem:[#allocation5 + $0xc70] sm:$0xff] %v1258_v15 }
 0x364   :  { %1403 = vxpose.xlu1.b32.cont [5/16] %v442_v16, 128  ;;  %v1291_v18 = vpop.trf.xlu1  ;;  %1371 = vxpose.xlu0.b32.cont [5/16] %v441_v17, 128  ;;  %v1259_v19 = vpop.trf.xlu0  ;;  %v444_v16 = vld [vmem:[#allocation2 + $0xd28] sm:$0xff]  ;;  %v443_v17 = vld [vmem:[#allocation2 + $0xd20] sm:$0xff] }
 0x365   :  { %2025 = vst [vmem:[#allocation5 + $0xe90] sm:$0xff] %v1291_v18  ;;  %1961 = vst [vmem:[#allocation5 + $0xc90] sm:$0xff] %v1259_v19 }
 0x368   :  { %1404 = vxpose.xlu1.b32.cont [6/16] %v450_v20, 128  ;;  %v1292_v22 = vpop.trf.xlu1  ;;  %1372 = vxpose.xlu0.b32.cont [6/16] %v449_v21, 128  ;;  %v1260_v23 = vpop.trf.xlu0  ;;  %v452_v20 = vld [vmem:[#allocation2 + $0xd68] sm:$0xff]  ;;  %v451_v21 = vld [vmem:[#allocation2 + $0xd60] sm:$0xff] }
 0x369   :  { %2029 = vst [vmem:[#allocation5 + $0xeb0] sm:$0xff] %v1292_v22  ;;  %1965 = vst [vmem:[#allocation5 + $0xcb0] sm:$0xff] %v1260_v23 }
 0x36c   :  { %1405 = vxpose.xlu1.b32.cont [7/16] %v458_v24, 128  ;;  %v1293_v26 = vpop.trf.xlu1  ;;  %1373 = vxpose.xlu0.b32.cont [7/16] %v457_v25, 128  ;;  %v1261_v27 = vpop.trf.xlu0  ;;  %v460_v24 = vld [vmem:[#allocation2 + $0xda8] sm:$0xff]  ;;  %v459_v25 = vld [vmem:[#allocation2 + $0xda0] sm:$0xff] }
 0x36d   :  { %2033 = vst [vmem:[#allocation5 + $0xed0] sm:$0xff] %v1293_v26  ;;  %1969 = vst [vmem:[#allocation5 + $0xcd0] sm:$0xff] %v1261_v27 }
 0x370   :  { %1406 = vxpose.xlu1.b32.cont [8/16] %v466_v28, 128  ;;  %v1294_v30 = vpop.trf.xlu1  ;;  %1374 = vxpose.xlu0.b32.cont [8/16] %v465_v29, 128  ;;  %v1262_v31 = vpop.trf.xlu0  ;;  %v468_v28 = vld [vmem:[#allocation2 + $0xde8] sm:$0xff]  ;;  %v467_v29 = vld [vmem:[#allocation2 + $0xde0] sm:$0xff] }
 0x371   :  { %2037 = vst [vmem:[#allocation5 + $0xef0] sm:$0xff] %v1294_v30  ;;  %1973 = vst [vmem:[#allocation5 + $0xcf0] sm:$0xff] %v1262_v31 }
 0x374   :  { %1407 = vxpose.xlu1.b32.cont [9/16] %v474_v32, 128  ;;  %v1295_v34 = vpop.trf.xlu1  ;;  %1375 = vxpose.xlu0.b32.cont [9/16] %v473_v33, 128  ;;  %v1263_v35 = vpop.trf.xlu0  ;;  %v476_v32 = vld [vmem:[#allocation2 + $0xe28] sm:$0xff]  ;;  %v475_v33 = vld [vmem:[#allocation2 + $0xe20] sm:$0xff] }
 0x375   :  { %2041 = vst [vmem:[#allocation5 + $0xf10] sm:$0xff] %v1295_v34  ;;  %1977 = vst [vmem:[#allocation5 + $0xd10] sm:$0xff] %v1263_v35 }
 0x378   :  { %1408 = vxpose.xlu1.b32.cont [10/16] %v482_v36, 128  ;;  %v1296_v38 = vpop.trf.xlu1  ;;  %1376 = vxpose.xlu0.b32.cont [10/16] %v481_v37, 128  ;;  %v1264_v39 = vpop.trf.xlu0  ;;  %v484_v36 = vld [vmem:[#allocation2 + $0xe68] sm:$0xff]  ;;  %v483_v37 = vld [vmem:[#allocation2 + $0xe60] sm:$0xff] }
 0x379   :  { %2045 = vst [vmem:[#allocation5 + $0xf30] sm:$0xff] %v1296_v38  ;;  %1981 = vst [vmem:[#allocation5 + $0xd30] sm:$0xff] %v1264_v39 }
 0x37c   :  { %1409 = vxpose.xlu1.b32.cont [11/16] %v490_v40, 128  ;;  %v1297_v42 = vpop.trf.xlu1  ;;  %1377 = vxpose.xlu0.b32.cont [11/16] %v489_v41, 128  ;;  %v1265_v43 = vpop.trf.xlu0  ;;  %v492_v40 = vld [vmem:[#allocation2 + $0xea8] sm:$0xff]  ;;  %v491_v41 = vld [vmem:[#allocation2 + $0xea0] sm:$0xff] }
 0x37d   :  { %2049 = vst [vmem:[#allocation5 + $0xf50] sm:$0xff] %v1297_v42  ;;  %1985 = vst [vmem:[#allocation5 + $0xd50] sm:$0xff] %v1265_v43 }
 0x380   :  { %1410 = vxpose.xlu1.b32.cont [12/16] %v498_v44, 128  ;;  %v1298_v46 = vpop.trf.xlu1  ;;  %1378 = vxpose.xlu0.b32.cont [12/16] %v497_v45, 128  ;;  %v1266_v47 = vpop.trf.xlu0  ;;  %v500_v44 = vld [vmem:[#allocation2 + $0xee8] sm:$0xff]  ;;  %v499_v45 = vld [vmem:[#allocation2 + $0xee0] sm:$0xff] }
 0x381   :  { %2053 = vst [vmem:[#allocation5 + $0xf70] sm:$0xff] %v1298_v46  ;;  %1989 = vst [vmem:[#allocation5 + $0xd70] sm:$0xff] %v1266_v47 }
 0x384   :  { %1411 = vxpose.xlu1.b32.cont [13/16] %v506_v48, 128  ;;  %v1299_v50 = vpop.trf.xlu1  ;;  %1379 = vxpose.xlu0.b32.cont [13/16] %v505_v49, 128  ;;  %v1267_v51 = vpop.trf.xlu0  ;;  %v508_v48 = vld [vmem:[#allocation2 + $0xf28] sm:$0xff]  ;;  %v507_v49 = vld [vmem:[#allocation2 + $0xf20] sm:$0xff] }
 0x385   :  { %2057 = vst [vmem:[#allocation5 + $0xf90] sm:$0xff] %v1299_v50  ;;  %1993 = vst [vmem:[#allocation5 + $0xd90] sm:$0xff] %v1267_v51 }
 0x388   :  { %1412 = vxpose.xlu1.b32.cont [14/16] %v514_v52, 128  ;;  %v1300_v54 = vpop.trf.xlu1  ;;  %1380 = vxpose.xlu0.b32.cont [14/16] %v513_v53, 128  ;;  %v1268_v55 = vpop.trf.xlu0  ;;  %v516_v52 = vld [vmem:[#allocation2 + $0xf68] sm:$0xff]  ;;  %v515_v53 = vld [vmem:[#allocation2 + $0xf60] sm:$0xff] }
 0x389   :  { %2061 = vst [vmem:[#allocation5 + $0xfb0] sm:$0xff] %v1300_v54  ;;  %1997 = vst [vmem:[#allocation5 + $0xdb0] sm:$0xff] %v1268_v55 }
 0x38c   :  { %1413 = vxpose.xlu1.b32.cont [15/16] %v522_v56, 128  ;;  %v1301_v58 = vpop.trf.xlu1  ;;  %1381 = vxpose.xlu0.b32.cont [15/16] %v521_v57, 128  ;;  %v1269_v59 = vpop.trf.xlu0  ;;  %v524_v56 = vld [vmem:[#allocation2 + $0xfa8] sm:$0xff]  ;;  %v523_v57 = vld [vmem:[#allocation2 + $0xfa0] sm:$0xff] }
 0x38d   :  { %2065 = vst [vmem:[#allocation5 + $0xfd0] sm:$0xff] %v1301_v58  ;;  %2001 = vst [vmem:[#allocation5 + $0xdd0] sm:$0xff] %v1269_v59 }
 0x390   :  { %1414 = vxpose.xlu1.b32.end [16/16] %v530_v60, 128  ;;  %v1302_v62 = vpop.trf.xlu1  ;;  %1382 = vxpose.xlu0.b32.end [16/16] %v529_v61, 128  ;;  %v1270_v63 = vpop.trf.xlu0  ;;  %v532_v60 = vld [vmem:[#allocation2 + $0xfe8] sm:$0xff]  ;;  %v531_v61 = vld [vmem:[#allocation2 + $0xfe0] sm:$0xff] }
 0x391   :  { %2069 = vst [vmem:[#allocation5 + $0xff0] sm:$0xff] %v1302_v62  ;;  %2005 = vst [vmem:[#allocation5 + $0xdf0] sm:$0xff] %v1270_v63 }
 0x394   :  { %1463 = vxpose.xlu1.b32.start [1/16] %v412_v0, 128  ;;  %v1351_v2 = vpop.trf.xlu1  ;;  %1431 = vxpose.xlu0.b32.start [1/16] %v411_v1, 128  ;;  %v1319_v3 = vpop.trf.xlu0  ;;  %v414_v0 = vld [vmem:[#allocation2 + $0xc38] sm:$0xff]  ;;  %v413_v1 = vld [vmem:[#allocation2 + $0xc30] sm:$0xff] }
 0x395   :  { %1626 = vst [vmem:[#allocation5 + $0x218] sm:$0xff] %v1351_v2  ;;  %1562 = vst [vmem:[#allocation5 + $0x18] sm:$0xff] %v1319_v3 }
 0x398   :  { %1464 = vxpose.xlu1.b32.cont [2/16] %v420_v4, 128  ;;  %v1352_v6 = vpop.trf.xlu1  ;;  %1432 = vxpose.xlu0.b32.cont [2/16] %v419_v5, 128  ;;  %v1320_v7 = vpop.trf.xlu0  ;;  %v422_v4 = vld [vmem:[#allocation2 + $0xc78] sm:$0xff]  ;;  %v421_v5 = vld [vmem:[#allocation2 + $0xc70] sm:$0xff] }
 0x399   :  { %1630 = vst [vmem:[#allocation5 + $0x238] sm:$0xff] %v1352_v6  ;;  %1566 = vst [vmem:[#allocation5 + $0x38] sm:$0xff] %v1320_v7 }
 0x39c   :  { %1465 = vxpose.xlu1.b32.cont [3/16] %v428_v8, 128  ;;  %v1353_v10 = vpop.trf.xlu1  ;;  %1433 = vxpose.xlu0.b32.cont [3/16] %v427_v9, 128  ;;  %v1321_v11 = vpop.trf.xlu0  ;;  %v430_v8 = vld [vmem:[#allocation2 + $0xcb8] sm:$0xff]  ;;  %v429_v9 = vld [vmem:[#allocation2 + $0xcb0] sm:$0xff] }
 0x39d   :  { %1634 = vst [vmem:[#allocation5 + $0x258] sm:$0xff] %v1353_v10  ;;  %1570 = vst [vmem:[#allocation5 + $0x58] sm:$0xff] %v1321_v11 }
 0x3a0   :  { %1466 = vxpose.xlu1.b32.cont [4/16] %v436_v12, 128  ;;  %v1354_v14 = vpop.trf.xlu1  ;;  %1434 = vxpose.xlu0.b32.cont [4/16] %v435_v13, 128  ;;  %v1322_v15 = vpop.trf.xlu0  ;;  %v438_v12 = vld [vmem:[#allocation2 + $0xcf8] sm:$0xff]  ;;  %v437_v13 = vld [vmem:[#allocation2 + $0xcf0] sm:$0xff] }
 0x3a1   :  { %1638 = vst [vmem:[#allocation5 + $0x278] sm:$0xff] %v1354_v14  ;;  %1574 = vst [vmem:[#allocation5 + $0x78] sm:$0xff] %v1322_v15 }
 0x3a4   :  { %1467 = vxpose.xlu1.b32.cont [5/16] %v444_v16, 128  ;;  %v1355_v18 = vpop.trf.xlu1  ;;  %1435 = vxpose.xlu0.b32.cont [5/16] %v443_v17, 128  ;;  %v1323_v19 = vpop.trf.xlu0  ;;  %v446_v16 = vld [vmem:[#allocation2 + $0xd38] sm:$0xff]  ;;  %v445_v17 = vld [vmem:[#allocation2 + $0xd30] sm:$0xff] }
 0x3a5   :  { %1642 = vst [vmem:[#allocation5 + $0x298] sm:$0xff] %v1355_v18  ;;  %1578 = vst [vmem:[#allocation5 + $0x98] sm:$0xff] %v1323_v19 }
 0x3a8   :  { %1468 = vxpose.xlu1.b32.cont [6/16] %v452_v20, 128  ;;  %v1356_v22 = vpop.trf.xlu1  ;;  %1436 = vxpose.xlu0.b32.cont [6/16] %v451_v21, 128  ;;  %v1324_v23 = vpop.trf.xlu0  ;;  %v454_v20 = vld [vmem:[#allocation2 + $0xd78] sm:$0xff]  ;;  %v453_v21 = vld [vmem:[#allocation2 + $0xd70] sm:$0xff] }
 0x3a9   :  { %1646 = vst [vmem:[#allocation5 + $0x2b8] sm:$0xff] %v1356_v22  ;;  %1582 = vst [vmem:[#allocation5 + $0xb8] sm:$0xff] %v1324_v23 }
 0x3ac   :  { %1469 = vxpose.xlu1.b32.cont [7/16] %v460_v24, 128  ;;  %v1357_v26 = vpop.trf.xlu1  ;;  %1437 = vxpose.xlu0.b32.cont [7/16] %v459_v25, 128  ;;  %v1325_v27 = vpop.trf.xlu0  ;;  %v462_v24 = vld [vmem:[#allocation2 + $0xdb8] sm:$0xff]  ;;  %v461_v25 = vld [vmem:[#allocation2 + $0xdb0] sm:$0xff] }
 0x3ad   :  { %1650 = vst [vmem:[#allocation5 + $0x2d8] sm:$0xff] %v1357_v26  ;;  %1586 = vst [vmem:[#allocation5 + $0xd8] sm:$0xff] %v1325_v27 }
 0x3b0   :  { %1470 = vxpose.xlu1.b32.cont [8/16] %v468_v28, 128  ;;  %v1358_v30 = vpop.trf.xlu1  ;;  %1438 = vxpose.xlu0.b32.cont [8/16] %v467_v29, 128  ;;  %v1326_v31 = vpop.trf.xlu0  ;;  %v470_v28 = vld [vmem:[#allocation2 + $0xdf8] sm:$0xff]  ;;  %v469_v29 = vld [vmem:[#allocation2 + $0xdf0] sm:$0xff] }
 0x3b1   :  { %1654 = vst [vmem:[#allocation5 + $0x2f8] sm:$0xff] %v1358_v30  ;;  %1590 = vst [vmem:[#allocation5 + $0xf8] sm:$0xff] %v1326_v31 }
 0x3b4   :  { %1471 = vxpose.xlu1.b32.cont [9/16] %v476_v32, 128  ;;  %v1359_v34 = vpop.trf.xlu1  ;;  %1439 = vxpose.xlu0.b32.cont [9/16] %v475_v33, 128  ;;  %v1327_v35 = vpop.trf.xlu0  ;;  %v478_v32 = vld [vmem:[#allocation2 + $0xe38] sm:$0xff]  ;;  %v477_v33 = vld [vmem:[#allocation2 + $0xe30] sm:$0xff] }
 0x3b5   :  { %1658 = vst [vmem:[#allocation5 + $0x318] sm:$0xff] %v1359_v34  ;;  %1594 = vst [vmem:[#allocation5 + $0x118] sm:$0xff] %v1327_v35 }
 0x3b8   :  { %1472 = vxpose.xlu1.b32.cont [10/16] %v484_v36, 128  ;;  %v1360_v38 = vpop.trf.xlu1  ;;  %1440 = vxpose.xlu0.b32.cont [10/16] %v483_v37, 128  ;;  %v1328_v39 = vpop.trf.xlu0  ;;  %v486_v36 = vld [vmem:[#allocation2 + $0xe78] sm:$0xff]  ;;  %v485_v37 = vld [vmem:[#allocation2 + $0xe70] sm:$0xff] }
 0x3b9   :  { %1662 = vst [vmem:[#allocation5 + $0x338] sm:$0xff] %v1360_v38  ;;  %1598 = vst [vmem:[#allocation5 + $0x138] sm:$0xff] %v1328_v39 }
 0x3bc   :  { %1473 = vxpose.xlu1.b32.cont [11/16] %v492_v40, 128  ;;  %v1361_v42 = vpop.trf.xlu1  ;;  %1441 = vxpose.xlu0.b32.cont [11/16] %v491_v41, 128  ;;  %v1329_v43 = vpop.trf.xlu0  ;;  %v494_v40 = vld [vmem:[#allocation2 + $0xeb8] sm:$0xff]  ;;  %v493_v41 = vld [vmem:[#allocation2 + $0xeb0] sm:$0xff] }
 0x3bd   :  { %1666 = vst [vmem:[#allocation5 + $0x358] sm:$0xff] %v1361_v42  ;;  %1602 = vst [vmem:[#allocation5 + $0x158] sm:$0xff] %v1329_v43 }
 0x3c0   :  { %1474 = vxpose.xlu1.b32.cont [12/16] %v500_v44, 128  ;;  %v1362_v46 = vpop.trf.xlu1  ;;  %1442 = vxpose.xlu0.b32.cont [12/16] %v499_v45, 128  ;;  %v1330_v47 = vpop.trf.xlu0  ;;  %v502_v44 = vld [vmem:[#allocation2 + $0xef8] sm:$0xff]  ;;  %v501_v45 = vld [vmem:[#allocation2 + $0xef0] sm:$0xff] }
 0x3c1   :  { %1670 = vst [vmem:[#allocation5 + $0x378] sm:$0xff] %v1362_v46  ;;  %1606 = vst [vmem:[#allocation5 + $0x178] sm:$0xff] %v1330_v47 }
 0x3c4   :  { %1475 = vxpose.xlu1.b32.cont [13/16] %v508_v48, 128  ;;  %v1363_v50 = vpop.trf.xlu1  ;;  %1443 = vxpose.xlu0.b32.cont [13/16] %v507_v49, 128  ;;  %v1331_v51 = vpop.trf.xlu0  ;;  %v510_v48 = vld [vmem:[#allocation2 + $0xf38] sm:$0xff]  ;;  %v509_v49 = vld [vmem:[#allocation2 + $0xf30] sm:$0xff] }
 0x3c5   :  { %1674 = vst [vmem:[#allocation5 + $0x398] sm:$0xff] %v1363_v50  ;;  %1610 = vst [vmem:[#allocation5 + $0x198] sm:$0xff] %v1331_v51 }
 0x3c8   :  { %1476 = vxpose.xlu1.b32.cont [14/16] %v516_v52, 128  ;;  %v1364_v54 = vpop.trf.xlu1  ;;  %1444 = vxpose.xlu0.b32.cont [14/16] %v515_v53, 128  ;;  %v1332_v55 = vpop.trf.xlu0  ;;  %v518_v52 = vld [vmem:[#allocation2 + $0xf78] sm:$0xff]  ;;  %v517_v53 = vld [vmem:[#allocation2 + $0xf70] sm:$0xff] }
 0x3c9   :  { %1678 = vst [vmem:[#allocation5 + $0x3b8] sm:$0xff] %v1364_v54  ;;  %1614 = vst [vmem:[#allocation5 + $0x1b8] sm:$0xff] %v1332_v55 }
 0x3cc   :  { %1477 = vxpose.xlu1.b32.cont [15/16] %v524_v56, 128  ;;  %v1365_v58 = vpop.trf.xlu1  ;;  %1445 = vxpose.xlu0.b32.cont [15/16] %v523_v57, 128  ;;  %v1333_v59 = vpop.trf.xlu0  ;;  %v526_v56 = vld [vmem:[#allocation2 + $0xfb8] sm:$0xff]  ;;  %v525_v57 = vld [vmem:[#allocation2 + $0xfb0] sm:$0xff] }
 0x3cd   :  { %1682 = vst [vmem:[#allocation5 + $0x3d8] sm:$0xff] %v1365_v58  ;;  %1618 = vst [vmem:[#allocation5 + $0x1d8] sm:$0xff] %v1333_v59 }
 0x3d0   :  { %1478 = vxpose.xlu1.b32.end [16/16] %v532_v60, 128  ;;  %v1366_v62 = vpop.trf.xlu1  ;;  %1446 = vxpose.xlu0.b32.end [16/16] %v531_v61, 128  ;;  %v1334_v63 = vpop.trf.xlu0  ;;  %v534_v60 = vld [vmem:[#allocation2 + $0xff8] sm:$0xff]  ;;  %v533_v61 = vld [vmem:[#allocation2 + $0xff0] sm:$0xff] }
 0x3d1   :  { %1686 = vst [vmem:[#allocation5 + $0x3f8] sm:$0xff] %v1366_v62  ;;  %1622 = vst [vmem:[#allocation5 + $0x1f8] sm:$0xff] %v1334_v63 }
 0x3d4   :  { %1527 = vxpose.xlu1.b32.start [1/16] %v414_v0, 128  ;;  %v1415_v2 = vpop.trf.xlu1  ;;  %1495 = vxpose.xlu0.b32.start [1/16] %v413_v1, 128  ;;  %v1383_v3 = vpop.trf.xlu0 }
 0x3d5   :  { %1754 = vst [vmem:[#allocation5 + $0x618] sm:$0xff] %v1415_v2  ;;  %1690 = vst [vmem:[#allocation5 + $0x418] sm:$0xff] %v1383_v3 }
 0x3d8   :  { %1528 = vxpose.xlu1.b32.cont [2/16] %v422_v4, 128  ;;  %v1416_v6 = vpop.trf.xlu1  ;;  %1496 = vxpose.xlu0.b32.cont [2/16] %v421_v5, 128  ;;  %v1384_v7 = vpop.trf.xlu0 }
 0x3d9   :  { %1758 = vst [vmem:[#allocation5 + $0x638] sm:$0xff] %v1416_v6  ;;  %1694 = vst [vmem:[#allocation5 + $0x438] sm:$0xff] %v1384_v7 }
 0x3dc   :  { %1529 = vxpose.xlu1.b32.cont [3/16] %v430_v8, 128  ;;  %v1417_v10 = vpop.trf.xlu1  ;;  %1497 = vxpose.xlu0.b32.cont [3/16] %v429_v9, 128  ;;  %v1385_v11 = vpop.trf.xlu0 }
 0x3dd   :  { %1762 = vst [vmem:[#allocation5 + $0x658] sm:$0xff] %v1417_v10  ;;  %1698 = vst [vmem:[#allocation5 + $0x458] sm:$0xff] %v1385_v11 }
 0x3e0   :  { %1530 = vxpose.xlu1.b32.cont [4/16] %v438_v12, 128  ;;  %v1418_v14 = vpop.trf.xlu1  ;;  %1498 = vxpose.xlu0.b32.cont [4/16] %v437_v13, 128  ;;  %v1386_v15 = vpop.trf.xlu0 }
 0x3e1   :  { %1766 = vst [vmem:[#allocation5 + $0x678] sm:$0xff] %v1418_v14  ;;  %1702 = vst [vmem:[#allocation5 + $0x478] sm:$0xff] %v1386_v15 }
 0x3e4   :  { %1531 = vxpose.xlu1.b32.cont [5/16] %v446_v16, 128  ;;  %v1419_v18 = vpop.trf.xlu1  ;;  %1499 = vxpose.xlu0.b32.cont [5/16] %v445_v17, 128  ;;  %v1387_v19 = vpop.trf.xlu0 }
 0x3e5   :  { %1770 = vst [vmem:[#allocation5 + $0x698] sm:$0xff] %v1419_v18  ;;  %1706 = vst [vmem:[#allocation5 + $0x498] sm:$0xff] %v1387_v19 }
 0x3e8   :  { %1532 = vxpose.xlu1.b32.cont [6/16] %v454_v20, 128  ;;  %v1420_v22 = vpop.trf.xlu1  ;;  %1500 = vxpose.xlu0.b32.cont [6/16] %v453_v21, 128  ;;  %v1388_v23 = vpop.trf.xlu0 }
 0x3e9   :  { %1774 = vst [vmem:[#allocation5 + $0x6b8] sm:$0xff] %v1420_v22  ;;  %1710 = vst [vmem:[#allocation5 + $0x4b8] sm:$0xff] %v1388_v23 }
 0x3ec   :  { %1533 = vxpose.xlu1.b32.cont [7/16] %v462_v24, 128  ;;  %v1421_v26 = vpop.trf.xlu1  ;;  %1501 = vxpose.xlu0.b32.cont [7/16] %v461_v25, 128  ;;  %v1389_v27 = vpop.trf.xlu0 }
 0x3ed   :  { %1778 = vst [vmem:[#allocation5 + $0x6d8] sm:$0xff] %v1421_v26  ;;  %1714 = vst [vmem:[#allocation5 + $0x4d8] sm:$0xff] %v1389_v27 }
 0x3f0   :  { %1534 = vxpose.xlu1.b32.cont [8/16] %v470_v28, 128  ;;  %v1422_v30 = vpop.trf.xlu1  ;;  %1502 = vxpose.xlu0.b32.cont [8/16] %v469_v29, 128  ;;  %v1390_v31 = vpop.trf.xlu0 }
 0x3f1   :  { %1782 = vst [vmem:[#allocation5 + $0x6f8] sm:$0xff] %v1422_v30  ;;  %1718 = vst [vmem:[#allocation5 + $0x4f8] sm:$0xff] %v1390_v31 }
 0x3f4   :  { %1535 = vxpose.xlu1.b32.cont [9/16] %v478_v32, 128  ;;  %v1423_v34 = vpop.trf.xlu1  ;;  %1503 = vxpose.xlu0.b32.cont [9/16] %v477_v33, 128  ;;  %v1391_v35 = vpop.trf.xlu0 }
 0x3f5   :  { %1786 = vst [vmem:[#allocation5 + $0x718] sm:$0xff] %v1423_v34  ;;  %1722 = vst [vmem:[#allocation5 + $0x518] sm:$0xff] %v1391_v35 }
 0x3f8   :  { %1536 = vxpose.xlu1.b32.cont [10/16] %v486_v36, 128  ;;  %v1424_v38 = vpop.trf.xlu1  ;;  %1504 = vxpose.xlu0.b32.cont [10/16] %v485_v37, 128  ;;  %v1392_v39 = vpop.trf.xlu0 }
 0x3f9   :  { %1790 = vst [vmem:[#allocation5 + $0x738] sm:$0xff] %v1424_v38  ;;  %1726 = vst [vmem:[#allocation5 + $0x538] sm:$0xff] %v1392_v39 }
 0x3fc   :  { %1537 = vxpose.xlu1.b32.cont [11/16] %v494_v40, 128  ;;  %v1425_v42 = vpop.trf.xlu1  ;;  %1505 = vxpose.xlu0.b32.cont [11/16] %v493_v41, 128  ;;  %v1393_v43 = vpop.trf.xlu0 }
 0x3fd   :  { %1794 = vst [vmem:[#allocation5 + $0x758] sm:$0xff] %v1425_v42  ;;  %1730 = vst [vmem:[#allocation5 + $0x558] sm:$0xff] %v1393_v43 }
 0x400   :  { %1538 = vxpose.xlu1.b32.cont [12/16] %v502_v44, 128  ;;  %v1426_v46 = vpop.trf.xlu1  ;;  %1506 = vxpose.xlu0.b32.cont [12/16] %v501_v45, 128  ;;  %v1394_v47 = vpop.trf.xlu0 }
 0x401   :  { %1798 = vst [vmem:[#allocation5 + $0x778] sm:$0xff] %v1426_v46  ;;  %1734 = vst [vmem:[#allocation5 + $0x578] sm:$0xff] %v1394_v47 }
 0x404   :  { %1539 = vxpose.xlu1.b32.cont [13/16] %v510_v48, 128  ;;  %v1427_v50 = vpop.trf.xlu1  ;;  %1507 = vxpose.xlu0.b32.cont [13/16] %v509_v49, 128  ;;  %v1395_v51 = vpop.trf.xlu0 }
 0x405   :  { %1802 = vst [vmem:[#allocation5 + $0x798] sm:$0xff] %v1427_v50  ;;  %1738 = vst [vmem:[#allocation5 + $0x598] sm:$0xff] %v1395_v51 }
 0x408   :  { %1540 = vxpose.xlu1.b32.cont [14/16] %v518_v52, 128  ;;  %v1428_v54 = vpop.trf.xlu1  ;;  %1508 = vxpose.xlu0.b32.cont [14/16] %v517_v53, 128  ;;  %v1396_v55 = vpop.trf.xlu0 }
 0x409   :  { %1806 = vst [vmem:[#allocation5 + $0x7b8] sm:$0xff] %v1428_v54  ;;  %1742 = vst [vmem:[#allocation5 + $0x5b8] sm:$0xff] %v1396_v55 }
 0x40c   :  { %1541 = vxpose.xlu1.b32.cont [15/16] %v526_v56, 128  ;;  %v1429_v58 = vpop.trf.xlu1  ;;  %1509 = vxpose.xlu0.b32.cont [15/16] %v525_v57, 128  ;;  %v1397_v59 = vpop.trf.xlu0 }
 0x40d   :  { %1810 = vst [vmem:[#allocation5 + $0x7d8] sm:$0xff] %v1429_v58  ;;  %1746 = vst [vmem:[#allocation5 + $0x5d8] sm:$0xff] %v1397_v59 }
 0x410   :  { %1542 = vxpose.xlu1.b32.end [16/16] %v534_v60, 128  ;;  %v1430_v62 = vpop.trf.xlu1  ;;  %1510 = vxpose.xlu0.b32.end [16/16] %v533_v61, 128  ;;  %v1398_v63 = vpop.trf.xlu0 }
 0x411   :  { %1814 = vst [vmem:[#allocation5 + $0x7f8] sm:$0xff] %v1430_v62  ;;  %1750 = vst [vmem:[#allocation5 + $0x5f8] sm:$0xff] %v1398_v63 }
 0x414   :  { %v1479_v0 = vpop.trf.xlu1  ;;  %v1447_v1 = vpop.trf.xlu0 }
 0x415   :  { %1882 = vst [vmem:[#allocation5 + $0xa18] sm:$0xff] %v1479_v0  ;;  %1818 = vst [vmem:[#allocation5 + $0x818] sm:$0xff] %v1447_v1 }
 0x418   :  { %v1480_v2 = vpop.trf.xlu1  ;;  %v1448_v3 = vpop.trf.xlu0 }
 0x419   :  { %1886 = vst [vmem:[#allocation5 + $0xa38] sm:$0xff] %v1480_v2  ;;  %1822 = vst [vmem:[#allocation5 + $0x838] sm:$0xff] %v1448_v3 }
 0x41c   :  { %v1481_v4 = vpop.trf.xlu1  ;;  %v1449_v5 = vpop.trf.xlu0 }
 0x41d   :  { %1890 = vst [vmem:[#allocation5 + $0xa58] sm:$0xff] %v1481_v4  ;;  %1826 = vst [vmem:[#allocation5 + $0x858] sm:$0xff] %v1449_v5 }
 0x420   :  { %v1482_v6 = vpop.trf.xlu1  ;;  %v1450_v7 = vpop.trf.xlu0 }
 0x421   :  { %1894 = vst [vmem:[#allocation5 + $0xa78] sm:$0xff] %v1482_v6  ;;  %1830 = vst [vmem:[#allocation5 + $0x878] sm:$0xff] %v1450_v7 }
 0x424   :  { %v1483_v8 = vpop.trf.xlu1  ;;  %v1451_v9 = vpop.trf.xlu0 }
 0x425   :  { %1898 = vst [vmem:[#allocation5 + $0xa98] sm:$0xff] %v1483_v8  ;;  %1834 = vst [vmem:[#allocation5 + $0x898] sm:$0xff] %v1451_v9 }
 0x428   :  { %v1484_v10 = vpop.trf.xlu1  ;;  %v1452_v11 = vpop.trf.xlu0 }
 0x429   :  { %1902 = vst [vmem:[#allocation5 + $0xab8] sm:$0xff] %v1484_v10  ;;  %1838 = vst [vmem:[#allocation5 + $0x8b8] sm:$0xff] %v1452_v11 }
 0x42c   :  { %v1485_v12 = vpop.trf.xlu1  ;;  %v1453_v13 = vpop.trf.xlu0 }
 0x42d   :  { %1906 = vst [vmem:[#allocation5 + $0xad8] sm:$0xff] %v1485_v12  ;;  %1842 = vst [vmem:[#allocation5 + $0x8d8] sm:$0xff] %v1453_v13 }
 0x430   :  { %v1486_v14 = vpop.trf.xlu1  ;;  %v1454_v15 = vpop.trf.xlu0 }
 0x431   :  { %1910 = vst [vmem:[#allocation5 + $0xaf8] sm:$0xff] %v1486_v14  ;;  %1846 = vst [vmem:[#allocation5 + $0x8f8] sm:$0xff] %v1454_v15 }
 0x434   :  { %v1487_v16 = vpop.trf.xlu1  ;;  %v1455_v17 = vpop.trf.xlu0 }
 0x435   :  { %1914 = vst [vmem:[#allocation5 + $0xb18] sm:$0xff] %v1487_v16  ;;  %1850 = vst [vmem:[#allocation5 + $0x918] sm:$0xff] %v1455_v17 }
 0x438   :  { %v1488_v18 = vpop.trf.xlu1  ;;  %v1456_v19 = vpop.trf.xlu0 }
 0x439   :  { %1918 = vst [vmem:[#allocation5 + $0xb38] sm:$0xff] %v1488_v18  ;;  %1854 = vst [vmem:[#allocation5 + $0x938] sm:$0xff] %v1456_v19 }
 0x43c   :  { %v1489_v20 = vpop.trf.xlu1  ;;  %v1457_v21 = vpop.trf.xlu0 }
 0x43d   :  { %1922 = vst [vmem:[#allocation5 + $0xb58] sm:$0xff] %v1489_v20  ;;  %1858 = vst [vmem:[#allocation5 + $0x958] sm:$0xff] %v1457_v21 }
 0x440   :  { %v1490_v22 = vpop.trf.xlu1  ;;  %v1458_v23 = vpop.trf.xlu0 }
 0x441   :  { %1926 = vst [vmem:[#allocation5 + $0xb78] sm:$0xff] %v1490_v22  ;;  %1862 = vst [vmem:[#allocation5 + $0x978] sm:$0xff] %v1458_v23 }
 0x444   :  { %v1491_v24 = vpop.trf.xlu1  ;;  %v1459_v25 = vpop.trf.xlu0 }
 0x445   :  { %1930 = vst [vmem:[#allocation5 + $0xb98] sm:$0xff] %v1491_v24  ;;  %1866 = vst [vmem:[#allocation5 + $0x998] sm:$0xff] %v1459_v25 }
 0x448   :  { %v1492_v26 = vpop.trf.xlu1  ;;  %v1460_v27 = vpop.trf.xlu0 }
 0x449   :  { %1934 = vst [vmem:[#allocation5 + $0xbb8] sm:$0xff] %v1492_v26  ;;  %1870 = vst [vmem:[#allocation5 + $0x9b8] sm:$0xff] %v1460_v27 }
 0x44c   :  { %v1493_v28 = vpop.trf.xlu1  ;;  %v1461_v29 = vpop.trf.xlu0 }
 0x44d   :  { %1938 = vst [vmem:[#allocation5 + $0xbd8] sm:$0xff] %v1493_v28  ;;  %1874 = vst [vmem:[#allocation5 + $0x9d8] sm:$0xff] %v1461_v29 }
 0x450   :  { %v1494_v30 = vpop.trf.xlu1  ;;  %v1462_v31 = vpop.trf.xlu0 }
 0x451   :  { %1942 = vst [vmem:[#allocation5 + $0xbf8] sm:$0xff] %v1494_v30  ;;  %1878 = vst [vmem:[#allocation5 + $0x9f8] sm:$0xff] %v1462_v31 }
 0x454   :  { %v1543_v32 = vpop.trf.xlu1  ;;  %v1511_v33 = vpop.trf.xlu0 }
 0x455   :  { %2010 = vst [vmem:[#allocation5 + $0xe18] sm:$0xff] %v1543_v32  ;;  %1946 = vst [vmem:[#allocation5 + $0xc18] sm:$0xff] %v1511_v33 }
 0x458   :  { %v1544_v34 = vpop.trf.xlu1  ;;  %v1512_v35 = vpop.trf.xlu0 }
 0x459   :  { %2014 = vst [vmem:[#allocation5 + $0xe38] sm:$0xff] %v1544_v34  ;;  %1950 = vst [vmem:[#allocation5 + $0xc38] sm:$0xff] %v1512_v35 }
 0x45c   :  { %v1545_v36 = vpop.trf.xlu1  ;;  %v1513_v37 = vpop.trf.xlu0 }
 0x45d   :  { %2018 = vst [vmem:[#allocation5 + $0xe58] sm:$0xff] %v1545_v36  ;;  %1954 = vst [vmem:[#allocation5 + $0xc58] sm:$0xff] %v1513_v37 }
 0x460   :  { %v1546_v38 = vpop.trf.xlu1  ;;  %v1514_v39 = vpop.trf.xlu0 }
 0x461   :  { %2022 = vst [vmem:[#allocation5 + $0xe78] sm:$0xff] %v1546_v38  ;;  %1958 = vst [vmem:[#allocation5 + $0xc78] sm:$0xff] %v1514_v39 }
 0x464   :  { %v1547_v40 = vpop.trf.xlu1  ;;  %v1515_v41 = vpop.trf.xlu0 }
 0x465   :  { %2026 = vst [vmem:[#allocation5 + $0xe98] sm:$0xff] %v1547_v40  ;;  %1962 = vst [vmem:[#allocation5 + $0xc98] sm:$0xff] %v1515_v41 }
 0x468   :  { %v1548_v42 = vpop.trf.xlu1  ;;  %v1516_v43 = vpop.trf.xlu0 }
 0x469   :  { %2030 = vst [vmem:[#allocation5 + $0xeb8] sm:$0xff] %v1548_v42  ;;  %1966 = vst [vmem:[#allocation5 + $0xcb8] sm:$0xff] %v1516_v43 }
 0x46c   :  { %v1549_v44 = vpop.trf.xlu1  ;;  %v1517_v45 = vpop.trf.xlu0 }
 0x46d   :  { %2034 = vst [vmem:[#allocation5 + $0xed8] sm:$0xff] %v1549_v44  ;;  %1970 = vst [vmem:[#allocation5 + $0xcd8] sm:$0xff] %v1517_v45 }
 0x470   :  { %v1550_v46 = vpop.trf.xlu1  ;;  %v1518_v47 = vpop.trf.xlu0 }
 0x471   :  { %2038 = vst [vmem:[#allocation5 + $0xef8] sm:$0xff] %v1550_v46  ;;  %1974 = vst [vmem:[#allocation5 + $0xcf8] sm:$0xff] %v1518_v47 }
 0x474   :  { %v1551_v48 = vpop.trf.xlu1  ;;  %v1519_v49 = vpop.trf.xlu0 }
 0x475   :  { %2042 = vst [vmem:[#allocation5 + $0xf18] sm:$0xff] %v1551_v48  ;;  %1978 = vst [vmem:[#allocation5 + $0xd18] sm:$0xff] %v1519_v49 }
 0x478   :  { %v1552_v50 = vpop.trf.xlu1  ;;  %v1520_v51 = vpop.trf.xlu0 }
 0x479   :  { %2046 = vst [vmem:[#allocation5 + $0xf38] sm:$0xff] %v1552_v50  ;;  %1982 = vst [vmem:[#allocation5 + $0xd38] sm:$0xff] %v1520_v51 }
 0x47c   :  { %v1553_v52 = vpop.trf.xlu1  ;;  %v1521_v53 = vpop.trf.xlu0 }
 0x47d   :  { %2050 = vst [vmem:[#allocation5 + $0xf58] sm:$0xff] %v1553_v52  ;;  %1986 = vst [vmem:[#allocation5 + $0xd58] sm:$0xff] %v1521_v53 }
 0x480   :  { %v1554_v54 = vpop.trf.xlu1  ;;  %v1522_v55 = vpop.trf.xlu0 }
 0x481   :  { %2054 = vst [vmem:[#allocation5 + $0xf78] sm:$0xff] %v1554_v54  ;;  %1990 = vst [vmem:[#allocation5 + $0xd78] sm:$0xff] %v1522_v55 }
 0x484   :  { %v1555_v56 = vpop.trf.xlu1  ;;  %v1523_v57 = vpop.trf.xlu0 }
 0x485   :  { %2058 = vst [vmem:[#allocation5 + $0xf98] sm:$0xff] %v1555_v56  ;;  %1994 = vst [vmem:[#allocation5 + $0xd98] sm:$0xff] %v1523_v57 }
 0x488   :  { %v1556_v58 = vpop.trf.xlu1  ;;  %v1524_v59 = vpop.trf.xlu0 }
 0x489   :  { %2062 = vst [vmem:[#allocation5 + $0xfb8] sm:$0xff] %v1556_v58  ;;  %1998 = vst [vmem:[#allocation5 + $0xdb8] sm:$0xff] %v1524_v59 }
 0x48c   :  { %v1557_v60 = vpop.trf.xlu1  ;;  %v1525_v61 = vpop.trf.xlu0 }
 0x48d   :  { %2066 = vst [vmem:[#allocation5 + $0xfd8] sm:$0xff] %v1557_v60  ;;  %2002 = vst [vmem:[#allocation5 + $0xdd8] sm:$0xff] %v1525_v61 }
 0x490   :  { %v1558_v62 = vpop.trf.xlu1  ;;  %v1526_v63 = vpop.trf.xlu0 }
 0x491   :  { %2070 = vst [vmem:[#allocation5 + $0xff8] sm:$0xff] %v1558_v62  ;;  %2006 = vst [vmem:[#allocation5 + $0xdf8] sm:$0xff] %v1526_v63 }
 0x492   :  { %2127 = shalt.err (!%p2124_p12)
}
 0x493   :  { %s2128_s24 = scalar_lea.hbm %s2183_s1, 65536 }
 0x494   :  { %p2129_p13 = scmp.ne.s32.totalorder %s2183_s1, %s2128_s24  ;;  %p2132_p0 = scmp.lt.u32.totalorder %s2128_s24, %s2183_s1 }
 0x496   :  { %p2134_p1 = pnand %p2132_p0, %p2129_p13 }
 0x498   :  { %2137 = shalt.err (!%p2134_p1)
}
 0x499   :  { %s2146_s29 = smov 512   ;;  %s2147_s30 = smov 32  }
 0x49a   :  { %2082 = dma.vmem_to_hbm [thread:$0]  %s2077_s20, 65536, %s2183_s1, [#allocation4], %s2146_s29, %s2146_s29, %s2147_s30  }
 0x49b   :  { %2140 = dma.done.wait [#allocation4], 65536  }
 0x49c   :  { %2141 = vsyncadd [#allocation4], 4294901760 }
 0x49d   :  { %2086 = vsyncpa [#allocation3], 1 }
 0x49e   :  { %2087 = vsyncpa [#allocation4], 1 }

</bundles_post_ra>
